<compile_context>
chip_gen: v5e
topology: v5e:2x2
jax: 0.10.0
libtpu: 0.0.40
codegen_flags: <defaults>
</compile_context>

<pallas_src>
import jax
import jax.numpy as jnp
import numpy as np
from jax import lax
from jax.experimental import pallas as pl
from jax.experimental.pallas import tpu as pltpu

KSIZE = 5            # conv kernel size of the torch module
K1_PAD = 32          # conv1 contraction dim 25 -> 32
C1_PAD = 32          # conv1 output channels 24 -> 32 (=> conv2 K = 32*25 = 800)
FC_LANES = 128       # fc hidden padded 120 -> 128
NUM_CLASSES = 10

_VMEM = pl.BlockSpec(memory_space=pltpu.MemorySpace.VMEM)


def _pad_to(x, size, axis):
    pad = size - x.shape[axis]
    if pad <= 0:
        return x
    cfg = [(0, 0)] * x.ndim
    cfg[axis] = (0, pad)
    return jnp.pad(x, cfg)


# ----------------------------------------------------------------------------
# Pallas kernels
# ----------------------------------------------------------------------------
def conv1_relu_pool(p1, w1m, b1m, oh, ow):
    """Fused conv1 + bias + ReLU + 2x2 max-pool (one MXU matmul, VPU max).

    p1:  (B*oh*ow, K1_PAD) im2col patches, rows ordered (b, oh, ow).
    Returns (B*oh*ow, C1_PAD): at even-even (oh, ow) rows the value is the
    pooled activation of the 2x2 window anchored there; other rows are
    don't-care filler (never read downstream).
    """
    rows, _ = p1.shape
    valid = rows - (ow + 1)

    def kernel(p_ref, w_ref, b_ref, o_ref):
        c = jnp.dot(p_ref[...], w_ref[...], preferred_element_type=jnp.float32)
        c = jnp.maximum(c + b_ref[...], 0.0)                     # (rows, C1_PAD)
        # 2x2 max-pool == max over the 4 row shifts {0, 1, ow, ow+1}; the
        # result is only meaningful (and only consumed) at even-even rows.
        p4 = jnp.maximum(jnp.maximum(c[0:valid], c[1:valid + 1]),
                         jnp.maximum(c[ow:ow + valid], c[ow + 1:ow + 1 + valid]))
        o_ref[...] = jnp.concatenate(
            [p4, jnp.zeros((ow + 1, C1_PAD), jnp.float32)], axis=0)

    return pl.pallas_call(
        kernel,
        out_shape=jax.ShapeDtypeStruct((rows, C1_PAD), jnp.float32),
        in_specs=[_VMEM, _VMEM, _VMEM],
        out_specs=_VMEM,
    )(p1, w1m, b1m)


def conv2_fc_head(p2, w2m, b2m, wf1m, bf1m, wf2m, bf2m, batch, oh, ow):
    """Fused conv2 + bias + ReLU + 2x2 max-pool + fc1 + ReLU + fc2 + log_softmax.

    p2: (batch*oh*ow, 800) im2col patches of the pooled conv1 output, rows
        ordered (b, oh, ow).  Output: (batch, NUM_CLASSES) log-probabilities.
    """
    ph, pw = oh // 2, ow // 2
    rows = batch * oh * ow
    valid = rows - (ow + 1)
    c2 = w2m.shape[1]                                    # 48 real channels

    def kernel(p_ref, w_ref, b_ref, wf1_ref, bf1_ref, wf2_ref, bf2_ref, o_ref):
        c = jnp.dot(p_ref[...], w_ref[...], preferred_element_type=jnp.float32)
        c = jnp.maximum(c + b_ref[...], 0.0)                     # (rows, 48)
        p4 = jnp.maximum(jnp.maximum(c[0:valid], c[1:valid + 1]),
                         jnp.maximum(c[ow:ow + valid], c[ow + 1:ow + 1 + valid]))
        # Gather the pooled 4x4x48 map per batch element and flatten it (NHWC
        # order, matching the permuted fc1 weight) into a 768-wide fc1 row via
        # static single-row slices + lane concatenation (stays in VMEM).
        brows = []
        for b in range(batch):
            blocks = []
            for i in range(ph):
                for j in range(pw):
                    r = b * oh * ow + (2 * i) * ow + 2 * j
                    blocks.append(p4[r:r + 1, :])
            brows.append(jnp.concatenate(blocks, axis=1))        # (1, ph*pw*48)
        flat = jnp.concatenate(brows, axis=0)                    # (batch, 768)
        h = jnp.dot(flat, wf1_ref[...], preferred_element_type=jnp.float32)
        h = jnp.maximum(h + bf1_ref[...], 0.0)                   # (batch, 128)
        logits = jnp.dot(h, wf2_ref[...], preferred_element_type=jnp.float32)
        logits = (logits + bf2_ref[...])[:, :NUM_CLASSES]        # real classes
        m = jnp.max(logits, axis=-1, keepdims=True)
        z = logits - m
        lse = jnp.log(jnp.sum(jnp.exp(z), axis=-1, keepdims=True))
        o_ref[...] = z - lse

    return pl.pallas_call(
        kernel,
        out_shape=jax.ShapeDtypeStruct((batch, NUM_CLASSES), jnp.float32),
        in_specs=[_VMEM] * 7,
        out_specs=_VMEM,
    )(p2, w2m, b2m, wf1m, bf1m, wf2m, bf2m)


# ----------------------------------------------------------------------------
# One-time parameter re-layout (torch layout -> kernel layout)
# ----------------------------------------------------------------------------
def prepare_params(params):
    w1, b1 = params["w1"], params["b1"]      # (24,1,5,5), (24,)
    w2, b2 = params["w2"], params["b2"]      # (48,24,5,5), (48,)
    wf1, bf1 = params["wf1"], params["bf1"]  # (120,768), (120,)
    wf2, bf2 = params["wf2"], params["bf2"]  # (10,120), (10,)

    oc1, _, k1, _ = w1.shape
    oc2, _, k2, _ = w2.shape
    nf1 = wf1.shape[0]

    # conv1: (oc,1,k,k) -> (k*k, oc), padded to (32, 32); padded bias lanes = 0.
    w1m = _pad_to(_pad_to(w1.reshape(oc1, k1 * k1).T, K1_PAD, 0), C1_PAD, 1)
    b1m = _pad_to(b1[None, :], C1_PAD, 1)

    # conv2: pad input channels 24 -> 32 to match conv1's output lanes, flatten
    # in the patches feature order (c, ki, kj): (800, 48).
    w2p = _pad_to(w2, C1_PAD, 1)                          # (48, 32, 5, 5)
    w2m = w2p.reshape(oc2, C1_PAD * k2 * k2).T            # (800, 48)
    b2m = b2[None, :]                                     # (1, 48)

    # fc1: permute columns from torch's (c, ph, pw) flatten to the kernel's
    # (ph, pw, c) flatten; output features padded 120 -> 128: (768, 128).
    wf1t = wf1.reshape(nf1, oc2, 4, 4)                    # (f, c, ph, pw)
    wf1t = jnp.transpose(wf1t, (2, 3, 1, 0))              # (ph, pw, c, f)
    wf1m = _pad_to(wf1t.reshape(4 * 4 * oc2, nf1), FC_LANES, 1)
    bf1m = _pad_to(bf1[None, :], FC_LANES, 1)

    # fc2: (10, 120) -> (128, 128); padded rows/cols are zero (the kernel only
    # reads the first NUM_CLASSES logit lanes, so no -inf trick is needed).
    wf2m = _pad_to(_pad_to(wf2.T, FC_LANES, 0), FC_LANES, 1)
    bf2m = _pad_to(bf2[None, :], FC_LANES, 1)

    return dict(w1=w1m, b1=b1m, w2=w2m, b2=b2m,
                wf1=wf1m, bf1=bf1m, wf2=wf2m, bf2=bf2m)


# ----------------------------------------------------------------------------
# Forward pass
# ----------------------------------------------------------------------------
def net_forward(x_nchw, prep):
    """Forward pass matching torch NetConv.forward.  x_nchw: (B, 1, 28, 28)."""
    B, _, H, W = x_nchw.shape
    k = KSIZE
    oh1, ow1 = H - k + 1, W - k + 1                       # 24, 24
    x = x_nchw.reshape(B, H, W, 1)                        # NHWC (C=1: pure reshape)

    # conv1 im2col (single XLA op), K padded 25 -> 32, rows (b, oh, ow).
    p1 = lax.conv_general_dilated_patches(
        x, (k, k), (1, 1), "VALID",
        dimension_numbers=("NHWC", "HWIO", "NHWC"),
        precision=lax.Precision.HIGHEST)                  # (B, 24, 24, 25)
    p1 = _pad_to(p1, K1_PAD, 3).reshape(B * oh1 * ow1, K1_PAD)

    # Kernel 1: conv1 + ReLU + 2x2 max-pool (pool max stored at even-even rows).
    a1 = conv1_relu_pool(p1, prep["w1"], prep["b1"], oh1, ow1)
    a1 = a1.reshape(B, oh1, ow1, C1_PAD)

    # conv2 im2col with window stride 2 + kernel dilation 2: this reads exactly
    # the even-even (i.e. pooled) positions of a1, so the pool's stride-2
    # subsampling costs no separate op and no transpose.  K2 = 32*25 = 800.
    oh2 = oh1 // 2 - k + 1                                # 8
    ow2 = ow1 // 2 - k + 1                                # 8
    p2 = lax.conv_general_dilated_patches(
        a1, (k, k), (2, 2), "VALID", rhs_dilation=(2, 2),
        dimension_numbers=("NHWC", "HWIO", "NHWC"),
        precision=lax.Precision.HIGHEST)                  # (B, 8, 8, 800)
    p2 = p2.reshape(B * oh2 * ow2, C1_PAD * k * k)

    # Kernel 2: conv2 + ReLU + pool + fc1 + ReLU + fc2 + log_softmax.
    return conv2_fc_head(p2, prep["w2"], prep["b2"],
                         prep["wf1"], prep["bf1"], prep["wf2"], prep["bf2"],
                         B, oh2, ow2)


# ----------------------------------------------------------------------------
# Pure-JAX reference (guards conv weight flatten / patch feature ordering)
# ----------------------------------------------------------------------------
def ref_forward(x, params):
    def pool(h):
        B, C, H, W = h.shape
        return h.reshape(B, C, H // 2, 2, W // 2, 2).max(axis=(3, 5))

    hp = lax.Precision.HIGHEST
    h = lax.conv(x, params["w1"], (1, 1), "VALID", precision=hp)
    h = pool(jnp.maximum(h + params["b1"][None, :, None, None], 0.0))
    h = lax.conv(h, params["w2"], (1, 1), "VALID", precision=hp)
    h = pool(jnp.maximum(h + params["b2"][None, :, None, None], 0.0))
    flat = h.reshape(h.shape[0], -1)
    f1 = jnp.maximum(jnp.dot(flat, params["wf1"].T, precision=hp) + params["bf1"], 0.0)
    logits = jnp.dot(f1, params["wf2"].T, precision=hp) + params["bf2"]
    return jax.nn.log_softmax(logits, axis=1)


# ----------------------------------------------------------------------------
if __name__ == "__main__":
    key = jax.random.PRNGKey(0)
    ks = jax.random.split(key, 9)
    params = {
        "w1": 0.1 * jax.random.normal(ks[0], (24, 1, 5, 5), jnp.float32),
        "b1": 0.1 * jax.random.normal(ks[1], (24,), jnp.float32),
        "w2": 0.05 * jax.random.normal(ks[2], (48, 24, 5, 5), jnp.float32),
        "b2": 0.05 * jax.random.normal(ks[3], (48,), jnp.float32),
        "wf1": 0.05 * jax.random.normal(ks[4], (120, 48 * 4 * 4), jnp.float32),
        "bf1": 0.05 * jax.random.normal(ks[5], (120,), jnp.float32),
        "wf2": 0.1 * jax.random.normal(ks[6], (10, 120), jnp.float32),
        "bf2": 0.1 * jax.random.normal(ks[7], (10,), jnp.float32),
    }
    # MNIST-like input: fc1's 48*4*4 input dimension implies 28x28 spatial.
    x = jax.random.normal(ks[8], (2, 1, 28, 28), jnp.float32)

    prep = prepare_params(params)            # one-time weight re-layout
    out = jax.jit(net_forward)(x, prep)
    out = jax.block_until_ready(out)

    ref = ref_forward(x, params)
    assert out.shape == (2, NUM_CLASSES)
    np.testing.assert_allclose(np.asarray(out), np.asarray(ref), rtol=1e-4, atol=1e-4)

    print("KERNEL_OK")
</pallas_src>

<mosaic_0001>
module attributes {stable_mosaic.version = 11 : i64} {
  func.func @kernel(%arg0: memref<1152x32xf32, #tpu.memory_space<vmem>>, %arg1: memref<32x32xf32, #tpu.memory_space<vmem>>, %arg2: memref<1x32xf32, #tpu.memory_space<vmem>>, %arg3: memref<1152x32xf32, #tpu.memory_space<vmem>>) attributes {dimension_semantics = [], scalar_prefetch = 0 : i64, scratch_operands = 0 : i64, tpu.core_type = #tpu.core_type<tc>} {
    %c0 = arith.constant 0 : index
    %c0_0 = arith.constant 0 : index
    %0 = vector.load %arg0[%c0, %c0_0] : memref<1152x32xf32, #tpu.memory_space<vmem>>, vector<1152x32xf32>
    %c0_1 = arith.constant 0 : index
    %c0_2 = arith.constant 0 : index
    %1 = vector.load %arg1[%c0_1, %c0_2] : memref<32x32xf32, #tpu.memory_space<vmem>>, vector<32x32xf32>
    %cst = arith.constant dense<0.000000e+00> : vector<1152x32xf32>
    %2 = tpu.matmul %0, %1, %cst {dimension_numbers = #tpu.dot_dimension_numbers<[1], [0], [0], [1], [0, 0, 1, 1], [], []>} : vector<1152x32xf32>, vector<32x32xf32>, vector<1152x32xf32> -> vector<1152x32xf32>
    %c0_3 = arith.constant 0 : index
    %c0_4 = arith.constant 0 : index
    %3 = vector.load %arg2[%c0_3, %c0_4] : memref<1x32xf32, #tpu.memory_space<vmem>>, vector<1x32xf32>
    %4 = vector.broadcast %3 : vector<1x32xf32> to vector<1152x32xf32>
    %5 = arith.addf %2, %4 : vector<1152x32xf32>
    %cst_5 = arith.constant 0.000000e+00 : f32
    %6 = vector.broadcast %cst_5 : f32 to vector<1152x32xf32>
    %7 = arith.maximumf %5, %6 : vector<1152x32xf32>
    %8 = vector.extract_strided_slice %7 {offsets = [0, 0], sizes = [1127, 32], strides = [1, 1]} : vector<1152x32xf32> to vector<1127x32xf32>
    %9 = vector.extract_strided_slice %7 {offsets = [1, 0], sizes = [1127, 32], strides = [1, 1]} : vector<1152x32xf32> to vector<1127x32xf32>
    %10 = arith.maximumf %8, %9 : vector<1127x32xf32>
    %11 = vector.extract_strided_slice %7 {offsets = [24, 0], sizes = [1127, 32], strides = [1, 1]} : vector<1152x32xf32> to vector<1127x32xf32>
    %12 = vector.extract_strided_slice %7 {offsets = [25, 0], sizes = [1127, 32], strides = [1, 1]} : vector<1152x32xf32> to vector<1127x32xf32>
    %13 = arith.maximumf %11, %12 : vector<1127x32xf32>
    %14 = arith.maximumf %10, %13 : vector<1127x32xf32>
    %cst_6 = arith.constant 0.000000e+00 : f32
    %15 = vector.broadcast %cst_6 : f32 to vector<25x32xf32>
    %16 = tpu.concatenate %14, %15 in 0 : vector<1127x32xf32>, vector<25x32xf32> -> vector<1152x32xf32>
    %c0_7 = arith.constant 0 : index
    %c0_8 = arith.constant 0 : index
    %17 = vector.load %arg3[%c0_7, %c0_8] : memref<1152x32xf32, #tpu.memory_space<vmem>>, vector<1152x32xf32>
    tpu.vector_store %arg3[%c0_7, %c0_8], %16 {strides = array<i32>} : memref<1152x32xf32, #tpu.memory_space<vmem>>, vector<1152x32xf32>,
    return
  }
}

module attributes {stable_mosaic.version = 11 : i64} {
  func.func @kernel(%arg0: memref<128x800xf32, #tpu.memory_space<vmem>>, %arg1: memref<800x48xf32, #tpu.memory_space<vmem>>, %arg2: memref<1x48xf32, #tpu.memory_space<vmem>>, %arg3: memref<768x128xf32, #tpu.memory_space<vmem>>, %arg4: memref<1x128xf32, #tpu.memory_space<vmem>>, %arg5: memref<128x128xf32, #tpu.memory_space<vmem>>, %arg6: memref<1x128xf32, #tpu.memory_space<vmem>>, %arg7: memref<2x10xf32, #tpu.memory_space<vmem>>) attributes {dimension_semantics = [], scalar_prefetch = 0 : i64, scratch_operands = 0 : i64, tpu.core_type = #tpu.core_type<tc>} {
    %c0 = arith.constant 0 : index
    %c0_0 = arith.constant 0 : index
    %0 = vector.load %arg0[%c0, %c0_0] : memref<128x800xf32, #tpu.memory_space<vmem>>, vector<128x800xf32>
    %c0_1 = arith.constant 0 : index
    %c0_2 = arith.constant 0 : index
    %1 = vector.load %arg1[%c0_1, %c0_2] : memref<800x48xf32, #tpu.memory_space<vmem>>, vector<800x48xf32>
    %cst = arith.constant dense<0.000000e+00> : vector<128x48xf32>
    %2 = tpu.matmul %0, %1, %cst {dimension_numbers = #tpu.dot_dimension_numbers<[1], [0], [0], [1], [0, 0, 1, 1], [], []>} : vector<128x800xf32>, vector<800x48xf32>, vector<128x48xf32> -> vector<128x48xf32>
    %c0_3 = arith.constant 0 : index
    %c0_4 = arith.constant 0 : index
    %3 = vector.load %arg2[%c0_3, %c0_4] : memref<1x48xf32, #tpu.memory_space<vmem>>, vector<1x48xf32>
    %4 = vector.broadcast %3 : vector<1x48xf32> to vector<128x48xf32>
    %5 = arith.addf %2, %4 : vector<128x48xf32>
    %cst_5 = arith.constant 0.000000e+00 : f32
    %6 = vector.broadcast %cst_5 : f32 to vector<128x48xf32>
    %7 = arith.maximumf %5, %6 : vector<128x48xf32>
    %8 = vector.extract_strided_slice %7 {offsets = [0, 0], sizes = [119, 48], strides = [1, 1]} : vector<128x48xf32> to vector<119x48xf32>
    %9 = vector.extract_strided_slice %7 {offsets = [1, 0], sizes = [119, 48], strides = [1, 1]} : vector<128x48xf32> to vector<119x48xf32>
    %10 = arith.maximumf %8, %9 : vector<119x48xf32>
    %11 = vector.extract_strided_slice %7 {offsets = [8, 0], sizes = [119, 48], strides = [1, 1]} : vector<128x48xf32> to vector<119x48xf32>
    %12 = vector.extract_strided_slice %7 {offsets = [9, 0], sizes = [119, 48], strides = [1, 1]} : vector<128x48xf32> to vector<119x48xf32>
    %13 = arith.maximumf %11, %12 : vector<119x48xf32>
    %14 = arith.maximumf %10, %13 : vector<119x48xf32>
    %15 = vector.extract_strided_slice %14 {offsets = [0, 0], sizes = [1, 48], strides = [1, 1]} : vector<119x48xf32> to vector<1x48xf32>
    %16 = vector.extract_strided_slice %14 {offsets = [2, 0], sizes = [1, 48], strides = [1, 1]} : vector<119x48xf32> to vector<1x48xf32>
    %17 = vector.extract_strided_slice %14 {offsets = [4, 0], sizes = [1, 48], strides = [1, 1]} : vector<119x48xf32> to vector<1x48xf32>
    %18 = vector.extract_strided_slice %14 {offsets = [6, 0], sizes = [1, 48], strides = [1, 1]} : vector<119x48xf32> to vector<1x48xf32>
    %19 = vector.extract_strided_slice %14 {offsets = [16, 0], sizes = [1, 48], strides = [1, 1]} : vector<119x48xf32> to vector<1x48xf32>
    %20 = vector.extract_strided_slice %14 {offsets = [18, 0], sizes = [1, 48], strides = [1, 1]} : vector<119x48xf32> to vector<1x48xf32>
    %21 = vector.extract_strided_slice %14 {offsets = [20, 0], sizes = [1, 48], strides = [1, 1]} : vector<119x48xf32> to vector<1x48xf32>
    %22 = vector.extract_strided_slice %14 {offsets = [22, 0], sizes = [1, 48], strides = [1, 1]} : vector<119x48xf32> to vector<1x48xf32>
    %23 = vector.extract_strided_slice %14 {offsets = [32, 0], sizes = [1, 48], strides = [1, 1]} : vector<119x48xf32> to vector<1x48xf32>
    %24 = vector.extract_strided_slice %14 {offsets = [34, 0], sizes = [1, 48], strides = [1, 1]} : vector<119x48xf32> to vector<1x48xf32>
    %25 = vector.extract_strided_slice %14 {offsets = [36, 0], sizes = [1, 48], strides = [1, 1]} : vector<119x48xf32> to vector<1x48xf32>
    %26 = vector.extract_strided_slice %14 {offsets = [38, 0], sizes = [1, 48], strides = [1, 1]} : vector<119x48xf32> to vector<1x48xf32>
    %27 = vector.extract_strided_slice %14 {offsets = [48, 0], sizes = [1, 48], strides = [1, 1]} : vector<119x48xf32> to vector<1x48xf32>
    %28 = vector.extract_strided_slice %14 {offsets = [50, 0], sizes = [1, 48], strides = [1, 1]} : vector<119x48xf32> to vector<1x48xf32>
    %29 = vector.extract_strided_slice %14 {offsets = [52, 0], sizes = [1, 48], strides = [1, 1]} : vector<119x48xf32> to vector<1x48xf32>
    %30 = vector.extract_strided_slice %14 {offsets = [54, 0], sizes = [1, 48], strides = [1, 1]} : vector<119x48xf32> to vector<1x48xf32>
    %31 = tpu.concatenate %15, %16, %17, %18, %19, %20, %21, %22, %23, %24, %25, %26, %27, %28, %29, %30 in 1 : vector<1x48xf32>, vector<1x48xf32>, vector<1x48xf32>, vector<1x48xf32>, vector<1x48xf32>, vector<1x48xf32>, vector<1x48xf32>, vector<1x48xf32>, vector<1x48xf32>, vector<1x48xf32>, vector<1x48xf32>, vector<1x48xf32>, vector<1x48xf32>, vector<1x48xf32>, vector<1x48xf32>, vector<1x48xf32> -> vector<1x768xf32>
    %32 = vector.extract_strided_slice %14 {offsets = [64, 0], sizes = [1, 48], strides = [1, 1]} : vector<119x48xf32> to vector<1x48xf32>
    %33 = vector.extract_strided_slice %14 {offsets = [66, 0], sizes = [1, 48], strides = [1, 1]} : vector<119x48xf32> to vector<1x48xf32>
    %34 = vector.extract_strided_slice %14 {offsets = [68, 0], sizes = [1, 48], strides = [1, 1]} : vector<119x48xf32> to vector<1x48xf32>
    %35 = vector.extract_strided_slice %14 {offsets = [70, 0], sizes = [1, 48], strides = [1, 1]} : vector<119x48xf32> to vector<1x48xf32>
    %36 = vector.extract_strided_slice %14 {offsets = [80, 0], sizes = [1, 48], strides = [1, 1]} : vector<119x48xf32> to vector<1x48xf32>
    %37 = vector.extract_strided_slice %14 {offsets = [82, 0], sizes = [1, 48], strides = [1, 1]} : vector<119x48xf32> to vector<1x48xf32>
    %38 = vector.extract_strided_slice %14 {offsets = [84, 0], sizes = [1, 48], strides = [1, 1]} : vector<119x48xf32> to vector<1x48xf32>
    %39 = vector.extract_strided_slice %14 {offsets = [86, 0], sizes = [1, 48], strides = [1, 1]} : vector<119x48xf32> to vector<1x48xf32>
    %40 = vector.extract_strided_slice %14 {offsets = [96, 0], sizes = [1, 48], strides = [1, 1]} : vector<119x48xf32> to vector<1x48xf32>
    %41 = vector.extract_strided_slice %14 {offsets = [98, 0], sizes = [1, 48], strides = [1, 1]} : vector<119x48xf32> to vector<1x48xf32>
    %42 = vector.extract_strided_slice %14 {offsets = [100, 0], sizes = [1, 48], strides = [1, 1]} : vector<119x48xf32> to vector<1x48xf32>
    %43 = vector.extract_strided_slice %14 {offsets = [102, 0], sizes = [1, 48], strides = [1, 1]} : vector<119x48xf32> to vector<1x48xf32>
    %44 = vector.extract_strided_slice %14 {offsets = [112, 0], sizes = [1, 48], strides = [1, 1]} : vector<119x48xf32> to vector<1x48xf32>
    %45 = vector.extract_strided_slice %14 {offsets = [114, 0], sizes = [1, 48], strides = [1, 1]} : vector<119x48xf32> to vector<1x48xf32>
    %46 = vector.extract_strided_slice %14 {offsets = [116, 0], sizes = [1, 48], strides = [1, 1]} : vector<119x48xf32> to vector<1x48xf32>
    %47 = vector.extract_strided_slice %14 {offsets = [118, 0], sizes = [1, 48], strides = [1, 1]} : vector<119x48xf32> to vector<1x48xf32>
    %48 = tpu.concatenate %32, %33, %34, %35, %36, %37, %38, %39, %40, %41, %42, %43, %44, %45, %46, %47 in 1 : vector<1x48xf32>, vector<1x48xf32>, vector<1x48xf32>, vector<1x48xf32>, vector<1x48xf32>, vector<1x48xf32>, vector<1x48xf32>, vector<1x48xf32>, vector<1x48xf32>, vector<1x48xf32>, vector<1x48xf32>, vector<1x48xf32>, vector<1x48xf32>, vector<1x48xf32>, vector<1x48xf32>, vector<1x48xf32> -> vector<1x768xf32>
    %49 = tpu.concatenate %31, %48 in 0 : vector<1x768xf32>, vector<1x768xf32> -> vector<2x768xf32>
    %c0_6 = arith.constant 0 : index
    %c0_7 = arith.constant 0 : index
    %50 = vector.load %arg3[%c0_6, %c0_7] : memref<768x128xf32, #tpu.memory_space<vmem>>, vector<768x128xf32>
    %cst_8 = arith.constant dense<0.000000e+00> : vector<2x128xf32>
    %51 = tpu.matmul %49, %50, %cst_8 {dimension_numbers = #tpu.dot_dimension_numbers<[1], [0], [0], [1], [0, 0, 1, 1], [], []>} : vector<2x768xf32>, vector<768x128xf32>, vector<2x128xf32> -> vector<2x128xf32>
    %c0_9 = arith.constant 0 : index
    %c0_10 = arith.constant 0 : index
    %52 = vector.load %arg4[%c0_9, %c0_10] : memref<1x128xf32, #tpu.memory_space<vmem>>, vector<1x128xf32>
    %53 = vector.broadcast %52 : vector<1x128xf32> to vector<2x128xf32>
    %54 = arith.addf %51, %53 : vector<2x128xf32>
    %cst_11 = arith.constant 0.000000e+00 : f32
    %55 = vector.broadcast %cst_11 : f32 to vector<2x128xf32>
    %56 = arith.maximumf %54, %55 : vector<2x128xf32>
    %c0_12 = arith.constant 0 : index
    %c0_13 = arith.constant 0 : index
    %57 = vector.load %arg5[%c0_12, %c0_13] : memref<128x128xf32, #tpu.memory_space<vmem>>, vector<128x128xf32>
    %cst_14 = arith.constant dense<0.000000e+00> : vector<2x128xf32>
    %58 = tpu.matmul %56, %57, %cst_14 {dimension_numbers = #tpu.dot_dimension_numbers<[1], [0], [0], [1], [0, 0, 1, 1], [], []>} : vector<2x128xf32>, vector<128x128xf32>, vector<2x128xf32> -> vector<2x128xf32>
    %c0_15 = arith.constant 0 : index
    %c0_16 = arith.constant 0 : index
    %59 = vector.load %arg6[%c0_15, %c0_16] : memref<1x128xf32, #tpu.memory_space<vmem>>, vector<1x128xf32>
    %60 = vector.broadcast %59 : vector<1x128xf32> to vector<2x128xf32>
    %61 = arith.addf %58, %60 : vector<2x128xf32>
    %62 = vector.extract_strided_slice %61 {offsets = [0, 0], sizes = [2, 10], strides = [1, 1]} : vector<2x128xf32> to vector<2x10xf32>
    %cst_17 = arith.constant dense<0xFF800000> : vector<2xf32>
    %63 = vector.multi_reduction <maximumf>, %62, %cst_17 [1] : vector<2x10xf32> to vector<2xf32>
    %64 = vector.shape_cast %63 : vector<2xf32> to vector<2x1xf32>
    %65 = vector.broadcast %64 : vector<2x1xf32> to vector<2x10xf32>
    %66 = arith.subf %62, %65 : vector<2x10xf32>
    %67 = math.exp %66 : vector<2x10xf32>
    %cst_18 = arith.constant dense<0.000000e+00> : vector<2xf32>
    %68 = vector.multi_reduction <add>, %67, %cst_18 [1] : vector<2x10xf32> to vector<2xf32>
    %69 = vector.shape_cast %68 : vector<2xf32> to vector<2x1xf32>
    %70 = math.log %69 : vector<2x1xf32>
    %71 = vector.broadcast %70 : vector<2x1xf32> to vector<2x10xf32>
    %72 = arith.subf %66, %71 : vector<2x10xf32>
    %c0_19 = arith.constant 0 : index
    %c0_20 = arith.constant 0 : index
    %73 = vector.load %arg7[%c0_19, %c0_20] : memref<2x10xf32, #tpu.memory_space<vmem>>, vector<2x10xf32>
    tpu.vector_store %arg7[%c0_19, %c0_20], %72 {strides = array<i32>} : memref<2x10xf32, #tpu.memory_space<vmem>>, vector<2x10xf32>,
    return
  }
}

</mosaic_0001>

<bundles_post_ra>
// kernel: net_forward.2
= control target key start
LH: loop header
LB: loop body
LE: loop exit
PB: predicated region body
PF: predicated region fallthrough
CT: control target
= control target key end

     0   :  { %vm166_vm0 = vcmask 261120   ;;  %vm1333_vm1 = vcmask 1046528   ;;  %s4772_s1 = inlined_call_operand.vmem [shape: f32[32,32], index: 1, kind: input, shape index: {}]   ;;  %s4773_s0 = inlined_call_operand.vmem [shape: f32[1152,32], index: 0, kind: input, shape index: {}]   ;;  %s4774_s2 = inlined_call_operand.vmem [shape: f32[1,32], index: 2, kind: input, shape index: {}]   ;;  %s4775_s3 = inlined_call_operand.vmem [shape: f32[1152,32], index: 3, kind: output, shape index: {}]  }
   0x1   :  { %v161_v0 = vld [vmem:[%s4772_s1 + $0x18] sm:$0xff]  ;;  %v160_v1 = vld [vmem:[%s4772_s1 + $0x10] sm:$0xff]  ;;  %v159_v2 = vld [vmem:[%s4772_s1 + $0x8] sm:$0xff] }
   0x2   :  { %611 = vmatpush.msra.mxu0 %v161_v0  ;;  %2348 = vmatpush.msra.mxu1 %v161_v0  ;;  %v158_v3 = vld [vmem:[%s4772_s1] sm:$0xff]  ;;  %v15_v8 = vld [vmem:[%s4773_s0 + $0x8] sm:$0xff]  ;;  %v16_v12 = vld [vmem:[%s4773_s0 + $0x10] sm:$0xff] }
   0x3   :  { %2349 = vmatpush.msra.mxu2 %v161_v0  ;;  %2350 = vmatpush.msra.mxu3 %v161_v0  ;;  %v14_v4 = vld [vmem:[%s4773_s0] sm:$0xff]  ;;  %v51_v9 = vld [vmem:[%s4773_s0 + $0x128] sm:$0xff]  ;;  %v52_v13 = vld [vmem:[%s4773_s0 + $0x130] sm:$0xff] }
   0x4   :  { %612 = vmatpush.msra.mxu0 %v160_v1  ;;  %2351 = vmatpush.msra.mxu1 %v160_v1  ;;  %v50_v5 = vld [vmem:[%s4773_s0 + $0x120] sm:$0xff]  ;;  %v87_v10 = vld [vmem:[%s4773_s0 + $0x248] sm:$0xff]  ;;  %v88_v14 = vld [vmem:[%s4773_s0 + $0x250] sm:$0xff] }
   0x5   :  { %2352 = vmatpush.msra.mxu2 %v160_v1  ;;  %2353 = vmatpush.msra.mxu3 %v160_v1  ;;  %v86_v6 = vld [vmem:[%s4773_s0 + $0x240] sm:$0xff]  ;;  %v123_v11 = vld [vmem:[%s4773_s0 + $0x368] sm:$0xff]  ;;  %v124_v15 = vld [vmem:[%s4773_s0 + $0x370] sm:$0xff] }
   0x6   :  { %613 = vmatpush.msra.mxu0 %v159_v2  ;;  %2354 = vmatpush.msra.mxu1 %v159_v2  ;;  %v122_v7 = vld [vmem:[%s4773_s0 + $0x360] sm:$0xff]  ;;  %v17_v16 = vld [vmem:[%s4773_s0 + $0x18] sm:$0xff]  ;;  %v19_v24 = vld [vmem:[%s4773_s0 + $0x28] sm:$0xff] }
   0x7   :  { %2355 = vmatpush.msra.mxu2 %v159_v2  ;;  %2356 = vmatpush.msra.mxu3 %v159_v2  ;;  %v53_v17 = vld [vmem:[%s4773_s0 + $0x138] sm:$0xff]  ;;  %v18_v20 = vld [vmem:[%s4773_s0 + $0x20] sm:$0xff]  ;;  %v55_v25 = vld [vmem:[%s4773_s0 + $0x148] sm:$0xff] }
   0x8   :  { %614 = vmatpush.msra.mxu0 %v158_v3  ;;  %2357 = vmatpush.msra.mxu1 %v158_v3  ;;  %v89_v18 = vld [vmem:[%s4773_s0 + $0x258] sm:$0xff]  ;;  %v54_v21 = vld [vmem:[%s4773_s0 + $0x140] sm:$0xff]  ;;  %v91_v26 = vld [vmem:[%s4773_s0 + $0x268] sm:$0xff] }
   0x9   :  { %2358 = vmatpush.msra.mxu2 %v158_v3  ;;  %2359 = vmatpush.msra.mxu3 %v158_v3  ;;  %v125_v19 = vld [vmem:[%s4773_s0 + $0x378] sm:$0xff]  ;;  %v90_v22 = vld [vmem:[%s4773_s0 + $0x260] sm:$0xff]  ;;  %v127_v27 = vld [vmem:[%s4773_s0 + $0x388] sm:$0xff] }
   0xa   :  { %2204 = vmatmul.msk.f32.vlgmr.msra.gmra.mxu0 %vm166_vm0, %v14_v4  ;;  %2240 = vmatmul.msk.f32.vlgmr.msra.gmra.mxu1 %vm166_vm0, %v50_v5  ;;  %v126_v23 = vld [vmem:[%s4773_s0 + $0x380] sm:$0xff]  ;;  %v20_v28 = vld [vmem:[%s4773_s0 + $0x30] sm:$0xff]  ;;  %v21_v32 = vld [vmem:[%s4773_s0 + $0x38] sm:$0xff] }
   0xb   :  { %2276 = vmatmul.msk.f32.vlgmr.msra.gmra.mxu2 %vm166_vm0, %v86_v6  ;;  %2312 = vmatmul.msk.f32.vlgmr.msra.gmra.mxu3 %vm166_vm0, %v122_v7  ;;  %v56_v29 = vld [vmem:[%s4773_s0 + $0x150] sm:$0xff]  ;;  %v57_v33 = vld [vmem:[%s4773_s0 + $0x158] sm:$0xff]  ;;  %v22_v36 = vld [vmem:[%s4773_s0 + $0x40] sm:$0xff] }
   0xc   :  { %v92_v30 = vld [vmem:[%s4773_s0 + $0x270] sm:$0xff]  ;;  %v93_v34 = vld [vmem:[%s4773_s0 + $0x278] sm:$0xff]  ;;  %v58_v37 = vld [vmem:[%s4773_s0 + $0x160] sm:$0xff] }
   0xd   :  { %v128_v31 = vld [vmem:[%s4773_s0 + $0x390] sm:$0xff]  ;;  %v129_v35 = vld [vmem:[%s4773_s0 + $0x398] sm:$0xff]  ;;  %v94_v38 = vld [vmem:[%s4773_s0 + $0x280] sm:$0xff] }
   0xe   :  { %v130_v39 = vld [vmem:[%s4773_s0 + $0x3a0] sm:$0xff]  ;;  %v23_v40 = vld [vmem:[%s4773_s0 + $0x48] sm:$0xff]  ;;  %v24_v44 = vld [vmem:[%s4773_s0 + $0x50] sm:$0xff] }
   0xf   :  { %v59_v41 = vld [vmem:[%s4773_s0 + $0x168] sm:$0xff]  ;;  %v60_v45 = vld [vmem:[%s4773_s0 + $0x170] sm:$0xff]  ;;  %v25_v48 = vld [vmem:[%s4773_s0 + $0x58] sm:$0xff] }
  0x10   :  { %v95_v42 = vld [vmem:[%s4773_s0 + $0x288] sm:$0xff]  ;;  %v96_v46 = vld [vmem:[%s4773_s0 + $0x290] sm:$0xff]  ;;  %v61_v49 = vld [vmem:[%s4773_s0 + $0x178] sm:$0xff] }
  0x11   :  { %v131_v43 = vld [vmem:[%s4773_s0 + $0x3a8] sm:$0xff]  ;;  %v132_v47 = vld [vmem:[%s4773_s0 + $0x3b0] sm:$0xff]  ;;  %v97_v50 = vld [vmem:[%s4773_s0 + $0x298] sm:$0xff] }
  0x12   :  { %2205 = vmatmul.msk.f32.gmra.mxu0 %vm166_vm0, %v15_v8  ;;  %2241 = vmatmul.msk.f32.gmra.mxu1 %vm166_vm0, %v51_v9  ;;  %v133_v51 = vld [vmem:[%s4773_s0 + $0x3b8] sm:$0xff]  ;;  %v26_v52 = vld [vmem:[%s4773_s0 + $0x60] sm:$0xff]  ;;  %v27_v56 = vld [vmem:[%s4773_s0 + $0x68] sm:$0xff] }
  0x13   :  { %2277 = vmatmul.msk.f32.gmra.mxu2 %vm166_vm0, %v87_v10  ;;  %2313 = vmatmul.msk.f32.gmra.mxu3 %vm166_vm0, %v123_v11  ;;  %v62_v53 = vld [vmem:[%s4773_s0 + $0x180] sm:$0xff]  ;;  %v63_v57 = vld [vmem:[%s4773_s0 + $0x188] sm:$0xff]  ;;  %v28_v60 = vld [vmem:[%s4773_s0 + $0x70] sm:$0xff] }
  0x14   :  { %v98_v54 = vld [vmem:[%s4773_s0 + $0x2a0] sm:$0xff]  ;;  %v99_v58 = vld [vmem:[%s4773_s0 + $0x2a8] sm:$0xff]  ;;  %v64_v61 = vld [vmem:[%s4773_s0 + $0x190] sm:$0xff] }
  0x15   :  { %v134_v55 = vld [vmem:[%s4773_s0 + $0x3c0] sm:$0xff]  ;;  %v135_v59 = vld [vmem:[%s4773_s0 + $0x3c8] sm:$0xff]  ;;  %v100_v62 = vld [vmem:[%s4773_s0 + $0x2b0] sm:$0xff] }
  0x16   :  { %v136_v63 = vld [vmem:[%s4773_s0 + $0x3d0] sm:$0xff]  ;;  %v29_v0 = vld [vmem:[%s4773_s0 + $0x78] sm:$0xff]  ;;  %v30_v6 = vld [vmem:[%s4773_s0 + $0x80] sm:$0xff] }
  0x17   :  { %v65_v1 = vld [vmem:[%s4773_s0 + $0x198] sm:$0xff]  ;;  %v66_v7 = vld [vmem:[%s4773_s0 + $0x1a0] sm:$0xff] }
  0x18   :  { %v101_v2 = vld [vmem:[%s4773_s0 + $0x2b8] sm:$0xff]  ;;  %v102_v8 = vld [vmem:[%s4773_s0 + $0x2c0] sm:$0xff] }
  0x19   :  { %v137_v3 = vld [vmem:[%s4773_s0 + $0x3d8] sm:$0xff]  ;;  %v138_v9 = vld [vmem:[%s4773_s0 + $0x3e0] sm:$0xff] }
  0x1a   :  { %2206 = vmatmul.msk.f32.gmra.mxu0 %vm166_vm0, %v16_v12  ;;  %2242 = vmatmul.msk.f32.gmra.mxu1 %vm166_vm0, %v52_v13 }
  0x1b   :  { %2278 = vmatmul.msk.f32.gmra.mxu2 %vm166_vm0, %v88_v14  ;;  %2314 = vmatmul.msk.f32.gmra.mxu3 %vm166_vm0, %v124_v15  ;;  %v31_v14 = vld [vmem:[%s4773_s0 + $0x88] sm:$0xff] }
  0x1c   :  { %v67_v15 = vld [vmem:[%s4773_s0 + $0x1a8] sm:$0xff] }
  0x22   :  { %2207 = vmatmul.msk.f32.gmra.mxu0 %vm166_vm0, %v17_v16  ;;  %2243 = vmatmul.msk.f32.gmra.mxu1 %vm166_vm0, %v53_v17  ;;  %v103_v16 = vld [vmem:[%s4773_s0 + $0x2c8] sm:$0xff] }
  0x23   :  { %2279 = vmatmul.msk.f32.gmra.mxu2 %vm166_vm0, %v89_v18  ;;  %2315 = vmatmul.msk.f32.gmra.mxu3 %vm166_vm0, %v125_v19  ;;  %v139_v17 = vld [vmem:[%s4773_s0 + $0x3e8] sm:$0xff] }
  0x2a   :  { %2208 = vmatmul.msk.f32.gmra.mxu0 %vm166_vm0, %v18_v20  ;;  %2244 = vmatmul.msk.f32.gmra.mxu1 %vm166_vm0, %v54_v21 }
  0x2b   :  { %2280 = vmatmul.msk.f32.gmra.mxu2 %vm166_vm0, %v90_v22  ;;  %2316 = vmatmul.msk.f32.gmra.mxu3 %vm166_vm0, %v126_v23  ;;  %v32_v22 = vld [vmem:[%s4773_s0 + $0x90] sm:$0xff] }
  0x2c   :  { %v68_v23 = vld [vmem:[%s4773_s0 + $0x1b0] sm:$0xff] }
  0x32   :  { %2209 = vmatmul.msk.f32.gmra.mxu0 %vm166_vm0, %v19_v24  ;;  %2245 = vmatmul.msk.f32.gmra.mxu1 %vm166_vm0, %v55_v25  ;;  %v2694_v24 = vld [vmem:[%s4774_s2] ss:$0 sm:$0xff]  ;;  %v104_v25 = vld [vmem:[%s4773_s0 + $0x2d0] sm:$0xff] }
  0x33   :  { %2281 = vmatmul.msk.f32.gmra.mxu2 %vm166_vm0, %v91_v26  ;;  %2317 = vmatmul.msk.f32.gmra.mxu3 %vm166_vm0, %v127_v27  ;;  %v140_v26 = vld [vmem:[%s4773_s0 + $0x3f0] sm:$0xff] }
  0x3a   :  { %2210 = vmatmul.msk.f32.gmra.mxu0 %vm166_vm0, %v20_v28  ;;  %2246 = vmatmul.msk.f32.gmra.mxu1 %vm166_vm0, %v56_v29 }
  0x3b   :  { %2282 = vmatmul.msk.f32.gmra.mxu2 %vm166_vm0, %v92_v30  ;;  %2318 = vmatmul.msk.f32.gmra.mxu3 %vm166_vm0, %v128_v31 }
  0x42   :  { %2211 = vmatmul.msk.f32.gmra.mxu0 %vm166_vm0, %v21_v32  ;;  %2247 = vmatmul.msk.f32.gmra.mxu1 %vm166_vm0, %v57_v33 }
  0x43   :  { %2283 = vmatmul.msk.f32.gmra.mxu2 %vm166_vm0, %v93_v34  ;;  %2319 = vmatmul.msk.f32.gmra.mxu3 %vm166_vm0, %v129_v35 }
  0x4a   :  { %2212 = vmatmul.msk.f32.gmra.mxu0 %vm166_vm0, %v22_v36  ;;  %2248 = vmatmul.msk.f32.gmra.mxu1 %vm166_vm0, %v58_v37 }
  0x4b   :  { %2284 = vmatmul.msk.f32.gmra.mxu2 %vm166_vm0, %v94_v38  ;;  %2320 = vmatmul.msk.f32.gmra.mxu3 %vm166_vm0, %v130_v39  ;;  %v33_v39 = vld [vmem:[%s4773_s0 + $0x98] sm:$0xff] }
  0x52   :  { %2213 = vmatmul.msk.f32.gmra.mxu0 %vm166_vm0, %v23_v40  ;;  %2249 = vmatmul.msk.f32.gmra.mxu1 %vm166_vm0, %v59_v41  ;;  %v69_v40 = vld [vmem:[%s4773_s0 + $0x1b8] sm:$0xff] }
  0x53   :  { %2285 = vmatmul.msk.f32.gmra.mxu2 %vm166_vm0, %v95_v42  ;;  %2321 = vmatmul.msk.f32.gmra.mxu3 %vm166_vm0, %v131_v43  ;;  %v105_v43 = vld [vmem:[%s4773_s0 + $0x2d8] sm:$0xff] }
  0x5a   :  { %2214 = vmatmul.msk.f32.gmra.mxu0 %vm166_vm0, %v24_v44  ;;  %2250 = vmatmul.msk.f32.gmra.mxu1 %vm166_vm0, %v60_v45  ;;  %v141_v44 = vld [vmem:[%s4773_s0 + $0x3f8] sm:$0xff] }
  0x5b   :  { %2286 = vmatmul.msk.f32.gmra.mxu2 %vm166_vm0, %v96_v46  ;;  %2322 = vmatmul.msk.f32.gmra.mxu3 %vm166_vm0, %v132_v47 }
  0x62   :  { %2215 = vmatmul.msk.f32.gmra.mxu0 %vm166_vm0, %v25_v48  ;;  %2251 = vmatmul.msk.f32.gmra.mxu1 %vm166_vm0, %v61_v49 }
  0x63   :  { %2287 = vmatmul.msk.f32.gmra.mxu2 %vm166_vm0, %v97_v50  ;;  %2323 = vmatmul.msk.f32.gmra.mxu3 %vm166_vm0, %v133_v51 }
  0x6a   :  { %2216 = vmatmul.msk.f32.gmra.mxu0 %vm166_vm0, %v26_v52  ;;  %2252 = vmatmul.msk.f32.gmra.mxu1 %vm166_vm0, %v62_v53 }
  0x6b   :  { %2288 = vmatmul.msk.f32.gmra.mxu2 %vm166_vm0, %v98_v54  ;;  %2324 = vmatmul.msk.f32.gmra.mxu3 %vm166_vm0, %v134_v55 }
  0x72   :  { %2217 = vmatmul.msk.f32.gmra.mxu0 %vm166_vm0, %v27_v56  ;;  %2253 = vmatmul.msk.f32.gmra.mxu1 %vm166_vm0, %v63_v57 }
  0x73   :  { %2289 = vmatmul.msk.f32.gmra.mxu2 %vm166_vm0, %v99_v58  ;;  %2325 = vmatmul.msk.f32.gmra.mxu3 %vm166_vm0, %v135_v59 }
  0x7a   :  { %2218 = vmatmul.msk.f32.gmra.mxu0 %vm166_vm0, %v28_v60  ;;  %2254 = vmatmul.msk.f32.gmra.mxu1 %vm166_vm0, %v64_v61 }
  0x7b   :  { %2290 = vmatmul.msk.f32.gmra.mxu2 %vm166_vm0, %v100_v62  ;;  %2326 = vmatmul.msk.f32.gmra.mxu3 %vm166_vm0, %v136_v63 }
  0x82   :  { %2219 = vmatmul.msk.f32.gmra.mxu0 %vm166_vm0, %v29_v0  ;;  %2255 = vmatmul.msk.f32.gmra.mxu1 %vm166_vm0, %v65_v1 }
  0x83   :  { %2291 = vmatmul.msk.f32.gmra.mxu2 %vm166_vm0, %v101_v2  ;;  %2327 = vmatmul.msk.f32.gmra.mxu3 %vm166_vm0, %v137_v3 }
  0x87   :  { %v616_v4 = vpop.f32.mrf.mxu0  ;;  %v724_v5 = vpop.f32.mrf.mxu1 }
  0x88   :  { %v2713_v29 = vadd.f32 %v2694_v24, %v616_v4  ;;  %v2716_v30 = vadd.f32 %v2694_v24, %v724_v5 }
  0x8a   :  { %2220 = vmatmul.msk.f32.gmra.mxu0 %vm166_vm0, %v30_v6  ;;  %2256 = vmatmul.msk.f32.gmra.mxu1 %vm166_vm0, %v66_v7  ;;  %v1048_v41 = vmax.f32 %v2713_v29, 0.0  ;;  %v1084_v42 = vmax.f32 %v2716_v30, 0.0  ;;  %v34_v7 = vld [vmem:[%s4773_s0 + $0xa0] sm:$0xff] }
  0x8b   :  { %2292 = vmatmul.msk.f32.gmra.mxu2 %vm166_vm0, %v102_v8  ;;  %2328 = vmatmul.msk.f32.gmra.mxu3 %vm166_vm0, %v138_v9  ;;  %v70_v8 = vld [vmem:[%s4773_s0 + $0x1c0] sm:$0xff] }
  0x8c   :  { %v1334_v53 = vrot.slane %v1048_v41, 1  ;;  %v2762_v54 = vrot.slane %v1084_v42, 1 }
  0x8e   :  { %v832_v10 = vpop.f32.mrf.mxu2  ;;  %v940_v11 = vpop.f32.mrf.mxu3 }
  0x8f   :  { %v619_v12 = vpop.f32.mrf.mxu0  ;;  %v727_v13 = vpop.f32.mrf.mxu1  ;;  %v2719_v31 = vadd.f32 %v2694_v24, %v832_v10  ;;  %v2722_v32 = vadd.f32 %v2694_v24, %v940_v11 }
  0x90   :  { %v2705_v27 = vadd.f32 %v2694_v24, %v619_v12  ;;  %v2708_v28 = vadd.f32 %v2694_v24, %v727_v13  ;;  %v106_v13 = vld [vmem:[%s4773_s0 + $0x2e0] sm:$0xff] }
  0x91   :  { %v1120_v49 = vmax.f32 %v2719_v31, 0.0  ;;  %v1156_v50 = vmax.f32 %v2722_v32, 0.0 }
  0x92   :  { %2221 = vmatmul.msk.f32.gmra.mxu0 %vm166_vm0, %v31_v14  ;;  %2257 = vmatmul.msk.f32.gmra.mxu1 %vm166_vm0, %v67_v15  ;;  %v1049_v35 = vmax.f32 %v2705_v27, 0.0  ;;  %v1085_v36 = vmax.f32 %v2708_v28, 0.0  ;;  %v142_v14 = vld [vmem:[%s4773_s0 + $0x400] sm:$0xff] }
  0x93   :  { %2293 = vmatmul.msk.f32.gmra.mxu2 %vm166_vm0, %v103_v16  ;;  %2329 = vmatmul.msk.f32.gmra.mxu3 %vm166_vm0, %v139_v17  ;;  %v2772_v61 = vrot.slane %v1120_v49, 1  ;;  %v2776_v62 = vrot.slane %v1156_v50, 1 }
  0x94   :  { %v1335_v51 = vrot.slane %v1049_v35, 1  ;;  %v1407_v52 = vrot.slane %v1085_v36, 1 }
  0x96   :  { %v835_v18 = vpop.f32.mrf.mxu2  ;;  %v943_v19 = vpop.f32.mrf.mxu3  ;;  %v1336_v1 = vsel %vm1333_vm1, %v1334_v53, %v1335_v51  ;;  %v1408_v2 = vsel %vm1333_vm1, %v2762_v54, %v1407_v52 }
  0x97   :  { %v622_v20 = vpop.f32.mrf.mxu0  ;;  %v730_v21 = vpop.f32.mrf.mxu1  ;;  %v2741_v45 = vadd.f32 %v2694_v24, %v835_v18  ;;  %v2744_v46 = vadd.f32 %v2694_v24, %v943_v19 }
  0x98   :  { %v2747_v47 = vadd.f32 %v2694_v24, %v622_v20  ;;  %v2750_v48 = vadd.f32 %v2694_v24, %v730_v21 }
  0x99   :  { %v1121_v57 = vmax.f32 %v2741_v45, 0.0  ;;  %v1157_v58 = vmax.f32 %v2744_v46, 0.0 }
  0x9a   :  { %2222 = vmatmul.msk.f32.gmra.mxu0 %vm166_vm0, %v32_v22  ;;  %2258 = vmatmul.msk.f32.gmra.mxu1 %vm166_vm0, %v68_v23  ;;  %v1050_v59 = vmax.f32 %v2747_v47, 0.0  ;;  %v1086_v60 = vmax.f32 %v2750_v48, 0.0  ;;  %v1756_v23 = vmax.f32 %v1048_v41, %v1336_v1 }
  0x9b   :  { %2294 = vmatmul.msk.f32.gmra.mxu2 %vm166_vm0, %v104_v25  ;;  %2330 = vmatmul.msk.f32.gmra.mxu3 %vm166_vm0, %v140_v26  ;;  %v2807_v15 = vrot.slane %v1121_v57, 1  ;;  %v2811_v16 = vrot.slane %v1157_v58, 1  ;;  %v2831_v25 = vmax.f32 %v1084_v42, %v1408_v2 }
  0x9c   :  { %v2815_v17 = vrot.slane %v1050_v59, 1  ;;  %v2819_v18 = vrot.slane %v1086_v60, 1 }
  0x9e   :  { %v838_v33 = vpop.f32.mrf.mxu2  ;;  %v946_v34 = vpop.f32.mrf.mxu3  ;;  %v1410_v41 = vsel %vm1333_vm1, %v1407_v52, %v2819_v18 }
  0x9f   :  { %v625_v37 = vpop.f32.mrf.mxu0  ;;  %v733_v38 = vpop.f32.mrf.mxu1  ;;  %v2782_v3 = vadd.f32 %v2694_v24, %v838_v33  ;;  %v2785_v4 = vadd.f32 %v2694_v24, %v946_v34 }
  0xa0   :  { %v626_v55 = vadd.f32 %v2694_v24, %v625_v37  ;;  %v734_v56 = vadd.f32 %v2694_v24, %v733_v38  ;;  %v1480_v38 = vsel %vm1333_vm1, %v2772_v61, %v2807_v15 }
  0xa1   :  { %v4777_v26 = vmax.f32 %v2782_v3, 0.0  ;;  %v4776_v29 = vmax.f32 %v2785_v4, 0.0 }
  0xa2   :  { %2223 = vmatmul.msk.f32.gmra.mxu0 %vm166_vm0, %v33_v39  ;;  %2259 = vmatmul.msk.f32.gmra.mxu1 %vm166_vm0, %v69_v40  ;;  %v1051_v9 = vmax.f32 %v626_v55, 0.0  ;;  %v1087_v10 = vmax.f32 %v734_v56, 0.0  ;;  %v1552_v39 = vsel %vm1333_vm1, %v2776_v62, %v2811_v16  ;;  %v1338_v40 = vsel %vm1333_vm1, %v1335_v51, %v2815_v17 }
  0xa3   :  { %2295 = vmatmul.msk.f32.gmra.mxu2 %vm166_vm0, %v105_v43  ;;  %2331 = vmatmul.msk.f32.gmra.mxu3 %vm166_vm0, %v141_v44 }
  0xa4   :  { %v2837_v30 = vrot.slane %v1051_v9, 1  ;;  %v2839_v33 = vrot.slane %v1087_v10, 1 }
  0xa6   :  { %v841_v63 = vpop.f32.mrf.mxu2  ;;  %v949_v0 = vpop.f32.mrf.mxu3 }
  0xa7   :  { %v628_v5 = vpop.f32.mrf.mxu0  ;;  %v736_v6 = vpop.f32.mrf.mxu1  ;;  %v2822_v19 = vadd.f32 %v2694_v24, %v841_v63  ;;  %v2825_v20 = vadd.f32 %v2694_v24, %v949_v0 }
  0xa8   :  { %v2794_v11 = vadd.f32 %v2694_v24, %v628_v5  ;;  %v2797_v12 = vadd.f32 %v2694_v24, %v736_v6  ;;  %v35_v5 = vld [vmem:[%s4773_s0 + $0xa8] sm:$0xff] }
  0xa9   :  { %v1123_v42 = vmax.f32 %v2822_v19, 0.0  ;;  %v1159_v43 = vmax.f32 %v2825_v20, 0.0  ;;  %v71_v6 = vld [vmem:[%s4773_s0 + $0x1c8] sm:$0xff] }
  0xaa   :  { %v1052_v21 = vmax.f32 %v2794_v11, 0.0  ;;  %v1088_v22 = vmax.f32 %v2797_v12, 0.0  ;;  %2224 = vmatmul.msk.f32.gmra.mxu0 %vm166_vm0, %v34_v7  ;;  %2260 = vmatmul.msk.f32.gmra.mxu1 %vm166_vm0, %v70_v8  ;;  %v2879_v7 = vrot.slane %v4777_v26, 1  ;;  %v2883_v8 = vrot.slane %v4776_v29, 1  ;;  %v72_v11 = vld [vmem:[%s4773_s0 + $0x1d0] sm:$0xff] }
  0xab   :  { %2296 = vmatmul.msk.f32.gmra.mxu2 %vm166_vm0, %v106_v13  ;;  %2332 = vmatmul.msk.f32.gmra.mxu3 %vm166_vm0, %v142_v14  ;;  %v107_v13 = vld [vmem:[%s4773_s0 + $0x2e8] sm:$0xff]  ;;  %v2916_v29 = vrot.slane %v1159_v43, 1  ;;  %v1412_v26 = vsel %vm1333_vm1, %v2819_v18, %v2839_v33 }
  0xac   :  { %v1341_v34 = vrot.slane %v1052_v21, 1  ;;  %v1413_v37 = vrot.slane %v1088_v22, 1  ;;  %v143_v14 = vld [vmem:[%s4773_s0 + $0x408] sm:$0xff]  ;;  %v1482_v27 = vsel %vm1333_vm1, %v2807_v15, %v2879_v7  ;;  %v1554_v28 = vsel %vm1333_vm1, %v2811_v16, %v2883_v8 }
  0xad   :  { %v3029_v18 = vmax.f32 %v1157_v58, %v1554_v28  ;;  %v3049_v58 = vmax.f32 %v1086_v60, %v1412_v26 }
  0xae   :  { %v1342_v44 = vsel %vm1333_vm1, %v2837_v30, %v1341_v34  ;;  %v1414_v53 = vsel %vm1333_vm1, %v2839_v33, %v1413_v37  ;;  %v844_v55 = vpop.f32.mrf.mxu2  ;;  %v952_v56 = vpop.f32.mrf.mxu3 }
  0xaf   :  { %v2861_v63 = vmax.f32 %v1051_v9, %v1342_v44  ;;  %v2863_v0 = vmax.f32 %v1087_v10, %v1414_v53  ;;  %v2866_v51 = vadd.f32 %v2694_v24, %v844_v55  ;;  %v2869_v52 = vadd.f32 %v2694_v24, %v952_v56  ;;  %v631_v1 = vpop.f32.mrf.mxu0  ;;  %v739_v2 = vpop.f32.mrf.mxu1 }
  0xb0   :  { %v2886_v9 = vadd.f32 %v2694_v24, %v631_v1  ;;  %v2889_v10 = vadd.f32 %v2694_v24, %v739_v2  ;;  %v2904_v55 = vmax.f32 %v1120_v49, %v1480_v38  ;;  %v2908_v56 = vmax.f32 %v1156_v50, %v1552_v39 }
  0xb1   :  { %v1914_v19 = vmax.f32 %v1756_v23, %v2861_v63  ;;  %v1950_v20 = vmax.f32 %v2831_v25, %v2863_v0  ;;  %v1124_v44 = vmax.f32 %v2866_v51, 0.0  ;;  %v1160_v53 = vmax.f32 %v2869_v52, 0.0 }
  0xb2   :  { %v1053_v1 = vmax.f32 %v2886_v9, 0.0  ;;  %v1089_v2 = vmax.f32 %v2889_v10, 0.0  ;;  %2225 = vmatmul.msk.f32.gmra.mxu0 %vm166_vm0, %v35_v5  ;;  %2261 = vmatmul.msk.f32.gmra.mxu1 %vm166_vm0, %v71_v6  ;;  %v2914_v23 = vrot.slane %v1123_v42, 1  ;;  %v1757_v49 = vmax.f32 %v1049_v35, %v1338_v40  ;;  %v73_v9 = vld [vmem:[%s4773_s0 + $0x1d8] sm:$0xff] }
  0xb3   :  { %2056 = vst.msk [vmem:[%s4775_s3] sm:$0xff] %vm166_vm0, %v1914_v19  ;;  %v1485_v31 = vrot.slane %v1124_v44, 1  ;;  %v1557_v32 = vrot.slane %v1160_v53, 1  ;;  %2297 = vmatmul.msk.f32.gmra.mxu2 %vm166_vm0, %v107_v13  ;;  %2333 = vmatmul.msk.f32.gmra.mxu3 %vm166_vm0, %v143_v14  ;;  %v2932_v50 = vmax.f32 %v1085_v36, %v1410_v41 }
  0xb4   :  { %2092 = vst.msk [vmem:[%s4775_s3 + $0x120] sm:$0xff] %vm166_vm0, %v1950_v20  ;;  %v1343_v38 = vrot.slane %v1053_v1, 1  ;;  %v1415_v39 = vrot.slane %v1089_v2, 1 }
  0xb5   :  { %v1486_v35 = vsel %vm1333_vm1, %v2914_v23, %v1485_v31  ;;  %v1558_v36 = vsel %vm1333_vm1, %v2916_v29, %v1557_v32 }
  0xb6   :  { %v2952_v40 = vmax.f32 %v1123_v42, %v1486_v35  ;;  %v2954_v41 = vmax.f32 %v1159_v43, %v1558_v36  ;;  %v1344_v5 = vsel %vm1333_vm1, %v1341_v34, %v1343_v38  ;;  %v1416_v6 = vsel %vm1333_vm1, %v1413_v37, %v1415_v39  ;;  %v847_v13 = vpop.f32.mrf.mxu2  ;;  %v955_v15 = vpop.f32.mrf.mxu3  ;;  %v36_v37 = vld [vmem:[%s4773_s0 + $0xb0] sm:$0xff] }
  0xb7   :  { %v2960_v14 = vmax.f32 %v1052_v21, %v1344_v5  ;;  %v2964_v16 = vmax.f32 %v1088_v22, %v1416_v6  ;;  %v2967_v19 = vadd.f32 %v2694_v24, %v847_v13  ;;  %v2970_v42 = vadd.f32 %v2694_v24, %v955_v15  ;;  %v634_v43 = vpop.f32.mrf.mxu0  ;;  %v742_v34 = vpop.f32.mrf.mxu1  ;;  %v108_v35 = vld [vmem:[%s4773_s0 + $0x2f0] sm:$0xff] }
  0xb8   :  { %v1986_v12 = vmax.f32 %v2904_v55, %v2952_v40  ;;  %v2022_v21 = vmax.f32 %v2908_v56, %v2954_v41  ;;  %v2983_v22 = vadd.f32 %v2694_v24, %v634_v43  ;;  %v2986_v20 = vadd.f32 %v2694_v24, %v742_v34  ;;  %v144_v36 = vld [vmem:[%s4773_s0 + $0x410] sm:$0xff] }
  0xb9   :  { %v1915_v5 = vmax.f32 %v1757_v49, %v2960_v14  ;;  %v1951_v6 = vmax.f32 %v2932_v50, %v2964_v16  ;;  %v1125_v13 = vmax.f32 %v2967_v19, 0.0  ;;  %v1161_v15 = vmax.f32 %v2970_v42, 0.0 }
  0xba   :  { %v1340_v43 = vsel %vm1333_vm1, %v2815_v17, %v2837_v30  ;;  %2128 = vst.msk [vmem:[%s4775_s3 + $0x240] sm:$0xff] %vm166_vm0, %v1986_v12  ;;  %v1054_v34 = vmax.f32 %v2983_v22, 0.0  ;;  %v1090_v49 = vmax.f32 %v2986_v20, 0.0  ;;  %2226 = vmatmul.msk.f32.gmra.mxu0 %vm166_vm0, %v36_v37  ;;  %2262 = vmatmul.msk.f32.gmra.mxu1 %vm166_vm0, %v72_v11  ;;  %v3025_v37 = vmax.f32 %v1121_v57, %v1482_v27  ;;  %v74_v22 = vld [vmem:[%s4773_s0 + $0x1e0] sm:$0xff] }
  0xbb   :  { %2164 = vst.msk [vmem:[%s4775_s3 + $0x360] sm:$0xff] %vm166_vm0, %v2022_v21  ;;  %v1487_v17 = vrot.slane %v1125_v13, 1  ;;  %v1559_v30 = vrot.slane %v1161_v15, 1  ;;  %2298 = vmatmul.msk.f32.gmra.mxu2 %vm166_vm0, %v108_v35  ;;  %2334 = vmatmul.msk.f32.gmra.mxu3 %vm166_vm0, %v144_v36  ;;  %v1758_v45 = vmax.f32 %v1050_v59, %v1340_v43 }
  0xbc   :  { %2057 = vst.msk [vmem:[%s4775_s3 + $0x8] sm:$0xff] %vm166_vm0, %v1915_v5  ;;  %v1345_v33 = vrot.slane %v1054_v34, 1  ;;  %v1417_v11 = vrot.slane %v1090_v49, 1 }
  0xbd   :  { %2093 = vst.msk [vmem:[%s4775_s3 + $0x128] sm:$0xff] %vm166_vm0, %v1951_v6  ;;  %v1488_v46 = vsel %vm1333_vm1, %v1485_v31, %v1487_v17  ;;  %v1560_v57 = vsel %vm1333_vm1, %v1557_v32, %v1559_v30 }
  0xbe   :  { %v3053_v27 = vmax.f32 %v1124_v44, %v1488_v46  ;;  %v3057_v47 = vmax.f32 %v1160_v53, %v1560_v57  ;;  %v1346_v59 = vsel %vm1333_vm1, %v1343_v38, %v1345_v33  ;;  %v1418_v28 = vsel %vm1333_vm1, %v1415_v39, %v1417_v11  ;;  %v850_v12 = vpop.f32.mrf.mxu2  ;;  %v958_v31 = vpop.f32.mrf.mxu3  ;;  %v37_v44 = vld [vmem:[%s4773_s0 + $0xb8] sm:$0xff] }
  0xbf   :  { %v3063_v32 = vmax.f32 %v1053_v1, %v1346_v59  ;;  %v3067_v48 = vmax.f32 %v1089_v2, %v1418_v28  ;;  %v3070_v60 = vadd.f32 %v2694_v24, %v850_v12  ;;  %v3073_v26 = vadd.f32 %v2694_v24, %v958_v31  ;;  %v637_v51 = vpop.f32.mrf.mxu0  ;;  %v745_v52 = vpop.f32.mrf.mxu1  ;;  %v109_v38 = vld [vmem:[%s4773_s0 + $0x2f8] sm:$0xff] }
  0xc0   :  { %v1987_v10 = vmax.f32 %v3025_v37, %v3053_v27  ;;  %v2023_v53 = vmax.f32 %v3029_v18, %v3057_v47  ;;  %v3086_v1 = vadd.f32 %v2694_v24, %v637_v51  ;;  %v3089_v2 = vadd.f32 %v2694_v24, %v745_v52  ;;  %v145_v39 = vld [vmem:[%s4773_s0 + $0x418] sm:$0xff] }
  0xc1   :  { %v1916_v21 = vmax.f32 %v1758_v45, %v3063_v32  ;;  %v1126_v35 = vmax.f32 %v3070_v60, 0.0  ;;  %v1162_v36 = vmax.f32 %v3073_v26, 0.0  ;;  %v1952_v5 = vmax.f32 %v3049_v58, %v3067_v48 }
  0xc2   :  { %2129 = vst.msk [vmem:[%s4775_s3 + $0x248] sm:$0xff] %vm166_vm0, %v1987_v10  ;;  %v1055_v6 = vmax.f32 %v3086_v1, 0.0  ;;  %v1091_v43 = vmax.f32 %v3089_v2, 0.0  ;;  %2227 = vmatmul.msk.f32.gmra.mxu0 %vm166_vm0, %v37_v44  ;;  %2263 = vmatmul.msk.f32.gmra.mxu1 %vm166_vm0, %v73_v9  ;;  %v1484_v45 = vsel %vm1333_vm1, %v2879_v7, %v2914_v23  ;;  %v1556_v46 = vsel %vm1333_vm1, %v2883_v8, %v2916_v29  ;;  %v75_v1 = vld [vmem:[%s4773_s0 + $0x1e8] sm:$0xff] }
  0xc3   :  { %2165 = vst.msk [vmem:[%s4775_s3 + $0x368] sm:$0xff] %vm166_vm0, %v2023_v53  ;;  %v1489_v57 = vrot.slane %v1126_v35, 1  ;;  %v1561_v59 = vrot.slane %v1162_v36, 1  ;;  %2299 = vmatmul.msk.f32.gmra.mxu2 %vm166_vm0, %v109_v38  ;;  %2335 = vmatmul.msk.f32.gmra.mxu3 %vm166_vm0, %v145_v39  ;;  %v4778_v28 = vmax.f32 %v2782_v3, 0.0  ;;  %v4779_v31 = vmax.f32 %v2785_v4, 0.0 }
  0xc4   :  { %2058 = vst.msk [vmem:[%s4775_s3 + $0x10] sm:$0xff] %vm166_vm0, %v1916_v21  ;;  %v1347_v29 = vrot.slane %v1055_v6, 1  ;;  %v1419_v7 = vrot.slane %v1091_v43, 1 }
  0xc5   :  { %v1490_v8 = vsel %vm1333_vm1, %v1487_v17, %v1489_v57  ;;  %v1562_v23 = vsel %vm1333_vm1, %v1559_v30, %v1561_v59  ;;  %2094 = vst.msk [vmem:[%s4775_s3 + $0x130] sm:$0xff] %vm166_vm0, %v1952_v5  ;;  %v3142_v12 = vmax.f32 %v4778_v28, %v1484_v45  ;;  %v3146_v51 = vmax.f32 %v4779_v31, %v1556_v46 }
  0xc6   :  { %v3150_v52 = vmax.f32 %v1125_v13, %v1490_v8  ;;  %v3154_v17 = vmax.f32 %v1161_v15, %v1562_v23  ;;  %v1348_v30 = vsel %vm1333_vm1, %v1345_v33, %v1347_v29  ;;  %v1420_v44 = vsel %vm1333_vm1, %v1417_v11, %v1419_v7  ;;  %v853_v9 = vpop.f32.mrf.mxu2  ;;  %v961_v3 = vpop.f32.mrf.mxu3  ;;  %v38_v33 = vld [vmem:[%s4773_s0 + $0xc0] sm:$0xff] }
  0xc7   :  { %v3160_v10 = vmax.f32 %v1054_v34, %v1348_v30  ;;  %v3164_v4 = vmax.f32 %v1090_v49, %v1420_v44  ;;  %v3167_v19 = vadd.f32 %v2694_v24, %v853_v9  ;;  %v3170_v42 = vadd.f32 %v2694_v24, %v961_v3  ;;  %v640_v13 = vpop.f32.mrf.mxu0  ;;  %v748_v15 = vpop.f32.mrf.mxu1  ;;  %v110_v49 = vld [vmem:[%s4773_s0 + $0x300] sm:$0xff] }
  0xc8   :  { %v3179_v20 = vadd.f32 %v2694_v24, %v640_v13  ;;  %v3182_v34 = vadd.f32 %v2694_v24, %v748_v15  ;;  %v146_v11 = vld [vmem:[%s4773_s0 + $0x420] sm:$0xff]  ;;  %v1988_v53 = vmax.f32 %v3142_v12, %v3150_v52  ;;  %v2024_v38 = vmax.f32 %v3146_v51, %v3154_v17  ;;  %v111_v15 = vld [vmem:[%s4773_s0 + $0x308] sm:$0xff] }
  0xc9   :  { %v1917_v39 = vmax.f32 %v2861_v63, %v3160_v10  ;;  %v1953_v21 = vmax.f32 %v2863_v0, %v3164_v4  ;;  %v1127_v5 = vmax.f32 %v3167_v19, 0.0  ;;  %v1163_v45 = vmax.f32 %v3170_v42, 0.0 }
  0xca   :  { %v1056_v46 = vmax.f32 %v3179_v20, 0.0  ;;  %v1092_v8 = vmax.f32 %v3182_v34, 0.0  ;;  %2228 = vmatmul.msk.f32.gmra.mxu0 %vm166_vm0, %v38_v33  ;;  %2264 = vmatmul.msk.f32.gmra.mxu1 %vm166_vm0, %v74_v22  ;;  %2130 = vst.msk [vmem:[%s4775_s3 + $0x250] sm:$0xff] %vm166_vm0, %v1988_v53  ;;  %v147_v33 = vld [vmem:[%s4773_s0 + $0x428] sm:$0xff] }
  0xcb   :  { %2059 = vst.msk [vmem:[%s4775_s3 + $0x18] sm:$0xff] %vm166_vm0, %v1917_v39  ;;  %v1491_v63 = vrot.slane %v1127_v5, 1  ;;  %v1563_v0 = vrot.slane %v1163_v45, 1  ;;  %2300 = vmatmul.msk.f32.gmra.mxu2 %vm166_vm0, %v110_v49  ;;  %2336 = vmatmul.msk.f32.gmra.mxu3 %vm166_vm0, %v146_v11 }
  0xcc   :  { %2095 = vst.msk [vmem:[%s4775_s3 + $0x138] sm:$0xff] %vm166_vm0, %v1953_v21  ;;  %v1349_v23 = vrot.slane %v1056_v46, 1  ;;  %v1421_v28 = vrot.slane %v1092_v8, 1 }
  0xcd   :  { %v1492_v31 = vsel %vm1333_vm1, %v1489_v57, %v1491_v63  ;;  %v1564_v30 = vsel %vm1333_vm1, %v1561_v59, %v1563_v0  ;;  %2166 = vst.msk [vmem:[%s4775_s3 + $0x370] sm:$0xff] %vm166_vm0, %v2024_v38 }
  0xce   :  { %v3226_v44 = vmax.f32 %v1126_v35, %v1492_v31  ;;  %v3230_v9 = vmax.f32 %v1162_v36, %v1564_v30  ;;  %v1350_v3 = vsel %vm1333_vm1, %v1347_v29, %v1349_v23  ;;  %v1422_v19 = vsel %vm1333_vm1, %v1419_v7, %v1421_v28  ;;  %v856_v57 = vpop.f32.mrf.mxu2  ;;  %v964_v42 = vpop.f32.mrf.mxu3  ;;  %v39_v29 = vld [vmem:[%s4773_s0 + $0xc8] sm:$0xff] }
  0xcf   :  { %v3236_v59 = vmax.f32 %v1055_v6, %v1350_v3  ;;  %v3240_v13 = vmax.f32 %v1091_v43, %v1422_v19  ;;  %v3243_v60 = vadd.f32 %v2694_v24, %v856_v57  ;;  %v3246_v26 = vadd.f32 %v2694_v24, %v964_v42  ;;  %v643_v35 = vpop.f32.mrf.mxu0  ;;  %v751_v36 = vpop.f32.mrf.mxu1 }
  0xd0   :  { %v1989_v2 = vmax.f32 %v2952_v40, %v3226_v44  ;;  %v2025_v6 = vmax.f32 %v2954_v41, %v3230_v9  ;;  %v3259_v43 = vadd.f32 %v2694_v24, %v643_v35  ;;  %v3262_v7 = vadd.f32 %v2694_v24, %v751_v36  ;;  %v112_v36 = vld [vmem:[%s4773_s0 + $0x310] sm:$0xff] }
  0xd1   :  { %v1918_v40 = vmax.f32 %v2960_v14, %v3236_v59  ;;  %v1954_v41 = vmax.f32 %v2964_v16, %v3240_v13  ;;  %v1128_v22 = vmax.f32 %v3243_v60, 0.0  ;;  %v1164_v20 = vmax.f32 %v3246_v26, 0.0 }
  0xd2   :  { %2131 = vst.msk [vmem:[%s4775_s3 + $0x258] sm:$0xff] %vm166_vm0, %v1989_v2  ;;  %v1057_v34 = vmax.f32 %v3259_v43, 0.0  ;;  %v1093_v49 = vmax.f32 %v3262_v7, 0.0  ;;  %2229 = vmatmul.msk.f32.gmra.mxu0 %vm166_vm0, %v39_v29  ;;  %2265 = vmatmul.msk.f32.gmra.mxu1 %vm166_vm0, %v75_v1  ;;  %v148_v29 = vld [vmem:[%s4773_s0 + $0x430] sm:$0xff] }
  0xd3   :  { %2167 = vst.msk [vmem:[%s4775_s3 + $0x378] sm:$0xff] %vm166_vm0, %v2025_v6  ;;  %v1493_v14 = vrot.slane %v1128_v22, 1  ;;  %v1565_v16 = vrot.slane %v1164_v20, 1  ;;  %2301 = vmatmul.msk.f32.gmra.mxu2 %vm166_vm0, %v111_v15  ;;  %2337 = vmatmul.msk.f32.gmra.mxu3 %vm166_vm0, %v147_v33 }
  0xd4   :  { %2060 = vst.msk [vmem:[%s4775_s3 + $0x20] sm:$0xff] %vm166_vm0, %v1918_v40  ;;  %v1351_v11 = vrot.slane %v1057_v34, 1  ;;  %v1423_v53 = vrot.slane %v1093_v49, 1 }
  0xd5   :  { %2096 = vst.msk [vmem:[%s4775_s3 + $0x140] sm:$0xff] %vm166_vm0, %v1954_v41  ;;  %v1494_v38 = vsel %vm1333_vm1, %v1491_v63, %v1493_v14  ;;  %v1566_v39 = vsel %vm1333_vm1, %v1563_v0, %v1565_v16 }
  0xd6   :  { %v3300_v21 = vmax.f32 %v1127_v5, %v1494_v38  ;;  %v3302_v31 = vmax.f32 %v1163_v45, %v1566_v39  ;;  %v1352_v30 = vsel %vm1333_vm1, %v1349_v23, %v1351_v11  ;;  %v1424_v3 = vsel %vm1333_vm1, %v1421_v28, %v1423_v53  ;;  %v859_v19 = vpop.f32.mrf.mxu2  ;;  %v967_v57 = vpop.f32.mrf.mxu3  ;;  %v40_v45 = vld [vmem:[%s4773_s0 + $0xd0] sm:$0xff] }
  0xd7   :  { %v3306_v42 = vmax.f32 %v1056_v46, %v1352_v30  ;;  %v3308_v60 = vmax.f32 %v1092_v8, %v1424_v3  ;;  %v3311_v26 = vadd.f32 %v2694_v24, %v859_v19  ;;  %v3314_v63 = vadd.f32 %v2694_v24, %v967_v57  ;;  %v646_v5 = vpop.f32.mrf.mxu0  ;;  %v754_v0 = vpop.f32.mrf.mxu1  ;;  %v76_v23 = vld [vmem:[%s4773_s0 + $0x1f0] sm:$0xff] }
  0xd8   :  { %v1990_v46 = vmax.f32 %v3053_v27, %v3300_v21  ;;  %v2026_v8 = vmax.f32 %v3057_v47, %v3302_v31  ;;  %v3327_v28 = vadd.f32 %v2694_v24, %v646_v5  ;;  %v3330_v35 = vadd.f32 %v2694_v24, %v754_v0  ;;  %v113_v0 = vld [vmem:[%s4773_s0 + $0x318] sm:$0xff] }
  0xd9   :  { %v1919_v27 = vmax.f32 %v3063_v32, %v3306_v42  ;;  %v1955_v47 = vmax.f32 %v3067_v48, %v3308_v60  ;;  %v1129_v1 = vmax.f32 %v3311_v26, 0.0  ;;  %v1165_v2 = vmax.f32 %v3314_v63, 0.0 }
  0xda   :  { %2132 = vst.msk [vmem:[%s4775_s3 + $0x260] sm:$0xff] %vm166_vm0, %v1990_v46  ;;  %v1058_v6 = vmax.f32 %v3327_v28, 0.0  ;;  %v1094_v43 = vmax.f32 %v3330_v35, 0.0  ;;  %2230 = vmatmul.msk.f32.gmra.mxu0 %vm166_vm0, %v40_v45  ;;  %2266 = vmatmul.msk.f32.gmra.mxu1 %vm166_vm0, %v76_v23  ;;  %v149_v45 = vld [vmem:[%s4773_s0 + $0x438] sm:$0xff] }
  0xdb   :  { %2168 = vst.msk [vmem:[%s4775_s3 + $0x380] sm:$0xff] %vm166_vm0, %v2026_v8  ;;  %v1495_v32 = vrot.slane %v1129_v1, 1  ;;  %v1567_v48 = vrot.slane %v1165_v2, 1  ;;  %2302 = vmatmul.msk.f32.gmra.mxu2 %vm166_vm0, %v112_v36  ;;  %2338 = vmatmul.msk.f32.gmra.mxu3 %vm166_vm0, %v148_v29 }
  0xdc   :  { %2061 = vst.msk [vmem:[%s4775_s3 + $0x28] sm:$0xff] %vm166_vm0, %v1919_v27  ;;  %v1353_v7 = vrot.slane %v1058_v6, 1  ;;  %v1425_v15 = vrot.slane %v1094_v43, 1 }
  0xdd   :  { %2097 = vst.msk [vmem:[%s4775_s3 + $0x148] sm:$0xff] %vm166_vm0, %v1955_v47  ;;  %v1496_v33 = vsel %vm1333_vm1, %v1493_v14, %v1495_v32  ;;  %v1568_v40 = vsel %vm1333_vm1, %v1565_v16, %v1567_v48 }
  0xde   :  { %v3368_v41 = vmax.f32 %v1128_v22, %v1496_v33  ;;  %v3370_v38 = vmax.f32 %v1164_v20, %v1568_v40  ;;  %v1354_v39 = vsel %vm1333_vm1, %v1351_v11, %v1353_v7  ;;  %v1426_v30 = vsel %vm1333_vm1, %v1423_v53, %v1425_v15  ;;  %v862_v3 = vpop.f32.mrf.mxu2  ;;  %v970_v19 = vpop.f32.mrf.mxu3  ;;  %v41_v20 = vld [vmem:[%s4773_s0 + $0xd8] sm:$0xff] }
  0xdf   :  { %v3374_v57 = vmax.f32 %v1057_v34, %v1354_v39  ;;  %v3376_v26 = vmax.f32 %v1093_v49, %v1426_v30  ;;  %v3379_v63 = vadd.f32 %v2694_v24, %v862_v3  ;;  %v3382_v14 = vadd.f32 %v2694_v24, %v970_v19  ;;  %v649_v22 = vpop.f32.mrf.mxu0  ;;  %v757_v16 = vpop.f32.mrf.mxu1  ;;  %v77_v11 = vld [vmem:[%s4773_s0 + $0x1f8] sm:$0xff] }
  0xe0   :  { %v1991_v34 = vmax.f32 %v3150_v52, %v3368_v41  ;;  %v2027_v49 = vmax.f32 %v3154_v17, %v3370_v38  ;;  %v3395_v53 = vadd.f32 %v2694_v24, %v649_v22  ;;  %v3398_v5 = vadd.f32 %v2694_v24, %v757_v16  ;;  %v114_v16 = vld [vmem:[%s4773_s0 + $0x320] sm:$0xff] }
  0xe1   :  { %v1920_v52 = vmax.f32 %v3160_v10, %v3374_v57  ;;  %v1956_v17 = vmax.f32 %v3164_v4, %v3376_v26  ;;  %v1130_v23 = vmax.f32 %v3379_v63, 0.0  ;;  %v1166_v46 = vmax.f32 %v3382_v14, 0.0 }
  0xe2   :  { %2133 = vst.msk [vmem:[%s4775_s3 + $0x268] sm:$0xff] %vm166_vm0, %v1991_v34  ;;  %v1059_v8 = vmax.f32 %v3395_v53, 0.0  ;;  %v1095_v28 = vmax.f32 %v3398_v5, 0.0  ;;  %2231 = vmatmul.msk.f32.gmra.mxu0 %vm166_vm0, %v41_v20  ;;  %2267 = vmatmul.msk.f32.gmra.mxu1 %vm166_vm0, %v77_v11  ;;  %v150_v20 = vld [vmem:[%s4773_s0 + $0x440] sm:$0xff] }
  0xe3   :  { %2169 = vst.msk [vmem:[%s4775_s3 + $0x388] sm:$0xff] %vm166_vm0, %v2027_v49  ;;  %v1497_v10 = vrot.slane %v1130_v23, 1  ;;  %v1569_v4 = vrot.slane %v1166_v46, 1  ;;  %2303 = vmatmul.msk.f32.gmra.mxu2 %vm166_vm0, %v113_v0  ;;  %2339 = vmatmul.msk.f32.gmra.mxu3 %vm166_vm0, %v149_v45 }
  0xe4   :  { %2062 = vst.msk [vmem:[%s4775_s3 + $0x30] sm:$0xff] %vm166_vm0, %v1920_v52  ;;  %v1355_v35 = vrot.slane %v1059_v8, 1  ;;  %v1427_v36 = vrot.slane %v1095_v28, 1 }
  0xe5   :  { %2098 = vst.msk [vmem:[%s4775_s3 + $0x150] sm:$0xff] %vm166_vm0, %v1956_v17  ;;  %v1498_v29 = vsel %vm1333_vm1, %v1495_v32, %v1497_v10  ;;  %v1570_v27 = vsel %vm1333_vm1, %v1567_v48, %v1569_v4 }
  0xe6   :  { %v3436_v47 = vmax.f32 %v1129_v1, %v1498_v29  ;;  %v3438_v33 = vmax.f32 %v1165_v2, %v1570_v27  ;;  %v1356_v40 = vsel %vm1333_vm1, %v1353_v7, %v1355_v35  ;;  %v1428_v39 = vsel %vm1333_vm1, %v1425_v15, %v1427_v36  ;;  %v865_v30 = vpop.f32.mrf.mxu2  ;;  %v973_v3 = vpop.f32.mrf.mxu3  ;;  %v42_v2 = vld [vmem:[%s4773_s0 + $0xe0] sm:$0xff] }
  0xe7   :  { %v3442_v19 = vmax.f32 %v1058_v6, %v1356_v40  ;;  %v3444_v63 = vmax.f32 %v1094_v43, %v1428_v39  ;;  %v3447_v14 = vadd.f32 %v2694_v24, %v865_v30  ;;  %v3450_v32 = vadd.f32 %v2694_v24, %v973_v3  ;;  %v652_v1 = vpop.f32.mrf.mxu0  ;;  %v760_v48 = vpop.f32.mrf.mxu1  ;;  %v78_v7 = vld [vmem:[%s4773_s0 + $0x200] sm:$0xff] }
  0xe8   :  { %v1992_v6 = vmax.f32 %v3226_v44, %v3436_v47  ;;  %v2028_v43 = vmax.f32 %v3230_v9, %v3438_v33  ;;  %v3463_v15 = vadd.f32 %v2694_v24, %v652_v1  ;;  %v3466_v22 = vadd.f32 %v2694_v24, %v760_v48  ;;  %v115_v48 = vld [vmem:[%s4773_s0 + $0x328] sm:$0xff] }
  0xe9   :  { %v1921_v44 = vmax.f32 %v3236_v59, %v3442_v19  ;;  %v1957_v9 = vmax.f32 %v3240_v13, %v3444_v63  ;;  %v1131_v11 = vmax.f32 %v3447_v14, 0.0  ;;  %v1167_v34 = vmax.f32 %v3450_v32, 0.0 }
  0xea   :  { %2134 = vst.msk [vmem:[%s4775_s3 + $0x270] sm:$0xff] %vm166_vm0, %v1992_v6  ;;  %v1060_v49 = vmax.f32 %v3463_v15, 0.0  ;;  %v1096_v53 = vmax.f32 %v3466_v22, 0.0  ;;  %2232 = vmatmul.msk.f32.gmra.mxu0 %vm166_vm0, %v42_v2  ;;  %2268 = vmatmul.msk.f32.gmra.mxu1 %vm166_vm0, %v78_v7  ;;  %v151_v2 = vld [vmem:[%s4773_s0 + $0x448] sm:$0xff] }
  0xeb   :  { %2170 = vst.msk [vmem:[%s4775_s3 + $0x390] sm:$0xff] %vm166_vm0, %v2028_v43  ;;  %v1499_v59 = vrot.slane %v1131_v11, 1  ;;  %v1571_v13 = vrot.slane %v1167_v34, 1  ;;  %2304 = vmatmul.msk.f32.gmra.mxu2 %vm166_vm0, %v114_v16  ;;  %2340 = vmatmul.msk.f32.gmra.mxu3 %vm166_vm0, %v150_v20 }
  0xec   :  { %2063 = vst.msk [vmem:[%s4775_s3 + $0x38] sm:$0xff] %vm166_vm0, %v1921_v44  ;;  %v1357_v5 = vrot.slane %v1060_v49, 1  ;;  %v1429_v0 = vrot.slane %v1096_v53, 1 }
  0xed   :  { %2099 = vst.msk [vmem:[%s4775_s3 + $0x158] sm:$0xff] %vm166_vm0, %v1957_v9  ;;  %v1500_v45 = vsel %vm1333_vm1, %v1497_v10, %v1499_v59  ;;  %v1572_v52 = vsel %vm1333_vm1, %v1569_v4, %v1571_v13 }
  0xee   :  { %v3504_v17 = vmax.f32 %v1130_v23, %v1500_v45  ;;  %v3506_v29 = vmax.f32 %v1166_v46, %v1572_v52  ;;  %v1358_v27 = vsel %vm1333_vm1, %v1355_v35, %v1357_v5  ;;  %v1430_v40 = vsel %vm1333_vm1, %v1427_v36, %v1429_v0  ;;  %v868_v39 = vpop.f32.mrf.mxu2  ;;  %v976_v30 = vpop.f32.mrf.mxu3  ;;  %v43_v46 = vld [vmem:[%s4773_s0 + $0xe8] sm:$0xff] }
  0xef   :  { %v3510_v3 = vmax.f32 %v1059_v8, %v1358_v27  ;;  %v3512_v14 = vmax.f32 %v1095_v28, %v1430_v40  ;;  %v3515_v32 = vadd.f32 %v2694_v24, %v868_v39  ;;  %v3518_v10 = vadd.f32 %v2694_v24, %v976_v30  ;;  %v655_v23 = vpop.f32.mrf.mxu0  ;;  %v763_v4 = vpop.f32.mrf.mxu1  ;;  %v79_v35 = vld [vmem:[%s4773_s0 + $0x208] sm:$0xff] }
  0xf0   :  { %v1993_v8 = vmax.f32 %v3300_v21, %v3504_v17  ;;  %v2029_v28 = vmax.f32 %v3302_v31, %v3506_v29  ;;  %v3531_v36 = vadd.f32 %v2694_v24, %v655_v23  ;;  %v3534_v1 = vadd.f32 %v2694_v24, %v763_v4  ;;  %v116_v4 = vld [vmem:[%s4773_s0 + $0x330] sm:$0xff] }
  0xf1   :  { %v1922_v21 = vmax.f32 %v3306_v42, %v3510_v3  ;;  %v1958_v31 = vmax.f32 %v3308_v60, %v3512_v14  ;;  %v1132_v7 = vmax.f32 %v3515_v32, 0.0  ;;  %v1168_v6 = vmax.f32 %v3518_v10, 0.0 }
  0xf2   :  { %2135 = vst.msk [vmem:[%s4775_s3 + $0x278] sm:$0xff] %vm166_vm0, %v1993_v8  ;;  %v1061_v43 = vmax.f32 %v3531_v36, 0.0  ;;  %v1097_v15 = vmax.f32 %v3534_v1, 0.0  ;;  %2233 = vmatmul.msk.f32.gmra.mxu0 %vm166_vm0, %v43_v46  ;;  %2269 = vmatmul.msk.f32.gmra.mxu1 %vm166_vm0, %v79_v35  ;;  %v152_v46 = vld [vmem:[%s4773_s0 + $0x450] sm:$0xff] }
  0xf3   :  { %2171 = vst.msk [vmem:[%s4775_s3 + $0x398] sm:$0xff] %vm166_vm0, %v2029_v28  ;;  %v1501_v42 = vrot.slane %v1132_v7, 1  ;;  %v1573_v60 = vrot.slane %v1168_v6, 1  ;;  %2305 = vmatmul.msk.f32.gmra.mxu2 %vm166_vm0, %v115_v48  ;;  %2341 = vmatmul.msk.f32.gmra.mxu3 %vm166_vm0, %v151_v2 }
  0xf4   :  { %2064 = vst.msk [vmem:[%s4775_s3 + $0x40] sm:$0xff] %vm166_vm0, %v1922_v21  ;;  %v1359_v22 = vrot.slane %v1061_v43, 1  ;;  %v1431_v16 = vrot.slane %v1097_v15, 1 }
  0xf5   :  { %2100 = vst.msk [vmem:[%s4775_s3 + $0x160] sm:$0xff] %vm166_vm0, %v1958_v31  ;;  %v1502_v20 = vsel %vm1333_vm1, %v1499_v59, %v1501_v42  ;;  %v1574_v44 = vsel %vm1333_vm1, %v1571_v13, %v1573_v60 }
  0xf6   :  { %v3572_v9 = vmax.f32 %v1131_v11, %v1502_v20  ;;  %v3574_v45 = vmax.f32 %v1167_v34, %v1574_v44  ;;  %v1360_v52 = vsel %vm1333_vm1, %v1357_v5, %v1359_v22  ;;  %v1432_v27 = vsel %vm1333_vm1, %v1429_v0, %v1431_v16  ;;  %v871_v40 = vpop.f32.mrf.mxu2  ;;  %v979_v39 = vpop.f32.mrf.mxu3  ;;  %v44_v34 = vld [vmem:[%s4773_s0 + $0xf0] sm:$0xff] }
  0xf7   :  { %v3578_v30 = vmax.f32 %v1060_v49, %v1360_v52  ;;  %v3580_v32 = vmax.f32 %v1096_v53, %v1432_v27  ;;  %v3583_v10 = vadd.f32 %v2694_v24, %v871_v40  ;;  %v3586_v59 = vadd.f32 %v2694_v24, %v979_v39  ;;  %v658_v11 = vpop.f32.mrf.mxu0  ;;  %v766_v13 = vpop.f32.mrf.mxu1  ;;  %v80_v5 = vld [vmem:[%s4773_s0 + $0x210] sm:$0xff] }
  0xf8   :  { %v1994_v49 = vmax.f32 %v3368_v41, %v3572_v9  ;;  %v2030_v53 = vmax.f32 %v3370_v38, %v3574_v45  ;;  %v3599_v0 = vadd.f32 %v2694_v24, %v658_v11  ;;  %v3602_v23 = vadd.f32 %v2694_v24, %v766_v13  ;;  %v117_v13 = vld [vmem:[%s4773_s0 + $0x338] sm:$0xff] }
  0xf9   :  { %v1923_v41 = vmax.f32 %v3374_v57, %v3578_v30  ;;  %v1959_v38 = vmax.f32 %v3376_v26, %v3580_v32  ;;  %v1133_v35 = vmax.f32 %v3583_v10, 0.0  ;;  %v1169_v8 = vmax.f32 %v3586_v59, 0.0 }
  0xfa   :  { %2136 = vst.msk [vmem:[%s4775_s3 + $0x280] sm:$0xff] %vm166_vm0, %v1994_v49  ;;  %v1062_v24 = vmax.f32 %v3599_v0, 0.0  ;;  %v1098_v28 = vmax.f32 %v3602_v23, 0.0  ;;  %2234 = vmatmul.msk.f32.gmra.mxu0 %vm166_vm0, %v44_v34  ;;  %2270 = vmatmul.msk.f32.gmra.mxu1 %vm166_vm0, %v80_v5  ;;  %v153_v34 = vld [vmem:[%s4773_s0 + $0x458] sm:$0xff] }
  0xfb   :  { %2172 = vst.msk [vmem:[%s4775_s3 + $0x3a0] sm:$0xff] %vm166_vm0, %v2030_v53  ;;  %v1503_v57 = vrot.slane %v1133_v35, 1  ;;  %v1575_v26 = vrot.slane %v1169_v8, 1  ;;  %2306 = vmatmul.msk.f32.gmra.mxu2 %vm166_vm0, %v116_v4  ;;  %2342 = vmatmul.msk.f32.gmra.mxu3 %vm166_vm0, %v152_v46 }
  0xfc   :  { %2065 = vst.msk [vmem:[%s4775_s3 + $0x48] sm:$0xff] %vm166_vm0, %v1923_v41  ;;  %v1361_v36 = vrot.slane %v1062_v24, 1  ;;  %v1433_v1 = vrot.slane %v1098_v28, 1 }
  0xfd   :  { %2101 = vst.msk [vmem:[%s4775_s3 + $0x168] sm:$0xff] %vm166_vm0, %v1959_v38  ;;  %v1504_v48 = vsel %vm1333_vm1, %v1501_v42, %v1503_v57  ;;  %v1576_v2 = vsel %vm1333_vm1, %v1573_v60, %v1575_v26  ;;  %v3653_v42 = vld [vmem:[%s4774_s2] ss:$0 sm:$0xff] }
  0xfe   :  { %v3640_v21 = vmax.f32 %v1132_v7, %v1504_v48  ;;  %v3642_v31 = vmax.f32 %v1168_v6, %v1576_v2  ;;  %v1362_v20 = vsel %vm1333_vm1, %v1359_v22, %v1361_v36  ;;  %v1434_v44 = vsel %vm1333_vm1, %v1431_v16, %v1433_v1  ;;  %v874_v52 = vpop.f32.mrf.mxu2  ;;  %v982_v27 = vpop.f32.mrf.mxu3 }
  0xff   :  { %v3646_v40 = vmax.f32 %v1061_v43, %v1362_v20  ;;  %v3648_v39 = vmax.f32 %v1097_v15, %v1434_v44  ;;  %v3656_v7 = vadd.f32 %v3653_v42, %v874_v52  ;;  %v3659_v6 = vadd.f32 %v3653_v42, %v982_v27  ;;  %v661_v60 = vpop.f32.mrf.mxu0  ;;  %v769_v22 = vpop.f32.mrf.mxu1  ;;  %v45_v43 = vld [vmem:[%s4773_s0 + $0xf8] sm:$0xff] }
 0x100   :  { %v81_v15 = vld [vmem:[%s4773_s0 + $0x218] sm:$0xff]  ;;  %v1995_v16 = vmax.f32 %v3436_v47, %v3640_v21  ;;  %v2031_v10 = vmax.f32 %v3438_v33, %v3642_v31  ;;  %v3672_v59 = vadd.f32 %v3653_v42, %v661_v60  ;;  %v3675_v11 = vadd.f32 %v3653_v42, %v769_v22  ;;  %v118_v22 = vld [vmem:[%s4773_s0 + $0x340] sm:$0xff] }
 0x101   :  { %v1924_v47 = vmax.f32 %v3442_v19, %v3646_v40  ;;  %v1960_v33 = vmax.f32 %v3444_v63, %v3648_v39  ;;  %v1134_v5 = vmax.f32 %v3656_v7, 0.0  ;;  %v1170_v49 = vmax.f32 %v3659_v6, 0.0 }
 0x102   :  { %2137 = vst.msk [vmem:[%s4775_s3 + $0x288] sm:$0xff] %vm166_vm0, %v1995_v16  ;;  %v1063_v53 = vmax.f32 %v3672_v59, 0.0  ;;  %v1099_v0 = vmax.f32 %v3675_v11, 0.0  ;;  %2235 = vmatmul.msk.f32.gmra.mxu0 %vm166_vm0, %v45_v43  ;;  %2271 = vmatmul.msk.f32.gmra.mxu1 %vm166_vm0, %v81_v15  ;;  %v154_v43 = vld [vmem:[%s4773_s0 + $0x460] sm:$0xff] }
 0x103   :  { %2173 = vst.msk [vmem:[%s4775_s3 + $0x3a8] sm:$0xff] %vm166_vm0, %v2031_v10  ;;  %v1505_v19 = vrot.slane %v1134_v5, 1  ;;  %v1577_v63 = vrot.slane %v1170_v49, 1  ;;  %2307 = vmatmul.msk.f32.gmra.mxu2 %vm166_vm0, %v117_v13  ;;  %2343 = vmatmul.msk.f32.gmra.mxu3 %vm166_vm0, %v153_v34 }
 0x104   :  { %2066 = vst.msk [vmem:[%s4775_s3 + $0x50] sm:$0xff] %vm166_vm0, %v1924_v47  ;;  %v1363_v23 = vrot.slane %v1063_v53, 1  ;;  %v1435_v4 = vrot.slane %v1099_v0, 1 }
 0x105   :  { %2102 = vst.msk [vmem:[%s4775_s3 + $0x170] sm:$0xff] %vm166_vm0, %v1960_v33  ;;  %v1506_v46 = vsel %vm1333_vm1, %v1503_v57, %v1505_v19  ;;  %v1578_v41 = vsel %vm1333_vm1, %v1575_v26, %v1577_v63 }
 0x106   :  { %v3713_v38 = vmax.f32 %v1133_v35, %v1506_v46  ;;  %v3715_v48 = vmax.f32 %v1169_v8, %v1578_v41  ;;  %v1364_v2 = vsel %vm1333_vm1, %v1361_v36, %v1363_v23  ;;  %v1436_v20 = vsel %vm1333_vm1, %v1433_v1, %v1435_v4  ;;  %v877_v44 = vpop.f32.mrf.mxu2  ;;  %v985_v52 = vpop.f32.mrf.mxu3  ;;  %v46_v8 = vld [vmem:[%s4773_s0 + $0x100] sm:$0xff] }
 0x107   :  { %v3719_v27 = vmax.f32 %v1062_v24, %v1364_v2  ;;  %v3721_v7 = vmax.f32 %v1098_v28, %v1436_v20  ;;  %v3724_v6 = vadd.f32 %v3653_v42, %v877_v44  ;;  %v3727_v57 = vadd.f32 %v3653_v42, %v985_v52  ;;  %v664_v35 = vpop.f32.mrf.mxu0  ;;  %v772_v26 = vpop.f32.mrf.mxu1  ;;  %v82_v36 = vld [vmem:[%s4773_s0 + $0x220] sm:$0xff] }
 0x108   :  { %v1996_v24 = vmax.f32 %v3504_v17, %v3713_v38  ;;  %v2032_v28 = vmax.f32 %v3506_v29, %v3715_v48  ;;  %v3740_v1 = vadd.f32 %v3653_v42, %v664_v35  ;;  %v3743_v60 = vadd.f32 %v3653_v42, %v772_v26  ;;  %v119_v26 = vld [vmem:[%s4773_s0 + $0x348] sm:$0xff] }
 0x109   :  { %v1925_v17 = vmax.f32 %v3510_v3, %v3719_v27  ;;  %v1961_v29 = vmax.f32 %v3512_v14, %v3721_v7  ;;  %v1135_v15 = vmax.f32 %v3724_v6, 0.0  ;;  %v1171_v16 = vmax.f32 %v3727_v57, 0.0 }
 0x10a   :  { %2138 = vst.msk [vmem:[%s4775_s3 + $0x290] sm:$0xff] %vm166_vm0, %v1996_v24  ;;  %v1064_v10 = vmax.f32 %v3740_v1, 0.0  ;;  %v1100_v59 = vmax.f32 %v3743_v60, 0.0  ;;  %2236 = vmatmul.msk.f32.gmra.mxu0 %vm166_vm0, %v46_v8  ;;  %2272 = vmatmul.msk.f32.gmra.mxu1 %vm166_vm0, %v82_v36  ;;  %v155_v8 = vld [vmem:[%s4773_s0 + $0x468] sm:$0xff] }
 0x10b   :  { %2174 = vst.msk [vmem:[%s4775_s3 + $0x3b0] sm:$0xff] %vm166_vm0, %v2032_v28  ;;  %v1507_v3 = vrot.slane %v1135_v15, 1  ;;  %v1579_v14 = vrot.slane %v1171_v16, 1  ;;  %2308 = vmatmul.msk.f32.gmra.mxu2 %vm166_vm0, %v118_v22  ;;  %2344 = vmatmul.msk.f32.gmra.mxu3 %vm166_vm0, %v154_v43 }
 0x10c   :  { %2067 = vst.msk [vmem:[%s4775_s3 + $0x58] sm:$0xff] %vm166_vm0, %v1925_v17  ;;  %v1365_v11 = vrot.slane %v1064_v10, 1  ;;  %v1437_v13 = vrot.slane %v1100_v59, 1 }
 0x10d   :  { %2103 = vst.msk [vmem:[%s4775_s3 + $0x178] sm:$0xff] %vm166_vm0, %v1961_v29  ;;  %v1508_v34 = vsel %vm1333_vm1, %v1505_v19, %v1507_v3  ;;  %v1580_v47 = vsel %vm1333_vm1, %v1577_v63, %v1579_v14 }
 0x10e   :  { %v3781_v33 = vmax.f32 %v1134_v5, %v1508_v34  ;;  %v3783_v46 = vmax.f32 %v1170_v49, %v1580_v47  ;;  %v1366_v41 = vsel %vm1333_vm1, %v1363_v23, %v1365_v11  ;;  %v1438_v2 = vsel %vm1333_vm1, %v1435_v4, %v1437_v13  ;;  %v880_v20 = vpop.f32.mrf.mxu2  ;;  %v988_v44 = vpop.f32.mrf.mxu3  ;;  %v47_v49 = vld [vmem:[%s4773_s0 + $0x108] sm:$0xff] }
 0x10f   :  { %v3787_v52 = vmax.f32 %v1063_v53, %v1366_v41  ;;  %v3789_v6 = vmax.f32 %v1099_v0, %v1438_v2  ;;  %v3792_v57 = vadd.f32 %v3653_v42, %v880_v20  ;;  %v3795_v19 = vadd.f32 %v3653_v42, %v988_v44  ;;  %v667_v5 = vpop.f32.mrf.mxu0  ;;  %v775_v63 = vpop.f32.mrf.mxu1  ;;  %v83_v23 = vld [vmem:[%s4773_s0 + $0x228] sm:$0xff] }
 0x110   :  { %v1997_v53 = vmax.f32 %v3572_v9, %v3781_v33  ;;  %v2033_v0 = vmax.f32 %v3574_v45, %v3783_v46  ;;  %v3808_v4 = vadd.f32 %v3653_v42, %v667_v5  ;;  %v3811_v35 = vadd.f32 %v3653_v42, %v775_v63  ;;  %v120_v63 = vld [vmem:[%s4773_s0 + $0x350] sm:$0xff] }
 0x111   :  { %v1926_v9 = vmax.f32 %v3578_v30, %v3787_v52  ;;  %v1962_v45 = vmax.f32 %v3580_v32, %v3789_v6  ;;  %v1136_v36 = vmax.f32 %v3792_v57, 0.0  ;;  %v1172_v24 = vmax.f32 %v3795_v19, 0.0 }
 0x112   :  { %2139 = vst.msk [vmem:[%s4775_s3 + $0x298] sm:$0xff] %vm166_vm0, %v1997_v53  ;;  %v1065_v28 = vmax.f32 %v3808_v4, 0.0  ;;  %v1101_v1 = vmax.f32 %v3811_v35, 0.0  ;;  %2237 = vmatmul.msk.f32.gmra.mxu0 %vm166_vm0, %v47_v49  ;;  %2273 = vmatmul.msk.f32.gmra.mxu1 %vm166_vm0, %v83_v23  ;;  %v156_v49 = vld [vmem:[%s4773_s0 + $0x470] sm:$0xff] }
 0x113   :  { %2175 = vst.msk [vmem:[%s4775_s3 + $0x3b8] sm:$0xff] %vm166_vm0, %v2033_v0  ;;  %v1509_v30 = vrot.slane %v1136_v36, 1  ;;  %v1581_v32 = vrot.slane %v1172_v24, 1  ;;  %2309 = vmatmul.msk.f32.gmra.mxu2 %vm166_vm0, %v119_v26  ;;  %2345 = vmatmul.msk.f32.gmra.mxu3 %vm166_vm0, %v155_v8 }
 0x114   :  { %2068 = vst.msk [vmem:[%s4775_s3 + $0x60] sm:$0xff] %vm166_vm0, %v1926_v9  ;;  %v1367_v60 = vrot.slane %v1065_v28, 1  ;;  %v1439_v22 = vrot.slane %v1101_v1, 1 }
 0x115   :  { %2104 = vst.msk [vmem:[%s4775_s3 + $0x180] sm:$0xff] %vm166_vm0, %v1962_v45  ;;  %v1510_v43 = vsel %vm1333_vm1, %v1507_v3, %v1509_v30  ;;  %v1582_v17 = vsel %vm1333_vm1, %v1579_v14, %v1581_v32 }
 0x116   :  { %v3849_v29 = vmax.f32 %v1135_v15, %v1510_v43  ;;  %v3851_v34 = vmax.f32 %v1171_v16, %v1582_v17  ;;  %v1368_v47 = vsel %vm1333_vm1, %v1365_v11, %v1367_v60  ;;  %v1440_v41 = vsel %vm1333_vm1, %v1437_v13, %v1439_v22  ;;  %v883_v2 = vpop.f32.mrf.mxu2  ;;  %v991_v20 = vpop.f32.mrf.mxu3  ;;  %v48_v16 = vld [vmem:[%s4773_s0 + $0x110] sm:$0xff] }
 0x117   :  { %v3855_v44 = vmax.f32 %v1064_v10, %v1368_v47  ;;  %v3857_v57 = vmax.f32 %v1100_v59, %v1440_v41  ;;  %v3860_v19 = vadd.f32 %v3653_v42, %v883_v2  ;;  %v3863_v3 = vadd.f32 %v3653_v42, %v991_v20  ;;  %v670_v15 = vpop.f32.mrf.mxu0  ;;  %v778_v14 = vpop.f32.mrf.mxu1  ;;  %v84_v11 = vld [vmem:[%s4773_s0 + $0x230] sm:$0xff] }
 0x118   :  { %v1998_v10 = vmax.f32 %v3640_v21, %v3849_v29  ;;  %v2034_v59 = vmax.f32 %v3642_v31, %v3851_v34  ;;  %v3876_v13 = vadd.f32 %v3653_v42, %v670_v15  ;;  %v3879_v5 = vadd.f32 %v3653_v42, %v778_v14  ;;  %v121_v14 = vld [vmem:[%s4773_s0 + $0x358] sm:$0xff] }
 0x119   :  { %v1927_v21 = vmax.f32 %v3646_v40, %v3855_v44  ;;  %v1963_v31 = vmax.f32 %v3648_v39, %v3857_v57  ;;  %v1137_v23 = vmax.f32 %v3860_v19, 0.0  ;;  %v1173_v53 = vmax.f32 %v3863_v3, 0.0 }
 0x11a   :  { %2140 = vst.msk [vmem:[%s4775_s3 + $0x2a0] sm:$0xff] %vm166_vm0, %v1998_v10  ;;  %v1066_v0 = vmax.f32 %v3876_v13, 0.0  ;;  %v1102_v4 = vmax.f32 %v3879_v5, 0.0  ;;  %2238 = vmatmul.msk.f32.gmra.mxu0 %vm166_vm0, %v48_v16  ;;  %2274 = vmatmul.msk.f32.gmra.mxu1 %vm166_vm0, %v84_v11  ;;  %v157_v16 = vld [vmem:[%s4773_s0 + $0x478] sm:$0xff] }
 0x11b   :  { %2176 = vst.msk [vmem:[%s4775_s3 + $0x3c0] sm:$0xff] %vm166_vm0, %v2034_v59  ;;  %v1511_v40 = vrot.slane %v1137_v23, 1  ;;  %v1583_v39 = vrot.slane %v1173_v53, 1  ;;  %2310 = vmatmul.msk.f32.gmra.mxu2 %vm166_vm0, %v120_v63  ;;  %2346 = vmatmul.msk.f32.gmra.mxu3 %vm166_vm0, %v156_v49 }
 0x11c   :  { %2069 = vst.msk [vmem:[%s4775_s3 + $0x68] sm:$0xff] %vm166_vm0, %v1927_v21  ;;  %v1369_v35 = vrot.slane %v1066_v0, 1  ;;  %v1441_v26 = vrot.slane %v1102_v4, 1 }
 0x11d   :  { %2105 = vst.msk [vmem:[%s4775_s3 + $0x188] sm:$0xff] %vm166_vm0, %v1963_v31  ;;  %v1512_v8 = vsel %vm1333_vm1, %v1509_v30, %v1511_v40  ;;  %v1584_v9 = vsel %vm1333_vm1, %v1581_v32, %v1583_v39 }
 0x11e   :  { %v3917_v45 = vmax.f32 %v1136_v36, %v1512_v8  ;;  %v3919_v43 = vmax.f32 %v1172_v24, %v1584_v9  ;;  %v1370_v17 = vsel %vm1333_vm1, %v1367_v60, %v1369_v35  ;;  %v1442_v47 = vsel %vm1333_vm1, %v1439_v22, %v1441_v26  ;;  %v886_v41 = vpop.f32.mrf.mxu2  ;;  %v994_v2 = vpop.f32.mrf.mxu3  ;;  %v49_v24 = vld [vmem:[%s4773_s0 + $0x118] sm:$0xff] }
 0x11f   :  { %v3923_v20 = vmax.f32 %v1065_v28, %v1370_v17  ;;  %v3925_v19 = vmax.f32 %v1101_v1, %v1442_v47  ;;  %v3928_v3 = vadd.f32 %v3653_v42, %v886_v41  ;;  %v3931_v30 = vadd.f32 %v3653_v42, %v994_v2  ;;  %v673_v36 = vpop.f32.mrf.mxu0  ;;  %v781_v32 = vpop.f32.mrf.mxu1  ;;  %v85_v60 = vld [vmem:[%s4773_s0 + $0x238] sm:$0xff] }
 0x120   :  { %v1999_v28 = vmax.f32 %v3713_v38, %v3917_v45  ;;  %v2035_v1 = vmax.f32 %v3715_v48, %v3919_v43  ;;  %v3944_v22 = vadd.f32 %v3653_v42, %v673_v36  ;;  %v3947_v15 = vadd.f32 %v3653_v42, %v781_v32 }
 0x121   :  { %v1928_v38 = vmax.f32 %v3719_v27, %v3923_v20  ;;  %v1964_v48 = vmax.f32 %v3721_v7, %v3925_v19  ;;  %v1138_v11 = vmax.f32 %v3928_v3, 0.0  ;;  %v1174_v10 = vmax.f32 %v3931_v30, 0.0 }
 0x122   :  { %2141 = vst.msk [vmem:[%s4775_s3 + $0x2a8] sm:$0xff] %vm166_vm0, %v1999_v28  ;;  %v1067_v59 = vmax.f32 %v3944_v22, 0.0  ;;  %v1103_v13 = vmax.f32 %v3947_v15, 0.0  ;;  %2239 = vmatmul.msk.f32.gmra.mxu0 %vm166_vm0, %v49_v24  ;;  %2275 = vmatmul.msk.f32.gmra.mxu1 %vm166_vm0, %v85_v60 }
 0x123   :  { %2177 = vst.msk [vmem:[%s4775_s3 + $0x3c8] sm:$0xff] %vm166_vm0, %v2035_v1  ;;  %v1513_v27 = vrot.slane %v1138_v11, 1  ;;  %v1585_v7 = vrot.slane %v1174_v10, 1  ;;  %2311 = vmatmul.msk.f32.gmra.mxu2 %vm166_vm0, %v121_v14  ;;  %2347 = vmatmul.msk.f32.gmra.mxu3 %vm166_vm0, %v157_v16 }
 0x124   :  { %2070 = vst.msk [vmem:[%s4775_s3 + $0x70] sm:$0xff] %vm166_vm0, %v1928_v38  ;;  %v1371_v5 = vrot.slane %v1067_v59, 1  ;;  %v1443_v63 = vrot.slane %v1103_v13, 1 }
 0x125   :  { %2106 = vst.msk [vmem:[%s4775_s3 + $0x190] sm:$0xff] %vm166_vm0, %v1964_v48  ;;  %v1514_v49 = vsel %vm1333_vm1, %v1511_v40, %v1513_v27  ;;  %v1586_v21 = vsel %vm1333_vm1, %v1583_v39, %v1585_v7 }
 0x126   :  { %v3985_v31 = vmax.f32 %v1137_v23, %v1514_v49  ;;  %v3987_v8 = vmax.f32 %v1173_v53, %v1586_v21  ;;  %v1372_v9 = vsel %vm1333_vm1, %v1369_v35, %v1371_v5  ;;  %v1444_v17 = vsel %vm1333_vm1, %v1441_v26, %v1443_v63  ;;  %v889_v47 = vpop.f32.mrf.mxu2  ;;  %v997_v41 = vpop.f32.mrf.mxu3 }
 0x127   :  { %v3991_v2 = vmax.f32 %v1066_v0, %v1372_v9  ;;  %v3993_v3 = vmax.f32 %v1102_v4, %v1444_v17  ;;  %v890_v30 = vadd.f32 %v3653_v42, %v889_v47  ;;  %v998_v40 = vadd.f32 %v3653_v42, %v997_v41  ;;  %v676_v36 = vpop.f32.mrf.mxu0  ;;  %v784_v39 = vpop.f32.mrf.mxu1 }
 0x128   :  { %v2000_v23 = vmax.f32 %v3781_v33, %v3985_v31  ;;  %v2036_v53 = vmax.f32 %v3783_v46, %v3987_v8  ;;  %v677_v35 = vadd.f32 %v3653_v42, %v676_v36  ;;  %v785_v26 = vadd.f32 %v3653_v42, %v784_v39 }
 0x129   :  { %v1929_v0 = vmax.f32 %v3787_v52, %v3991_v2  ;;  %v1965_v4 = vmax.f32 %v3789_v6, %v3993_v3  ;;  %v1139_v32 = vmax.f32 %v890_v30, 0.0  ;;  %v1175_v24 = vmax.f32 %v998_v40, 0.0 }
 0x12a   :  { %2142 = vst.msk [vmem:[%s4775_s3 + $0x2b0] sm:$0xff] %vm166_vm0, %v2000_v23  ;;  %v1068_v33 = vmax.f32 %v677_v35, 0.0  ;;  %v1104_v60 = vmax.f32 %v785_v26, 0.0 }
 0x12b   :  { %2178 = vst.msk [vmem:[%s4775_s3 + $0x3d0] sm:$0xff] %vm166_vm0, %v2036_v53  ;;  %v1515_v46 = vrot.slane %v1139_v32, 1  ;;  %v1587_v28 = vrot.slane %v1175_v24, 1 }
 0x12c   :  { %2071 = vst.msk [vmem:[%s4775_s3 + $0x78] sm:$0xff] %vm166_vm0, %v1929_v0  ;;  %v1373_v52 = vrot.slane %v1068_v33, 1  ;;  %v1445_v6 = vrot.slane %v1104_v60, 1 }
 0x12d   :  { %2107 = vst.msk [vmem:[%s4775_s3 + $0x198] sm:$0xff] %vm166_vm0, %v1965_v4  ;;  %v1516_v1 = vsel %vm1333_vm1, %v1513_v27, %v1515_v46  ;;  %v1588_v22 = vsel %vm1333_vm1, %v1585_v7, %v1587_v28 }
 0x12e   :  { %v4025_v15 = vmax.f32 %v1138_v11, %v1516_v1  ;;  %v4027_v14 = vmax.f32 %v1174_v10, %v1588_v22  ;;  %v1374_v16 = vsel %vm1333_vm1, %v1371_v5, %v1373_v52  ;;  %v1446_v38 = vsel %vm1333_vm1, %v1443_v63, %v1445_v6  ;;  %v892_v48 = vpop.f32.mrf.mxu2  ;;  %v1000_v49 = vpop.f32.mrf.mxu3 }
 0x12f   :  { %v4031_v21 = vmax.f32 %v1067_v59, %v1374_v16  ;;  %v4033_v9 = vmax.f32 %v1103_v13, %v1446_v38  ;;  %v893_v17 = vadd.f32 %v3653_v42, %v892_v48  ;;  %v1001_v27 = vadd.f32 %v3653_v42, %v1000_v49  ;;  %v679_v47 = vpop.f32.mrf.mxu0  ;;  %v787_v7 = vpop.f32.mrf.mxu1 }
 0x130   :  { %v2001_v11 = vmax.f32 %v3849_v29, %v4025_v15  ;;  %v2037_v10 = vmax.f32 %v3851_v34, %v4027_v14  ;;  %v680_v5 = vadd.f32 %v3653_v42, %v679_v47  ;;  %v788_v63 = vadd.f32 %v3653_v42, %v787_v7 }
 0x131   :  { %v1930_v59 = vmax.f32 %v3855_v44, %v4031_v21  ;;  %v1966_v13 = vmax.f32 %v3857_v57, %v4033_v9  ;;  %v1140_v41 = vmax.f32 %v893_v17, 0.0  ;;  %v1176_v30 = vmax.f32 %v1001_v27, 0.0 }
 0x132   :  { %2143 = vst.msk [vmem:[%s4775_s3 + $0x2b8] sm:$0xff] %vm166_vm0, %v2001_v11  ;;  %v1069_v29 = vmax.f32 %v680_v5, 0.0  ;;  %v1105_v40 = vmax.f32 %v788_v63, 0.0 }
 0x133   :  { %2179 = vst.msk [vmem:[%s4775_s3 + $0x3d8] sm:$0xff] %vm166_vm0, %v2037_v10  ;;  %v1517_v34 = vrot.slane %v1140_v41, 1  ;;  %v1589_v36 = vrot.slane %v1176_v30, 1 }
 0x134   :  { %2072 = vst.msk [vmem:[%s4775_s3 + $0x80] sm:$0xff] %vm166_vm0, %v1930_v59  ;;  %v1375_v44 = vrot.slane %v1069_v29, 1  ;;  %v1447_v57 = vrot.slane %v1105_v40, 1 }
 0x135   :  { %2108 = vst.msk [vmem:[%s4775_s3 + $0x1a0] sm:$0xff] %vm166_vm0, %v1966_v13  ;;  %v1518_v39 = vsel %vm1333_vm1, %v1515_v46, %v1517_v34  ;;  %v1590_v23 = vsel %vm1333_vm1, %v1587_v28, %v1589_v36 }
 0x136   :  { %v4065_v53 = vmax.f32 %v1139_v32, %v1518_v39  ;;  %v4067_v35 = vmax.f32 %v1175_v24, %v1590_v23  ;;  %v1376_v26 = vsel %vm1333_vm1, %v1373_v52, %v1375_v44  ;;  %v1448_v0 = vsel %vm1333_vm1, %v1445_v6, %v1447_v57  ;;  %v895_v4 = vpop.f32.mrf.mxu2  ;;  %v1003_v1 = vpop.f32.mrf.mxu3 }
 0x137   :  { %v4071_v22 = vmax.f32 %v1068_v33, %v1376_v26  ;;  %v4073_v16 = vmax.f32 %v1104_v60, %v1448_v0  ;;  %v896_v38 = vadd.f32 %v3653_v42, %v895_v4  ;;  %v1004_v46 = vadd.f32 %v3653_v42, %v1003_v1  ;;  %v682_v48 = vpop.f32.mrf.mxu0  ;;  %v790_v28 = vpop.f32.mrf.mxu1 }
 0x138   :  { %v2002_v32 = vmax.f32 %v3917_v45, %v4065_v53  ;;  %v2038_v24 = vmax.f32 %v3919_v43, %v4067_v35  ;;  %v683_v52 = vadd.f32 %v3653_v42, %v682_v48  ;;  %v791_v6 = vadd.f32 %v3653_v42, %v790_v28 }
 0x139   :  { %v1931_v33 = vmax.f32 %v3923_v20, %v4071_v22  ;;  %v1967_v60 = vmax.f32 %v3925_v19, %v4073_v16  ;;  %v1141_v49 = vmax.f32 %v896_v38, 0.0  ;;  %v1177_v17 = vmax.f32 %v1004_v46, 0.0 }
 0x13a   :  { %2144 = vst.msk [vmem:[%s4775_s3 + $0x2c0] sm:$0xff] %vm166_vm0, %v2002_v32  ;;  %v1070_v45 = vmax.f32 %v683_v52, 0.0  ;;  %v1106_v27 = vmax.f32 %v791_v6, 0.0 }
 0x13b   :  { %2180 = vst.msk [vmem:[%s4775_s3 + $0x3e0] sm:$0xff] %vm166_vm0, %v2038_v24  ;;  %v1519_v43 = vrot.slane %v1141_v49, 1  ;;  %v1591_v47 = vrot.slane %v1177_v17, 1 }
 0x13c   :  { %2073 = vst.msk [vmem:[%s4775_s3 + $0x88] sm:$0xff] %vm166_vm0, %v1931_v33  ;;  %v1377_v20 = vrot.slane %v1070_v45, 1  ;;  %v1449_v19 = vrot.slane %v1106_v27, 1 }
 0x13d   :  { %2109 = vst.msk [vmem:[%s4775_s3 + $0x1a8] sm:$0xff] %vm166_vm0, %v1967_v60  ;;  %v1520_v7 = vsel %vm1333_vm1, %v1517_v34, %v1519_v43  ;;  %v1592_v11 = vsel %vm1333_vm1, %v1589_v36, %v1591_v47 }
 0x13e   :  { %v4105_v10 = vmax.f32 %v1140_v41, %v1520_v7  ;;  %v4107_v5 = vmax.f32 %v1176_v30, %v1592_v11  ;;  %v1378_v63 = vsel %vm1333_vm1, %v1375_v44, %v1377_v20  ;;  %v1450_v59 = vsel %vm1333_vm1, %v1447_v57, %v1449_v19  ;;  %v898_v13 = vpop.f32.mrf.mxu2  ;;  %v1006_v39 = vpop.f32.mrf.mxu3 }
 0x13f   :  { %v4111_v23 = vmax.f32 %v1069_v29, %v1378_v63  ;;  %v4113_v26 = vmax.f32 %v1105_v40, %v1450_v59  ;;  %v899_v0 = vadd.f32 %v3653_v42, %v898_v13  ;;  %v1007_v34 = vadd.f32 %v3653_v42, %v1006_v39  ;;  %v685_v4 = vpop.f32.mrf.mxu0  ;;  %v793_v36 = vpop.f32.mrf.mxu1 }
 0x140   :  { %v2003_v41 = vmax.f32 %v3985_v31, %v4105_v10  ;;  %v2039_v30 = vmax.f32 %v3987_v8, %v4107_v5  ;;  %v686_v44 = vadd.f32 %v3653_v42, %v685_v4  ;;  %v794_v57 = vadd.f32 %v3653_v42, %v793_v36 }
 0x141   :  { %v1932_v29 = vmax.f32 %v3991_v2, %v4111_v23  ;;  %v1968_v40 = vmax.f32 %v3993_v3, %v4113_v26  ;;  %v1142_v1 = vmax.f32 %v899_v0, 0.0  ;;  %v1178_v38 = vmax.f32 %v1007_v34, 0.0 }
 0x142   :  { %2145 = vst.msk [vmem:[%s4775_s3 + $0x2c8] sm:$0xff] %vm166_vm0, %v2003_v41  ;;  %v1071_v31 = vmax.f32 %v686_v44, 0.0  ;;  %v1107_v46 = vmax.f32 %v794_v57, 0.0 }
 0x143   :  { %2181 = vst.msk [vmem:[%s4775_s3 + $0x3e8] sm:$0xff] %vm166_vm0, %v2039_v30  ;;  %v1521_v8 = vrot.slane %v1142_v1, 1  ;;  %v1593_v48 = vrot.slane %v1178_v38, 1 }
 0x144   :  { %2074 = vst.msk [vmem:[%s4775_s3 + $0x90] sm:$0xff] %vm166_vm0, %v1932_v29  ;;  %v1379_v2 = vrot.slane %v1071_v31, 1  ;;  %v1451_v3 = vrot.slane %v1107_v46, 1 }
 0x145   :  { %2110 = vst.msk [vmem:[%s4775_s3 + $0x1b0] sm:$0xff] %vm166_vm0, %v1968_v40  ;;  %v1522_v28 = vsel %vm1333_vm1, %v1519_v43, %v1521_v8  ;;  %v1594_v32 = vsel %vm1333_vm1, %v1591_v47, %v1593_v48 }
 0x146   :  { %v4145_v24 = vmax.f32 %v1141_v49, %v1522_v28  ;;  %v4147_v52 = vmax.f32 %v1177_v17, %v1594_v32  ;;  %v1380_v6 = vsel %vm1333_vm1, %v1377_v20, %v1379_v2  ;;  %v1452_v33 = vsel %vm1333_vm1, %v1449_v19, %v1451_v3  ;;  %v901_v60 = vpop.f32.mrf.mxu2  ;;  %v1009_v7 = vpop.f32.mrf.mxu3 }
 0x147   :  { %v4151_v11 = vmax.f32 %v1070_v45, %v1380_v6  ;;  %v4153_v63 = vmax.f32 %v1106_v27, %v1452_v33  ;;  %v902_v59 = vadd.f32 %v3653_v42, %v901_v60  ;;  %v1010_v43 = vadd.f32 %v3653_v42, %v1009_v7  ;;  %v688_v13 = vpop.f32.mrf.mxu0  ;;  %v796_v47 = vpop.f32.mrf.mxu1 }
 0x148   :  { %v2004_v49 = vmax.f32 %v4025_v15, %v4145_v24  ;;  %v2040_v17 = vmax.f32 %v4027_v14, %v4147_v52  ;;  %v689_v20 = vadd.f32 %v3653_v42, %v688_v13  ;;  %v797_v19 = vadd.f32 %v3653_v42, %v796_v47 }
 0x149   :  { %v1933_v45 = vmax.f32 %v4031_v21, %v4151_v11  ;;  %v1969_v27 = vmax.f32 %v4033_v9, %v4153_v63  ;;  %v1143_v39 = vmax.f32 %v902_v59, 0.0  ;;  %v1179_v0 = vmax.f32 %v1010_v43, 0.0 }
 0x14a   :  { %2146 = vst.msk [vmem:[%s4775_s3 + $0x2d0] sm:$0xff] %vm166_vm0, %v2004_v49  ;;  %v1072_v15 = vmax.f32 %v689_v20, 0.0  ;;  %v1108_v34 = vmax.f32 %v797_v19, 0.0 }
 0x14b   :  { %2182 = vst.msk [vmem:[%s4775_s3 + $0x3f0] sm:$0xff] %vm166_vm0, %v2040_v17  ;;  %v1523_v14 = vrot.slane %v1143_v39, 1  ;;  %v1595_v4 = vrot.slane %v1179_v0, 1 }
 0x14c   :  { %2075 = vst.msk [vmem:[%s4775_s3 + $0x98] sm:$0xff] %vm166_vm0, %v1933_v45  ;;  %v1381_v21 = vrot.slane %v1072_v15, 1  ;;  %v1453_v9 = vrot.slane %v1108_v34, 1 }
 0x14d   :  { %2111 = vst.msk [vmem:[%s4775_s3 + $0x1b8] sm:$0xff] %vm166_vm0, %v1969_v27  ;;  %v1524_v36 = vsel %vm1333_vm1, %v1521_v8, %v1523_v14  ;;  %v1596_v41 = vsel %vm1333_vm1, %v1593_v48, %v1595_v4 }
 0x14e   :  { %v4185_v30 = vmax.f32 %v1142_v1, %v1524_v36  ;;  %v4187_v44 = vmax.f32 %v1178_v38, %v1596_v41  ;;  %v1382_v57 = vsel %vm1333_vm1, %v1379_v2, %v1381_v21  ;;  %v1454_v29 = vsel %vm1333_vm1, %v1451_v3, %v1453_v9  ;;  %v904_v40 = vpop.f32.mrf.mxu2  ;;  %v1012_v28 = vpop.f32.mrf.mxu3 }
 0x14f   :  { %v4191_v32 = vmax.f32 %v1071_v31, %v1382_v57  ;;  %v4193_v6 = vmax.f32 %v1107_v46, %v1454_v29  ;;  %v905_v33 = vadd.f32 %v3653_v42, %v904_v40  ;;  %v1013_v8 = vadd.f32 %v3653_v42, %v1012_v28  ;;  %v691_v60 = vpop.f32.mrf.mxu0  ;;  %v799_v48 = vpop.f32.mrf.mxu1 }
 0x150   :  { %v2005_v1 = vmax.f32 %v4065_v53, %v4185_v30  ;;  %v2041_v38 = vmax.f32 %v4067_v35, %v4187_v44  ;;  %v692_v2 = vadd.f32 %v3653_v42, %v691_v60  ;;  %v800_v3 = vadd.f32 %v3653_v42, %v799_v48 }
 0x151   :  { %v1934_v31 = vmax.f32 %v4071_v22, %v4191_v32  ;;  %v1970_v46 = vmax.f32 %v4073_v16, %v4193_v6  ;;  %v1144_v7 = vmax.f32 %v905_v33, 0.0  ;;  %v1180_v59 = vmax.f32 %v1013_v8, 0.0 }
 0x152   :  { %2147 = vst.msk [vmem:[%s4775_s3 + $0x2d8] sm:$0xff] %vm166_vm0, %v2005_v1  ;;  %v1073_v53 = vmax.f32 %v692_v2, 0.0  ;;  %v1109_v43 = vmax.f32 %v800_v3, 0.0 }
 0x153   :  { %2183 = vst.msk [vmem:[%s4775_s3 + $0x3f8] sm:$0xff] %vm166_vm0, %v2041_v38  ;;  %v1525_v35 = vrot.slane %v1144_v7, 1  ;;  %v1597_v13 = vrot.slane %v1180_v59, 1 }
 0x154   :  { %2076 = vst.msk [vmem:[%s4775_s3 + $0xa0] sm:$0xff] %vm166_vm0, %v1934_v31  ;;  %v1383_v22 = vrot.slane %v1073_v53, 1  ;;  %v1455_v16 = vrot.slane %v1109_v43, 1 }
 0x155   :  { %2112 = vst.msk [vmem:[%s4775_s3 + $0x1c0] sm:$0xff] %vm166_vm0, %v1970_v46  ;;  %v1526_v47 = vsel %vm1333_vm1, %v1523_v14, %v1525_v35  ;;  %v1598_v49 = vsel %vm1333_vm1, %v1595_v4, %v1597_v13 }
 0x156   :  { %v4225_v17 = vmax.f32 %v1143_v39, %v1526_v47  ;;  %v4227_v20 = vmax.f32 %v1179_v0, %v1598_v49  ;;  %v1384_v19 = vsel %vm1333_vm1, %v1381_v21, %v1383_v22  ;;  %v1456_v45 = vsel %vm1333_vm1, %v1453_v9, %v1455_v16  ;;  %v907_v27 = vpop.f32.mrf.mxu2  ;;  %v1015_v36 = vpop.f32.mrf.mxu3 }
 0x157   :  { %v4231_v41 = vmax.f32 %v1072_v15, %v1384_v19  ;;  %v4233_v57 = vmax.f32 %v1108_v34, %v1456_v45  ;;  %v908_v29 = vadd.f32 %v3653_v42, %v907_v27  ;;  %v1016_v14 = vadd.f32 %v3653_v42, %v1015_v36  ;;  %v694_v40 = vpop.f32.mrf.mxu0  ;;  %v802_v4 = vpop.f32.mrf.mxu1 }
 0x158   :  { %v2006_v39 = vmax.f32 %v4105_v10, %v4225_v17  ;;  %v2042_v0 = vmax.f32 %v4107_v5, %v4227_v20  ;;  %v695_v21 = vadd.f32 %v3653_v42, %v694_v40  ;;  %v803_v9 = vadd.f32 %v3653_v42, %v802_v4 }
 0x159   :  { %v1935_v15 = vmax.f32 %v4111_v23, %v4231_v41  ;;  %v1971_v34 = vmax.f32 %v4113_v26, %v4233_v57  ;;  %v1145_v28 = vmax.f32 %v908_v29, 0.0  ;;  %v1181_v33 = vmax.f32 %v1016_v14, 0.0 }
 0x15a   :  { %2148 = vst.msk [vmem:[%s4775_s3 + $0x2e0] sm:$0xff] %vm166_vm0, %v2006_v39  ;;  %v1074_v10 = vmax.f32 %v695_v21, 0.0  ;;  %v1110_v8 = vmax.f32 %v803_v9, 0.0 }
 0x15b   :  { %2184 = vst.msk [vmem:[%s4775_s3 + $0x400] sm:$0xff] %vm166_vm0, %v2042_v0  ;;  %v1527_v5 = vrot.slane %v1145_v28, 1  ;;  %v1599_v60 = vrot.slane %v1181_v33, 1 }
 0x15c   :  { %2077 = vst.msk [vmem:[%s4775_s3 + $0xa8] sm:$0xff] %vm166_vm0, %v1935_v15  ;;  %v1385_v23 = vrot.slane %v1074_v10, 1  ;;  %v1457_v26 = vrot.slane %v1110_v8, 1 }
 0x15d   :  { %2113 = vst.msk [vmem:[%s4775_s3 + $0x1c8] sm:$0xff] %vm166_vm0, %v1971_v34  ;;  %v1528_v48 = vsel %vm1333_vm1, %v1525_v35, %v1527_v5  ;;  %v1600_v1 = vsel %vm1333_vm1, %v1597_v13, %v1599_v60 }
 0x15e   :  { %v4265_v38 = vmax.f32 %v1144_v7, %v1528_v48  ;;  %v4267_v2 = vmax.f32 %v1180_v59, %v1600_v1  ;;  %v1386_v3 = vsel %vm1333_vm1, %v1383_v22, %v1385_v23  ;;  %v1458_v31 = vsel %vm1333_vm1, %v1455_v16, %v1457_v26  ;;  %v910_v46 = vpop.f32.mrf.mxu2  ;;  %v1018_v47 = vpop.f32.mrf.mxu3 }
 0x15f   :  { %v4271_v49 = vmax.f32 %v1073_v53, %v1386_v3  ;;  %v4273_v19 = vmax.f32 %v1109_v43, %v1458_v31  ;;  %v911_v45 = vadd.f32 %v3653_v42, %v910_v46  ;;  %v1019_v35 = vadd.f32 %v3653_v42, %v1018_v47  ;;  %v697_v27 = vpop.f32.mrf.mxu0  ;;  %v805_v13 = vpop.f32.mrf.mxu1 }
 0x160   :  { %v2007_v7 = vmax.f32 %v4145_v24, %v4265_v38  ;;  %v2043_v59 = vmax.f32 %v4147_v52, %v4267_v2  ;;  %v698_v22 = vadd.f32 %v3653_v42, %v697_v27  ;;  %v806_v16 = vadd.f32 %v3653_v42, %v805_v13 }
 0x161   :  { %v1936_v53 = vmax.f32 %v4151_v11, %v4271_v49  ;;  %v1972_v43 = vmax.f32 %v4153_v63, %v4273_v19  ;;  %v1146_v36 = vmax.f32 %v911_v45, 0.0  ;;  %v1182_v29 = vmax.f32 %v1019_v35, 0.0 }
 0x162   :  { %2149 = vst.msk [vmem:[%s4775_s3 + $0x2e8] sm:$0xff] %vm166_vm0, %v2007_v7  ;;  %v1075_v24 = vmax.f32 %v698_v22, 0.0  ;;  %v1111_v14 = vmax.f32 %v806_v16, 0.0 }
 0x163   :  { %2185 = vst.msk [vmem:[%s4775_s3 + $0x408] sm:$0xff] %vm166_vm0, %v2043_v59  ;;  %v1529_v52 = vrot.slane %v1146_v36, 1  ;;  %v1601_v40 = vrot.slane %v1182_v29, 1 }
 0x164   :  { %2078 = vst.msk [vmem:[%s4775_s3 + $0xb0] sm:$0xff] %vm166_vm0, %v1936_v53  ;;  %v1387_v11 = vrot.slane %v1075_v24, 1  ;;  %v1459_v63 = vrot.slane %v1111_v14, 1 }
 0x165   :  { %2114 = vst.msk [vmem:[%s4775_s3 + $0x1d0] sm:$0xff] %vm166_vm0, %v1972_v43  ;;  %v1530_v4 = vsel %vm1333_vm1, %v1527_v5, %v1529_v52  ;;  %v1602_v39 = vsel %vm1333_vm1, %v1599_v60, %v1601_v40 }
 0x166   :  { %v4305_v0 = vmax.f32 %v1145_v28, %v1530_v4  ;;  %v4307_v21 = vmax.f32 %v1181_v33, %v1602_v39  ;;  %v1388_v9 = vsel %vm1333_vm1, %v1385_v23, %v1387_v11  ;;  %v1460_v15 = vsel %vm1333_vm1, %v1457_v26, %v1459_v63  ;;  %v913_v34 = vpop.f32.mrf.mxu2  ;;  %v1021_v48 = vpop.f32.mrf.mxu3 }
 0x167   :  { %v4311_v1 = vmax.f32 %v1074_v10, %v1388_v9  ;;  %v4313_v3 = vmax.f32 %v1110_v8, %v1460_v15  ;;  %v914_v31 = vadd.f32 %v3653_v42, %v913_v34  ;;  %v1022_v5 = vadd.f32 %v3653_v42, %v1021_v48  ;;  %v700_v46 = vpop.f32.mrf.mxu0  ;;  %v808_v60 = vpop.f32.mrf.mxu1 }
 0x168   :  { %v2008_v28 = vmax.f32 %v4185_v30, %v4305_v0  ;;  %v2044_v33 = vmax.f32 %v4187_v44, %v4307_v21  ;;  %v701_v23 = vadd.f32 %v3653_v42, %v700_v46  ;;  %v809_v26 = vadd.f32 %v3653_v42, %v808_v60 }
 0x169   :  { %v1937_v10 = vmax.f32 %v4191_v32, %v4311_v1  ;;  %v1973_v8 = vmax.f32 %v4193_v6, %v4313_v3  ;;  %v1147_v47 = vmax.f32 %v914_v31, 0.0  ;;  %v1183_v45 = vmax.f32 %v1022_v5, 0.0 }
 0x16a   :  { %2150 = vst.msk [vmem:[%s4775_s3 + $0x2f0] sm:$0xff] %vm166_vm0, %v2008_v28  ;;  %v1076_v30 = vmax.f32 %v701_v23, 0.0  ;;  %v1112_v35 = vmax.f32 %v809_v26, 0.0 }
 0x16b   :  { %2186 = vst.msk [vmem:[%s4775_s3 + $0x410] sm:$0xff] %vm166_vm0, %v2044_v33  ;;  %v1531_v44 = vrot.slane %v1147_v47, 1  ;;  %v1603_v27 = vrot.slane %v1183_v45, 1 }
 0x16c   :  { %2079 = vst.msk [vmem:[%s4775_s3 + $0xb8] sm:$0xff] %vm166_vm0, %v1937_v10  ;;  %v1389_v32 = vrot.slane %v1076_v30, 1  ;;  %v1461_v6 = vrot.slane %v1112_v35, 1 }
 0x16d   :  { %2115 = vst.msk [vmem:[%s4775_s3 + $0x1d8] sm:$0xff] %vm166_vm0, %v1973_v8  ;;  %v1532_v13 = vsel %vm1333_vm1, %v1529_v52, %v1531_v44  ;;  %v1604_v7 = vsel %vm1333_vm1, %v1601_v40, %v1603_v27 }
 0x16e   :  { %v4345_v59 = vmax.f32 %v1146_v36, %v1532_v13  ;;  %v4347_v22 = vmax.f32 %v1182_v29, %v1604_v7  ;;  %v1390_v16 = vsel %vm1333_vm1, %v1387_v11, %v1389_v32  ;;  %v1462_v53 = vsel %vm1333_vm1, %v1459_v63, %v1461_v6  ;;  %v916_v43 = vpop.f32.mrf.mxu2  ;;  %v1024_v4 = vpop.f32.mrf.mxu3 }
 0x16f   :  { %v4351_v39 = vmax.f32 %v1075_v24, %v1390_v16  ;;  %v4353_v9 = vmax.f32 %v1111_v14, %v1462_v53  ;;  %v917_v15 = vadd.f32 %v3653_v42, %v916_v43  ;;  %v1025_v52 = vadd.f32 %v3653_v42, %v1024_v4  ;;  %v703_v34 = vpop.f32.mrf.mxu0  ;;  %v811_v40 = vpop.f32.mrf.mxu1 }
 0x170   :  { %v2009_v36 = vmax.f32 %v4225_v17, %v4345_v59  ;;  %v2045_v29 = vmax.f32 %v4227_v20, %v4347_v22  ;;  %v704_v11 = vadd.f32 %v3653_v42, %v703_v34  ;;  %v812_v63 = vadd.f32 %v3653_v42, %v811_v40 }
 0x171   :  { %v1938_v24 = vmax.f32 %v4231_v41, %v4351_v39  ;;  %v1974_v14 = vmax.f32 %v4233_v57, %v4353_v9  ;;  %v1148_v48 = vmax.f32 %v917_v15, 0.0  ;;  %v1184_v31 = vmax.f32 %v1025_v52, 0.0 }
 0x172   :  { %2151 = vst.msk [vmem:[%s4775_s3 + $0x2f8] sm:$0xff] %vm166_vm0, %v2009_v36  ;;  %v1077_v17 = vmax.f32 %v704_v11, 0.0  ;;  %v1113_v5 = vmax.f32 %v812_v63, 0.0 }
 0x173   :  { %2187 = vst.msk [vmem:[%s4775_s3 + $0x418] sm:$0xff] %vm166_vm0, %v2045_v29  ;;  %v1533_v42 = vrot.slane %v1148_v48, 1  ;;  %v1605_v20 = vrot.slane %v1184_v31, 1 }
 0x174   :  { %2080 = vst.msk [vmem:[%s4775_s3 + $0xc0] sm:$0xff] %vm166_vm0, %v1938_v24  ;;  %v1391_v41 = vrot.slane %v1077_v17, 1  ;;  %v1463_v57 = vrot.slane %v1113_v5, 1 }
 0x175   :  { %2116 = vst.msk [vmem:[%s4775_s3 + $0x1e0] sm:$0xff] %vm166_vm0, %v1974_v14  ;;  %v1534_v46 = vsel %vm1333_vm1, %v1531_v44, %v1533_v42  ;;  %v1606_v60 = vsel %vm1333_vm1, %v1603_v27, %v1605_v20  ;;  %v4398_v44 = vld [vmem:[%s4774_s2] ss:$0 sm:$0xff] }
 0x176   :  { %v4385_v28 = vmax.f32 %v1147_v47, %v1534_v46  ;;  %v4387_v33 = vmax.f32 %v1183_v45, %v1606_v60  ;;  %v1392_v23 = vsel %vm1333_vm1, %v1389_v32, %v1391_v41  ;;  %v1464_v26 = vsel %vm1333_vm1, %v1461_v6, %v1463_v57  ;;  %v919_v10 = vpop.f32.mrf.mxu2  ;;  %v1027_v8 = vpop.f32.mrf.mxu3 }
 0x177   :  { %v4391_v13 = vmax.f32 %v1076_v30, %v1392_v23  ;;  %v4393_v7 = vmax.f32 %v1112_v35, %v1464_v26  ;;  %v920_v47 = vadd.f32 %v4398_v44, %v919_v10  ;;  %v1028_v45 = vadd.f32 %v4398_v44, %v1027_v8  ;;  %v706_v27 = vpop.f32.mrf.mxu0  ;;  %v814_v16 = vpop.f32.mrf.mxu1 }
 0x178   :  { %v2010_v32 = vmax.f32 %v4265_v38, %v4385_v28  ;;  %v2046_v30 = vmax.f32 %v4267_v2, %v4387_v33  ;;  %v707_v35 = vadd.f32 %v4398_v44, %v706_v27  ;;  %v815_v6 = vadd.f32 %v4398_v44, %v814_v16 }
 0x179   :  { %v1939_v53 = vmax.f32 %v4271_v49, %v4391_v13  ;;  %v1975_v43 = vmax.f32 %v4273_v19, %v4393_v7  ;;  %v1149_v4 = vmax.f32 %v920_v47, 0.0  ;;  %v1185_v15 = vmax.f32 %v1028_v45, 0.0 }
 0x17a   :  { %2152 = vst.msk [vmem:[%s4775_s3 + $0x300] sm:$0xff] %vm166_vm0, %v2010_v32  ;;  %v1078_v38 = vmax.f32 %v707_v35, 0.0  ;;  %v1114_v52 = vmax.f32 %v815_v6, 0.0 }
 0x17b   :  { %2188 = vst.msk [vmem:[%s4775_s3 + $0x420] sm:$0xff] %vm166_vm0, %v2046_v30  ;;  %v1535_v2 = vrot.slane %v1149_v4, 1  ;;  %v1607_v34 = vrot.slane %v1185_v15, 1 }
 0x17c   :  { %2081 = vst.msk [vmem:[%s4775_s3 + $0xc8] sm:$0xff] %vm166_vm0, %v1939_v53  ;;  %v1393_v49 = vrot.slane %v1078_v38, 1  ;;  %v1465_v19 = vrot.slane %v1114_v52, 1 }
 0x17d   :  { %2117 = vst.msk [vmem:[%s4775_s3 + $0x1e8] sm:$0xff] %vm166_vm0, %v1975_v43  ;;  %v1536_v40 = vsel %vm1333_vm1, %v1533_v42, %v1535_v2  ;;  %v1608_v36 = vsel %vm1333_vm1, %v1605_v20, %v1607_v34 }
 0x17e   :  { %v4430_v29 = vmax.f32 %v1148_v48, %v1536_v40  ;;  %v4432_v11 = vmax.f32 %v1184_v31, %v1608_v36  ;;  %v1394_v63 = vsel %vm1333_vm1, %v1391_v41, %v1393_v49  ;;  %v1466_v24 = vsel %vm1333_vm1, %v1463_v57, %v1465_v19  ;;  %v922_v14 = vpop.f32.mrf.mxu2  ;;  %v1030_v46 = vpop.f32.mrf.mxu3 }
 0x17f   :  { %v4436_v60 = vmax.f32 %v1077_v17, %v1394_v63  ;;  %v4438_v23 = vmax.f32 %v1113_v5, %v1466_v24  ;;  %v923_v26 = vadd.f32 %v4398_v44, %v922_v14  ;;  %v1031_v42 = vadd.f32 %v4398_v44, %v1030_v46  ;;  %v709_v10 = vpop.f32.mrf.mxu0  ;;  %v817_v20 = vpop.f32.mrf.mxu1 }
 0x180   :  { %v2011_v48 = vmax.f32 %v4305_v0, %v4430_v29  ;;  %v2047_v31 = vmax.f32 %v4307_v21, %v4432_v11  ;;  %v710_v41 = vadd.f32 %v4398_v44, %v709_v10  ;;  %v818_v57 = vadd.f32 %v4398_v44, %v817_v20 }
 0x181   :  { %v1940_v17 = vmax.f32 %v4311_v1, %v4436_v60  ;;  %v1976_v5 = vmax.f32 %v4313_v3, %v4438_v23  ;;  %v1150_v8 = vmax.f32 %v923_v26, 0.0  ;;  %v1186_v47 = vmax.f32 %v1031_v42, 0.0 }
 0x182   :  { %2153 = vst.msk [vmem:[%s4775_s3 + $0x308] sm:$0xff] %vm166_vm0, %v2011_v48  ;;  %v1079_v0 = vmax.f32 %v710_v41, 0.0  ;;  %v1115_v45 = vmax.f32 %v818_v57, 0.0 }
 0x183   :  { %2189 = vst.msk [vmem:[%s4775_s3 + $0x428] sm:$0xff] %vm166_vm0, %v2047_v31  ;;  %v1537_v21 = vrot.slane %v1150_v8, 1  ;;  %v1609_v27 = vrot.slane %v1186_v47, 1 }
 0x184   :  { %2082 = vst.msk [vmem:[%s4775_s3 + $0xd0] sm:$0xff] %vm166_vm0, %v1940_v17  ;;  %v1395_v1 = vrot.slane %v1079_v0, 1  ;;  %v1467_v3 = vrot.slane %v1115_v45, 1 }
 0x185   :  { %2118 = vst.msk [vmem:[%s4775_s3 + $0x1f0] sm:$0xff] %vm166_vm0, %v1976_v5  ;;  %v1538_v16 = vsel %vm1333_vm1, %v1535_v2, %v1537_v21  ;;  %v1610_v32 = vsel %vm1333_vm1, %v1607_v34, %v1609_v27 }
 0x186   :  { %v4470_v30 = vmax.f32 %v1149_v4, %v1538_v16  ;;  %v4472_v35 = vmax.f32 %v1185_v15, %v1610_v32  ;;  %v1396_v6 = vsel %vm1333_vm1, %v1393_v49, %v1395_v1  ;;  %v1468_v53 = vsel %vm1333_vm1, %v1465_v19, %v1467_v3  ;;  %v925_v43 = vpop.f32.mrf.mxu2  ;;  %v1033_v40 = vpop.f32.mrf.mxu3 }
 0x187   :  { %v4476_v36 = vmax.f32 %v1078_v38, %v1396_v6  ;;  %v4478_v63 = vmax.f32 %v1114_v52, %v1468_v53  ;;  %v926_v24 = vadd.f32 %v4398_v44, %v925_v43  ;;  %v1034_v2 = vadd.f32 %v4398_v44, %v1033_v40  ;;  %v712_v14 = vpop.f32.mrf.mxu0  ;;  %v820_v34 = vpop.f32.mrf.mxu1 }
 0x188   :  { %v2012_v4 = vmax.f32 %v4345_v59, %v4470_v30  ;;  %v2048_v15 = vmax.f32 %v4347_v22, %v4472_v35  ;;  %v713_v49 = vadd.f32 %v4398_v44, %v712_v14  ;;  %v821_v19 = vadd.f32 %v4398_v44, %v820_v34 }
 0x189   :  { %v1941_v38 = vmax.f32 %v4351_v39, %v4476_v36  ;;  %v1977_v52 = vmax.f32 %v4353_v9, %v4478_v63  ;;  %v1151_v46 = vmax.f32 %v926_v24, 0.0  ;;  %v1187_v26 = vmax.f32 %v1034_v2, 0.0 }
 0x18a   :  { %2154 = vst.msk [vmem:[%s4775_s3 + $0x310] sm:$0xff] %vm166_vm0, %v2012_v4  ;;  %v1080_v59 = vmax.f32 %v713_v49, 0.0  ;;  %v1116_v42 = vmax.f32 %v821_v19, 0.0 }
 0x18b   :  { %2190 = vst.msk [vmem:[%s4775_s3 + $0x430] sm:$0xff] %vm166_vm0, %v2048_v15  ;;  %v1539_v22 = vrot.slane %v1151_v46, 1  ;;  %v1611_v10 = vrot.slane %v1187_v26, 1 }
 0x18c   :  { %2083 = vst.msk [vmem:[%s4775_s3 + $0xd8] sm:$0xff] %vm166_vm0, %v1941_v38  ;;  %v1397_v39 = vrot.slane %v1080_v59, 1  ;;  %v1469_v9 = vrot.slane %v1116_v42, 1 }
 0x18d   :  { %2119 = vst.msk [vmem:[%s4775_s3 + $0x1f8] sm:$0xff] %vm166_vm0, %v1977_v52  ;;  %v1540_v20 = vsel %vm1333_vm1, %v1537_v21, %v1539_v22  ;;  %v1612_v48 = vsel %vm1333_vm1, %v1609_v27, %v1611_v10 }
 0x18e   :  { %v4510_v31 = vmax.f32 %v1150_v8, %v1540_v20  ;;  %v4512_v41 = vmax.f32 %v1186_v47, %v1612_v48  ;;  %v1398_v57 = vsel %vm1333_vm1, %v1395_v1, %v1397_v39  ;;  %v1470_v17 = vsel %vm1333_vm1, %v1467_v3, %v1469_v9  ;;  %v928_v5 = vpop.f32.mrf.mxu2  ;;  %v1036_v16 = vpop.f32.mrf.mxu3 }
 0x18f   :  { %v4516_v32 = vmax.f32 %v1079_v0, %v1398_v57  ;;  %v4518_v6 = vmax.f32 %v1115_v45, %v1470_v17  ;;  %v929_v53 = vadd.f32 %v4398_v44, %v928_v5  ;;  %v1037_v21 = vadd.f32 %v4398_v44, %v1036_v16  ;;  %v715_v43 = vpop.f32.mrf.mxu0  ;;  %v823_v27 = vpop.f32.mrf.mxu1 }
 0x190   :  { %v2013_v8 = vmax.f32 %v4385_v28, %v4510_v31  ;;  %v2049_v47 = vmax.f32 %v4387_v33, %v4512_v41  ;;  %v716_v1 = vadd.f32 %v4398_v44, %v715_v43  ;;  %v824_v3 = vadd.f32 %v4398_v44, %v823_v27 }
 0x191   :  { %v1942_v0 = vmax.f32 %v4391_v13, %v4516_v32  ;;  %v1978_v45 = vmax.f32 %v4393_v7, %v4518_v6  ;;  %v1152_v40 = vmax.f32 %v929_v53, 0.0  ;;  %v4532_v24 = vmax.f32 %v1037_v21, 0.0 }
 0x192   :  { %2155 = vst.msk [vmem:[%s4775_s3 + $0x318] sm:$0xff] %vm166_vm0, %v2013_v8  ;;  %v1081_v28 = vmax.f32 %v716_v1, 0.0  ;;  %v1117_v33 = vmax.f32 %v824_v3, 0.0 }
 0x193   :  { %2191 = vst.msk [vmem:[%s4775_s3 + $0x438] sm:$0xff] %vm166_vm0, %v2049_v47  ;;  %v1541_v2 = vrot.slane %v1152_v40, 1  ;;  %v4543_v13 = vrot.slane %v4532_v24, 1 }
 0x194   :  { %2084 = vst.msk [vmem:[%s4775_s3 + $0xe0] sm:$0xff] %vm166_vm0, %v1942_v0  ;;  %v1399_v7 = vrot.slane %v1081_v28, 1  ;;  %v1471_v14 = vrot.slane %v1117_v33, 1 }
 0x195   :  { %2120 = vst.msk [vmem:[%s4775_s3 + $0x200] sm:$0xff] %vm166_vm0, %v1978_v45  ;;  %v1542_v34 = vsel %vm1333_vm1, %v1539_v22, %v1541_v2  ;;  %v1614_v4 = vsel %vm1333_vm1, %v1611_v10, %v4543_v13 }
 0x196   :  { %v4556_v15 = vmax.f32 %v1151_v46, %v1542_v34  ;;  %v4558_v49 = vmax.f32 %v1187_v26, %v1614_v4  ;;  %v1400_v19 = vsel %vm1333_vm1, %v1397_v39, %v1399_v7  ;;  %v1472_v38 = vsel %vm1333_vm1, %v1469_v9, %v1471_v14  ;;  %v931_v52 = vpop.f32.mrf.mxu2  ;;  %v1039_v20 = vpop.f32.mrf.mxu3 }
 0x197   :  { %v4563_v48 = vadd.f32 %v4398_v44, %v931_v52  ;;  %v4566_v57 = vadd.f32 %v4398_v44, %v1039_v20  ;;  %v718_v22 = vpop.f32.mrf.mxu0  ;;  %v826_v17 = vpop.f32.mrf.mxu1  ;;  %v4568_v5 = vmax.f32 %v1080_v59, %v1400_v19  ;;  %v4570_v46 = vmax.f32 %v1116_v42, %v1472_v38 }
 0x198   :  { %v2014_v26 = vmax.f32 %v4430_v29, %v4556_v15  ;;  %v2050_v10 = vmax.f32 %v4432_v11, %v4558_v49  ;;  %v4577_v39 = vadd.f32 %v4398_v44, %v718_v22  ;;  %v4580_v9 = vadd.f32 %v4398_v44, %v826_v17 }
 0x199   :  { %v1153_v16 = vmax.f32 %v4563_v48, 0.0  ;;  %v1189_v53 = vmax.f32 %v4566_v57, 0.0  ;;  %v1943_v59 = vmax.f32 %v4436_v60, %v4568_v5  ;;  %v1979_v42 = vmax.f32 %v4438_v23, %v4570_v46 }
 0x19a   :  { %2156 = vst.msk [vmem:[%s4775_s3 + $0x320] sm:$0xff] %vm166_vm0, %v2014_v26  ;;  %v1082_v29 = vmax.f32 %v4577_v39, 0.0  ;;  %v1118_v11 = vmax.f32 %v4580_v9, 0.0  ;;  %v2364_v4 = vmov 0.0  }
 0x19b   :  { %2192 = vst.msk [vmem:[%s4775_s3 + $0x440] sm:$0xff] %vm166_vm0, %v2050_v10  ;;  %v1543_v21 = vrot.slane %v1153_v16, 1  ;;  %v1900_v43 = vrot.slane %v1189_v53, 1 }
 0x19c   :  { %v1401_v60 = vrot.slane %v1082_v29, 1  ;;  %v1473_v23 = vrot.slane %v1118_v11, 1  ;;  %2085 = vst.msk [vmem:[%s4775_s3 + $0xe8] sm:$0xff] %vm166_vm0, %v1943_v59 }
 0x19d   :  { %v1544_v27 = vsel %vm1333_vm1, %v1541_v2, %v1543_v21  ;;  %v1901_v8 = vsel %vm1333_vm1, %v4543_v13, %v1900_v43  ;;  %2121 = vst.msk [vmem:[%s4775_s3 + $0x208] sm:$0xff] %vm166_vm0, %v1979_v42 }
 0x19e   :  { %v1910_v47 = vmax.f32 %v4532_v24, %v1901_v8  ;;  %v1402_v1 = vsel %vm1333_vm1, %v1399_v7, %v1401_v60  ;;  %v1474_v3 = vsel %vm1333_vm1, %v1471_v14, %v1473_v23  ;;  %v934_v0 = vpop.f32.mrf.mxu2  ;;  %v1042_v45 = vpop.f32.mrf.mxu3  ;;  %v4614_v34 = vmax.f32 %v1152_v40, %v1544_v27  ;;  %2197 = vst.msk [vmem:[%s4775_s3 + $0x468] sm:$0xff] %vm166_vm0, %v2364_v4 }
 0x19f   :  { %v1789_v2 = vmax.f32 %v1081_v28, %v1402_v1  ;;  %v1825_v19 = vmax.f32 %v1117_v33, %v1474_v3  ;;  %v4621_v38 = vadd.f32 %v4398_v44, %v934_v0  ;;  %v4624_v52 = vadd.f32 %v4398_v44, %v1042_v45  ;;  %v721_v7 = vpop.f32.mrf.mxu0  ;;  %v829_v14 = vpop.f32.mrf.mxu1  ;;  %2198 = vst.msk [vmem:[%s4775_s3 + $0x470] sm:$0xff] %vm166_vm0, %v2364_v4 }
 0x1a0   :  { %v2051_v40 = vmax.f32 %v4472_v35, %v1910_v47  ;;  %v722_v20 = vadd.f32 %v4398_v44, %v721_v7  ;;  %v830_v28 = vadd.f32 %v4398_v44, %v829_v14  ;;  %2199 = vst.msk [vmem:[%s4775_s3 + $0x478] sm:$0xff] %vm166_vm0, %v2364_v4 }
 0x1a1   :  { %v1944_v33 = vmax.f32 %v4476_v36, %v1789_v2  ;;  %v1947_v48 = vmax.f32 %v1789_v2, %v2831_v25  ;;  %v1980_v57 = vmax.f32 %v4478_v63, %v1825_v19  ;;  %v1983_v22 = vmax.f32 %v1825_v19, %v2904_v55 }
 0x1a2   :  { %2193 = vst.msk [vmem:[%s4775_s3 + $0x448] sm:$0xff] %vm166_vm0, %v2051_v40  ;;  %v1154_v35 = vmax.f32 %v4621_v38, 0.0  ;;  %v1190_v17 = vmax.f32 %v4624_v52, 0.0  ;;  %v1083_v26 = vmax.f32 %v722_v20, 0.0  ;;  %v1119_v10 = vmax.f32 %v830_v28, 0.0 }
 0x1a3   :  { %2086 = vst.msk [vmem:[%s4775_s3 + $0xf0] sm:$0xff] %vm166_vm0, %v1944_v33  ;;  %v2015_v25 = vmax.f32 %v4470_v30, %v4614_v34 }
 0x1a4   :  { %2089 = vst.msk [vmem:[%s4775_s3 + $0x108] sm:$0xff] %vm166_vm0, %v1947_v48  ;;  %v1545_v55 = vrot.slane %v1154_v35, 1  ;;  %v1902_v36 = vrot.slane %v1190_v17, 1  ;;  %v1403_v63 = vrot.slane %v1083_v26, 1  ;;  %v1475_v39 = vrot.slane %v1119_v10, 1 }
 0x1a5   :  { %2122 = vst.msk [vmem:[%s4775_s3 + $0x210] sm:$0xff] %vm166_vm0, %v1980_v57 }
 0x1a6   :  { %2125 = vst.msk [vmem:[%s4775_s3 + $0x228] sm:$0xff] %vm166_vm0, %v1983_v22  ;;  %v1546_v30 = vsel %vm1333_vm1, %v1543_v21, %v1545_v55  ;;  %v1903_v59 = vsel %vm1333_vm1, %v1900_v43, %v1902_v36  ;;  %v1404_v42 = vsel %vm1333_vm1, %v1401_v60, %v1403_v63  ;;  %v1406_v27 = vsel %vm1333_vm1, %v1403_v63, %v2762_v54  ;;  %v937_v8 = vpop.f32.mrf.mxu2  ;;  %v1045_v47 = vpop.f32.mrf.mxu3 }
 0x1a7   :  { %v1861_v1 = vmax.f32 %v1153_v16, %v1546_v30  ;;  %v1911_v3 = vmax.f32 %v1189_v53, %v1903_v59  ;;  %v1790_v0 = vmax.f32 %v1082_v29, %v1404_v42  ;;  %v1791_v45 = vmax.f32 %v1083_v26, %v1406_v27  ;;  %2157 = vst.msk [vmem:[%s4775_s3 + $0x328] sm:$0xff] %vm166_vm0, %v2015_v25 }
 0x1a8   :  { %v1476_v21 = vsel %vm1333_vm1, %v1473_v23, %v1475_v39  ;;  %v1478_v43 = vsel %vm1333_vm1, %v1475_v39, %v2772_v61  ;;  %v938_v60 = vadd.f32 %v4398_v44, %v937_v8  ;;  %v1046_v54 = vadd.f32 %v4398_v44, %v1045_v47 }
 0x1a9   :  { %v2016_v4 = vmax.f32 %v4510_v31, %v1861_v1  ;;  %v2019_v16 = vmax.f32 %v1861_v1, %v2908_v56  ;;  %v2052_v53 = vmax.f32 %v4512_v41, %v1911_v3  ;;  %v1945_v29 = vmax.f32 %v4516_v32, %v1790_v0 }
 0x1aa   :  { %v1826_v2 = vmax.f32 %v1118_v11, %v1476_v21  ;;  %v1946_v61 = vmax.f32 %v4568_v5, %v1791_v45  ;;  %v1827_v23 = vmax.f32 %v1119_v10, %v1478_v43  ;;  %v1155_v44 = vmax.f32 %v938_v60, 0.0 }
 0x1ab   :  { %2158 = vst.msk [vmem:[%s4775_s3 + $0x330] sm:$0xff] %vm166_vm0, %v2016_v4  ;;  %v1191_v19 = vmax.f32 %v1046_v54, 0.0  ;;  %v1948_v56 = vmax.f32 %v1790_v0, %v2932_v50  ;;  %v1949_v31 = vmax.f32 %v1791_v45, %v3049_v58 }
 0x1ac   :  { %2161 = vst.msk [vmem:[%s4775_s3 + $0x348] sm:$0xff] %vm166_vm0, %v2019_v16  ;;  %v1547_v41 = vrot.slane %v1155_v44, 1  ;;  %v1981_v5 = vmax.f32 %v4518_v6, %v1826_v2  ;;  %v1982_v50 = vmax.f32 %v4570_v46, %v1827_v23  ;;  %v1984_v6 = vmax.f32 %v1826_v2, %v3025_v37 }
 0x1ad   :  { %2194 = vst.msk [vmem:[%s4775_s3 + $0x450] sm:$0xff] %vm166_vm0, %v2052_v53  ;;  %v1904_v32 = vrot.slane %v1191_v19, 1  ;;  %v1985_v46 = vmax.f32 %v1827_v23, %v3142_v12 }
 0x1ae   :  { %2087 = vst.msk [vmem:[%s4775_s3 + $0xf8] sm:$0xff] %vm166_vm0, %v1945_v29  ;;  %v1548_v9 = vsel %vm1333_vm1, %v1545_v55, %v1547_v41  ;;  %v1550_v58 = vsel %vm1333_vm1, %v1547_v41, %v2776_v62  ;;  %v1896_v62 = vmax.f32 %v4532_v24, %v4543_v13 }
 0x1af   :  { %2088 = vst.msk [vmem:[%s4775_s3 + $0x100] sm:$0xff] %vm166_vm0, %v1946_v61  ;;  %v1905_v11 = vsel %vm1333_vm1, %v1902_v36, %v1904_v32  ;;  %v1862_v38 = vmax.f32 %v1154_v35, %v1548_v9  ;;  %v1863_v52 = vmax.f32 %v1155_v44, %v1550_v58  ;;  %v1913_v7 = vmax.f32 %v1191_v19, %v1904_v32 }
 0x1b0   :  { %2090 = vst.msk [vmem:[%s4775_s3 + $0x110] sm:$0xff] %vm166_vm0, %v1948_v56  ;;  %v1912_v14 = vmax.f32 %v1190_v17, %v1905_v11 }
 0x1b1   :  { %2091 = vst.msk [vmem:[%s4775_s3 + $0x118] sm:$0xff] %vm166_vm0, %v1949_v31  ;;  %v2017_v37 = vmax.f32 %v4556_v15, %v1862_v38  ;;  %v2018_v40 = vmax.f32 %v4614_v34, %v1863_v52  ;;  %v2020_v12 = vmax.f32 %v1862_v38, %v3029_v18  ;;  %v2054_v24 = vmax.f32 %v1896_v62, %v1913_v7 }
 0x1b2   :  { %2123 = vst.msk [vmem:[%s4775_s3 + $0x218] sm:$0xff] %vm166_vm0, %v1981_v5  ;;  %v2021_v13 = vmax.f32 %v1863_v52, %v3146_v51  ;;  %v2053_v15 = vmax.f32 %v4558_v49, %v1912_v14 }
 0x1b3   :  { %2124 = vst.msk [vmem:[%s4775_s3 + $0x220] sm:$0xff] %vm166_vm0, %v1982_v50  ;;  %v2055_v18 = vsel %vm1333_vm1, %v2054_v24, 0.0 }
 0x1b4   :  { %2126 = vst.msk [vmem:[%s4775_s3 + $0x230] sm:$0xff] %vm166_vm0, %v1984_v6 }
 0x1b5   :  { %2127 = vst.msk [vmem:[%s4775_s3 + $0x238] sm:$0xff] %vm166_vm0, %v1985_v46 }
 0x1b6   :  { %2159 = vst.msk [vmem:[%s4775_s3 + $0x338] sm:$0xff] %vm166_vm0, %v2017_v37 }
 0x1b7   :  { %2160 = vst.msk [vmem:[%s4775_s3 + $0x340] sm:$0xff] %vm166_vm0, %v2018_v40 }
 0x1b8   :  { %2162 = vst.msk [vmem:[%s4775_s3 + $0x350] sm:$0xff] %vm166_vm0, %v2020_v12 }
 0x1b9   :  { %2163 = vst.msk [vmem:[%s4775_s3 + $0x358] sm:$0xff] %vm166_vm0, %v2021_v13 }
 0x1ba   :  { %2195 = vst.msk [vmem:[%s4775_s3 + $0x458] sm:$0xff] %vm166_vm0, %v2053_v15 }
 0x1bb   :  { %2196 = vst.msk [vmem:[%s4775_s3 + $0x460] sm:$0xff] %vm166_vm0, %v2055_v18 }

// kernel: net_forward.3
= control target key start
LH: loop header
LB: loop body
LE: loop exit
PB: predicated region body
PF: predicated region fallthrough
CT: control target
= control target key end

     0   :  { %s2690_s0 = inlined_call_operand.vmem [shape: f32[128,800], index: 0, kind: input, shape index: {}]   ;;  %s2691_s1 = inlined_call_operand.vmem [shape: f32[800,48], index: 1, kind: input, shape index: {}]   ;;  %s2692_s2 = inlined_call_operand.vmem [shape: f32[1,48], index: 2, kind: input, shape index: {}]   ;;  %s2693_s3 = inlined_call_operand.vmem [shape: f32[768,128], index: 3, kind: input, shape index: {}]   ;;  %s2694_s4 = inlined_call_operand.vmem [shape: f32[1,128], index: 4, kind: input, shape index: {}]   ;;  %s2695_s5 = inlined_call_operand.vmem [shape: f32[128,128], index: 5, kind: input, shape index: {}]   ;;  %s2696_s6 = inlined_call_operand.vmem [shape: f32[1,128], index: 6, kind: input, shape index: {}]   ;;  %s2697_s7 = inlined_call_operand.hbm [shape: f32[2,10], index: 7, kind: output, shape index: {}]  }
   0x1   :  { %v154_v0 = vld [vmem:[%s2691_s1 + $0x78] sm:$0xff]  ;;  %v153_v2 = vld [vmem:[%s2691_s1 + $0x70] sm:$0xff]  ;;  %v152_v6 = vld [vmem:[%s2691_s1 + $0x68] sm:$0xff] }
   0x2   :  { %v186_v1 = vld [vmem:[%s2691_s1 + $0x178] sm:$0xff]  ;;  %292 = vmatpush.msra.mxu0 %v154_v0  ;;  %v185_v4 = vld [vmem:[%s2691_s1 + $0x170] sm:$0xff]  ;;  %v184_v8 = vld [vmem:[%s2691_s1 + $0x168] sm:$0xff] }
   0x3   :  { %422 = vmatpush.msra.mxu2 %v186_v1  ;;  %v170_v3 = vld [vmem:[%s2691_s1 + $0xf8] sm:$0xff]  ;;  %v169_v7 = vld [vmem:[%s2691_s1 + $0xf0] sm:$0xff]  ;;  %v168_v10 = vld [vmem:[%s2691_s1 + $0xe8] sm:$0xff] }
   0x4   :  { %v202_v5 = vld [vmem:[%s2691_s1 + $0x1f8] sm:$0xff]  ;;  %357 = vmatpush.msra.mxu1 %v170_v3  ;;  %293 = vmatpush.msra.mxu0 %v153_v2  ;;  %v201_v9 = vld [vmem:[%s2691_s1 + $0x1f0] sm:$0xff]  ;;  %v151_v11 = vld [vmem:[%s2691_s1 + $0x60] sm:$0xff] }
   0x5   :  { %487 = vmatpush.msra.mxu3 %v202_v5  ;;  %423 = vmatpush.msra.mxu2 %v185_v4  ;;  %v183_v12 = vld [vmem:[%s2691_s1 + $0x160] sm:$0xff]  ;;  %v200_v13 = vld [vmem:[%s2691_s1 + $0x1e8] sm:$0xff]  ;;  %v150_v16 = vld [vmem:[%s2691_s1 + $0x58] sm:$0xff] }
   0x6   :  { %358 = vmatpush.msra.mxu1 %v169_v7  ;;  %294 = vmatpush.msra.mxu0 %v152_v6  ;;  %v167_v14 = vld [vmem:[%s2691_s1 + $0xe0] sm:$0xff]  ;;  %v182_v17 = vld [vmem:[%s2691_s1 + $0x158] sm:$0xff]  ;;  %v149_v20 = vld [vmem:[%s2691_s1 + $0x50] sm:$0xff] }
   0x7   :  { %488 = vmatpush.msra.mxu3 %v201_v9  ;;  %424 = vmatpush.msra.mxu2 %v184_v8  ;;  %v199_v15 = vld [vmem:[%s2691_s1 + $0x1e0] sm:$0xff]  ;;  %v166_v18 = vld [vmem:[%s2691_s1 + $0xd8] sm:$0xff]  ;;  %v181_v21 = vld [vmem:[%s2691_s1 + $0x150] sm:$0xff] }
   0x8   :  { %359 = vmatpush.msra.mxu1 %v168_v10  ;;  %295 = vmatpush.msra.mxu0 %v151_v11  ;;  %v198_v19 = vld [vmem:[%s2691_s1 + $0x1d8] sm:$0xff]  ;;  %v165_v22 = vld [vmem:[%s2691_s1 + $0xd0] sm:$0xff]  ;;  %v148_v24 = vld [vmem:[%s2691_s1 + $0x48] sm:$0xff] }
   0x9   :  { %489 = vmatpush.msra.mxu3 %v200_v13  ;;  %425 = vmatpush.msra.mxu2 %v183_v12  ;;  %v197_v23 = vld [vmem:[%s2691_s1 + $0x1d0] sm:$0xff]  ;;  %v180_v25 = vld [vmem:[%s2691_s1 + $0x148] sm:$0xff]  ;;  %v147_v28 = vld [vmem:[%s2691_s1 + $0x40] sm:$0xff] }
   0xa   :  { %360 = vmatpush.msra.mxu1 %v167_v14  ;;  %296 = vmatpush.msra.mxu0 %v150_v16  ;;  %v164_v26 = vld [vmem:[%s2691_s1 + $0xc8] sm:$0xff]  ;;  %v179_v29 = vld [vmem:[%s2691_s1 + $0x140] sm:$0xff]  ;;  %v146_v32 = vld [vmem:[%s2691_s1 + $0x38] sm:$0xff] }
   0xb   :  { %490 = vmatpush.msra.mxu3 %v199_v15  ;;  %426 = vmatpush.msra.mxu2 %v182_v17  ;;  %v196_v27 = vld [vmem:[%s2691_s1 + $0x1c8] sm:$0xff]  ;;  %v163_v30 = vld [vmem:[%s2691_s1 + $0xc0] sm:$0xff]  ;;  %v178_v33 = vld [vmem:[%s2691_s1 + $0x138] sm:$0xff] }
   0xc   :  { %361 = vmatpush.msra.mxu1 %v166_v18  ;;  %297 = vmatpush.msra.mxu0 %v149_v20  ;;  %v195_v31 = vld [vmem:[%s2691_s1 + $0x1c0] sm:$0xff]  ;;  %v162_v34 = vld [vmem:[%s2691_s1 + $0xb8] sm:$0xff]  ;;  %v145_v36 = vld [vmem:[%s2691_s1 + $0x30] sm:$0xff] }
   0xd   :  { %491 = vmatpush.msra.mxu3 %v198_v19  ;;  %427 = vmatpush.msra.mxu2 %v181_v21  ;;  %v194_v35 = vld [vmem:[%s2691_s1 + $0x1b8] sm:$0xff]  ;;  %v177_v37 = vld [vmem:[%s2691_s1 + $0x130] sm:$0xff]  ;;  %v144_v40 = vld [vmem:[%s2691_s1 + $0x28] sm:$0xff] }
   0xe   :  { %362 = vmatpush.msra.mxu1 %v165_v22  ;;  %298 = vmatpush.msra.mxu0 %v148_v24  ;;  %v161_v38 = vld [vmem:[%s2691_s1 + $0xb0] sm:$0xff]  ;;  %v176_v41 = vld [vmem:[%s2691_s1 + $0x128] sm:$0xff]  ;;  %v143_v44 = vld [vmem:[%s2691_s1 + $0x20] sm:$0xff] }
   0xf   :  { %492 = vmatpush.msra.mxu3 %v197_v23  ;;  %428 = vmatpush.msra.mxu2 %v180_v25  ;;  %v193_v39 = vld [vmem:[%s2691_s1 + $0x1b0] sm:$0xff]  ;;  %v160_v42 = vld [vmem:[%s2691_s1 + $0xa8] sm:$0xff]  ;;  %v175_v45 = vld [vmem:[%s2691_s1 + $0x120] sm:$0xff] }
  0x10   :  { %363 = vmatpush.msra.mxu1 %v164_v26  ;;  %299 = vmatpush.msra.mxu0 %v147_v28  ;;  %v192_v43 = vld [vmem:[%s2691_s1 + $0x1a8] sm:$0xff]  ;;  %v159_v46 = vld [vmem:[%s2691_s1 + $0xa0] sm:$0xff]  ;;  %v142_v48 = vld [vmem:[%s2691_s1 + $0x18] sm:$0xff] }
  0x11   :  { %493 = vmatpush.msra.mxu3 %v196_v27  ;;  %429 = vmatpush.msra.mxu2 %v179_v29  ;;  %v191_v47 = vld [vmem:[%s2691_s1 + $0x1a0] sm:$0xff]  ;;  %v174_v49 = vld [vmem:[%s2691_s1 + $0x118] sm:$0xff]  ;;  %v141_v52 = vld [vmem:[%s2691_s1 + $0x10] sm:$0xff] }
  0x12   :  { %364 = vmatpush.msra.mxu1 %v163_v30  ;;  %300 = vmatpush.msra.mxu0 %v146_v32  ;;  %v158_v50 = vld [vmem:[%s2691_s1 + $0x98] sm:$0xff]  ;;  %v173_v53 = vld [vmem:[%s2691_s1 + $0x110] sm:$0xff]  ;;  %v140_v56 = vld [vmem:[%s2691_s1 + $0x8] sm:$0xff] }
  0x13   :  { %494 = vmatpush.msra.mxu3 %v195_v31  ;;  %430 = vmatpush.msra.mxu2 %v178_v33  ;;  %v190_v51 = vld [vmem:[%s2691_s1 + $0x198] sm:$0xff]  ;;  %v157_v54 = vld [vmem:[%s2691_s1 + $0x90] sm:$0xff]  ;;  %v172_v57 = vld [vmem:[%s2691_s1 + $0x108] sm:$0xff] }
  0x14   :  { %365 = vmatpush.msra.mxu1 %v162_v34  ;;  %301 = vmatpush.msra.mxu0 %v145_v36  ;;  %v189_v55 = vld [vmem:[%s2691_s1 + $0x190] sm:$0xff]  ;;  %v139_v58 = vld [vmem:[%s2691_s1] sm:$0xff]  ;;  %v156_v59 = vld [vmem:[%s2691_s1 + $0x88] sm:$0xff] }
  0x15   :  { %495 = vmatpush.msra.mxu3 %v194_v35  ;;  %431 = vmatpush.msra.mxu2 %v177_v37  ;;  %v171_v60 = vld [vmem:[%s2691_s1 + $0x100] sm:$0xff]  ;;  %v188_v61 = vld [vmem:[%s2691_s1 + $0x188] sm:$0xff]  ;;  %v29_v63 = vld [vmem:[%s2690_s0 + $0x10] sm:$0xff] }
  0x16   :  { %366 = vmatpush.msra.mxu1 %v161_v38  ;;  %302 = vmatpush.msra.mxu0 %v144_v40  ;;  %v27_v62 = vld [vmem:[%s2690_s0] sm:$0xff] }
  0x17   :  { %496 = vmatpush.msra.mxu3 %v193_v39  ;;  %432 = vmatpush.msra.mxu2 %v176_v41 }
  0x18   :  { %367 = vmatpush.msra.mxu1 %v160_v42  ;;  %303 = vmatpush.msra.mxu0 %v143_v44 }
  0x19   :  { %497 = vmatpush.msra.mxu3 %v192_v43  ;;  %433 = vmatpush.msra.mxu2 %v175_v45 }
  0x1a   :  { %368 = vmatpush.msra.mxu1 %v159_v46  ;;  %304 = vmatpush.msra.mxu0 %v142_v48 }
  0x1b   :  { %498 = vmatpush.msra.mxu3 %v191_v47  ;;  %434 = vmatpush.msra.mxu2 %v174_v49 }
  0x1c   :  { %369 = vmatpush.msra.mxu1 %v158_v50  ;;  %305 = vmatpush.msra.mxu0 %v141_v52 }
  0x1d   :  { %499 = vmatpush.msra.mxu3 %v190_v51  ;;  %435 = vmatpush.msra.mxu2 %v173_v53 }
  0x1e   :  { %370 = vmatpush.msra.mxu1 %v157_v54  ;;  %306 = vmatpush.msra.mxu0 %v140_v56 }
  0x1f   :  { %500 = vmatpush.msra.mxu3 %v189_v55  ;;  %436 = vmatpush.msra.mxu2 %v172_v57 }
  0x20   :  { %12 = vsyncpa [#allocation3], 0  ;;  %371 = vmatpush.msra.mxu1 %v156_v59  ;;  %v155_v0 = vld [vmem:[%s2691_s1 + $0x80] sm:$0xff]  ;;  %307 = vmatpush.msra.mxu0 %v139_v58  ;;  %v28_v2 = vld [vmem:[%s2690_s0 + $0x8] sm:$0xff]  ;;  %vm243_vm0 = vcmask 261120   ;;  %vm778_vm1 = vcmask 1046528  }
  0x21   :  { %501 = vmatpush.msra.mxu3 %v188_v61  ;;  %v187_v1 = vld [vmem:[%s2691_s1 + $0x180] sm:$0xff]  ;;  %437 = vmatpush.msra.mxu2 %v171_v60  ;;  %v30_v3 = vld [vmem:[%s2690_s0 + $0x18] sm:$0xff]  ;;  %v217_v7 = vld [vmem:[%s2691_s1 + $0x270] sm:$0xff]  ;;  %s1444_s27 = smov 48   ;;  %s1445_s11 = smov 96   ;;  %vm908_vm2 = vcmask 392192  }
  0x22   :  { %308 = vmatmul.f32.vlgmr.msra.gmra.mxu0 %v27_v62  ;;  %438 = vmatmul.f32.vlgmr.msra.gmra.mxu2 %v29_v63  ;;  %v238_v4 = vld [vmem:[%s2691_s1 + $0x318] sm:$0xff]  ;;  %v233_v8 = vld [vmem:[%s2691_s1 + $0x2f0] sm:$0xff]  ;;  %v36_v10 = vld [vmem:[%s2690_s0 + $0x48] sm:$0xff]  ;;  %s1448_s14 = smov 80   ;;  %s1449_s21 = smov 32   ;;  %vm910_vm3 = vcmask 785408  }
  0x23   :  { %v218_v5 = vld [vmem:[%s2691_s1 + $0x278] sm:$0xff]  ;;  %372 = vmatpush.msra.mxu1 %v155_v0  ;;  %502 = vmatpush.msra.mxu3 %v187_v1  ;;  %v35_v11 = vld [vmem:[%s2690_s0 + $0x40] sm:$0xff]  ;;  %v37_v12 = vld [vmem:[%s2690_s0 + $0x50] sm:$0xff]  ;;  %vm1018_vm4 = vcmask 1040384   ;;  %vm912_vm5 = vcmask 130048   ;;  %vm914_vm6 = vcmask 523264  }
  0x24   :  { %v234_v6 = vld [vmem:[%s2691_s1 + $0x2f8] sm:$0xff]  ;;  %373 = vmatmul.f32.vlgmr.msra.gmra.mxu1 %v28_v2  ;;  %503 = vmatmul.f32.vlgmr.msra.gmra.mxu3 %v30_v3  ;;  %v216_v13 = vld [vmem:[%s2691_s1 + $0x268] sm:$0xff]  ;;  %v41_v15 = vld [vmem:[%s2690_s0 + $0x70] sm:$0xff]  ;;  %vm916_vm7 = vcmask 916480   ;;  %vm919_vm8 = vcmask 654336   ;;  %vm1286_vm9 = vcmask 74752  }
  0x25   :  { %694 = vmatpush.msrb.mxu2 %v238_v4  ;;  %552 = vmatpush.msrb.mxu0 %v218_v5  ;;  %v34_v9 = vld [vmem:[%s2690_s0 + $0x38] sm:$0xff]  ;;  %v232_v14 = vld [vmem:[%s2691_s1 + $0x2e8] sm:$0xff]  ;;  %v43_v16 = vld [vmem:[%s2690_s0 + $0x80] sm:$0xff]  ;;  %s1307_s13 = sshll.u32 %s2697_s7, 4  ;;  %s1308_s13 = int_to_ptr.hbm [resolvable:$true] %s1307_s13 }
  0x26   :  { %617 = vmatpush.msrb.mxu1 %v234_v6  ;;  %v42_v17 = vld [vmem:[%s2690_s0 + $0x78] sm:$0xff]  ;;  %v44_v18 = vld [vmem:[%s2690_s0 + $0x88] sm:$0xff]  ;;  %v215_v19 = vld [vmem:[%s2691_s1 + $0x260] sm:$0xff] }
  0x27   :  { %553 = vmatpush.msrb.mxu0 %v217_v7  ;;  %v231_v20 = vld [vmem:[%s2691_s1 + $0x2e0] sm:$0xff]  ;;  %v237_v21 = vld [vmem:[%s2691_s1 + $0x310] sm:$0xff]  ;;  %v48_v22 = vld [vmem:[%s2690_s0 + $0xa8] sm:$0xff] }
  0x28   :  { %618 = vmatpush.msrb.mxu1 %v233_v8  ;;  %695 = vmatpush.msrb.mxu2 %v237_v21  ;;  %v50_v23 = vld [vmem:[%s2690_s0 + $0xb8] sm:$0xff]  ;;  %v49_v24 = vld [vmem:[%s2690_s0 + $0xb0] sm:$0xff]  ;;  %v51_v25 = vld [vmem:[%s2690_s0 + $0xc0] sm:$0xff] }
  0x29   :  { %554 = vmatpush.msrb.mxu0 %v216_v13  ;;  %v214_v26 = vld [vmem:[%s2691_s1 + $0x258] sm:$0xff]  ;;  %v55_v28 = vld [vmem:[%s2690_s0 + $0xe0] sm:$0xff]  ;;  %v57_v29 = vld [vmem:[%s2690_s0 + $0xf0] sm:$0xff] }
  0x2a   :  { %311 = vmatmul.f32.gmra.mxu0 %v34_v9  ;;  %441 = vmatmul.f32.gmra.mxu2 %v36_v10  ;;  %v230_v27 = vld [vmem:[%s2691_s1 + $0x2d8] sm:$0xff]  ;;  %v56_v30 = vld [vmem:[%s2690_s0 + $0xe8] sm:$0xff]  ;;  %v213_v32 = vld [vmem:[%s2691_s1 + $0x250] sm:$0xff] }
  0x2b   :  { %619 = vmatpush.msrb.mxu1 %v232_v14  ;;  %555 = vmatpush.msrb.mxu0 %v215_v19  ;;  %v58_v31 = vld [vmem:[%s2690_s0 + $0xf8] sm:$0xff]  ;;  %v229_v33 = vld [vmem:[%s2691_s1 + $0x2d0] sm:$0xff]  ;;  %v64_v35 = vld [vmem:[%s2690_s0 + $0x128] sm:$0xff] }
  0x2c   :  { %376 = vmatmul.f32.gmra.mxu1 %v35_v11  ;;  %506 = vmatmul.f32.gmra.mxu3 %v37_v12  ;;  %v62_v34 = vld [vmem:[%s2690_s0 + $0x118] sm:$0xff]  ;;  %v63_v36 = vld [vmem:[%s2690_s0 + $0x120] sm:$0xff]  ;;  %v65_v37 = vld [vmem:[%s2690_s0 + $0x130] sm:$0xff] }
  0x2d   :  { %620 = vmatpush.msrb.mxu1 %v231_v20  ;;  %556 = vmatpush.msrb.mxu0 %v214_v26  ;;  %v212_v38 = vld [vmem:[%s2691_s1 + $0x248] sm:$0xff]  ;;  %v69_v40 = vld [vmem:[%s2690_s0 + $0x150] sm:$0xff]  ;;  %v71_v41 = vld [vmem:[%s2690_s0 + $0x160] sm:$0xff] }
  0x2e   :  { %v228_v39 = vld [vmem:[%s2691_s1 + $0x2c8] sm:$0xff]  ;;  %v70_v42 = vld [vmem:[%s2690_s0 + $0x158] sm:$0xff]  ;;  %v211_v44 = vld [vmem:[%s2691_s1 + $0x240] sm:$0xff] }
  0x2f   :  { %621 = vmatpush.msrb.mxu1 %v230_v27  ;;  %557 = vmatpush.msrb.mxu0 %v213_v32  ;;  %v72_v43 = vld [vmem:[%s2690_s0 + $0x168] sm:$0xff]  ;;  %v227_v45 = vld [vmem:[%s2691_s1 + $0x2c0] sm:$0xff]  ;;  %v78_v48 = vld [vmem:[%s2690_s0 + $0x198] sm:$0xff] }
  0x30   :  { %v236_v46 = vld [vmem:[%s2691_s1 + $0x308] sm:$0xff]  ;;  %v77_v49 = vld [vmem:[%s2690_s0 + $0x190] sm:$0xff]  ;;  %v79_v50 = vld [vmem:[%s2690_s0 + $0x1a0] sm:$0xff] }
  0x31   :  { %622 = vmatpush.msrb.mxu1 %v229_v33  ;;  %558 = vmatpush.msrb.mxu0 %v212_v38  ;;  %v76_v47 = vld [vmem:[%s2690_s0 + $0x188] sm:$0xff]  ;;  %v210_v51 = vld [vmem:[%s2691_s1 + $0x238] sm:$0xff]  ;;  %v83_v53 = vld [vmem:[%s2690_s0 + $0x1c0] sm:$0xff] }
  0x32   :  { %314 = vmatmul.f32.gmra.mxu0 %v41_v15  ;;  %444 = vmatmul.f32.gmra.mxu2 %v43_v16  ;;  %v226_v52 = vld [vmem:[%s2691_s1 + $0x2b8] sm:$0xff]  ;;  %v85_v54 = vld [vmem:[%s2690_s0 + $0x1d0] sm:$0xff]  ;;  %v84_v55 = vld [vmem:[%s2690_s0 + $0x1c8] sm:$0xff] }
  0x33   :  { %623 = vmatpush.msrb.mxu1 %v228_v39  ;;  %559 = vmatpush.msrb.mxu0 %v211_v44  ;;  %v86_v56 = vld [vmem:[%s2690_s0 + $0x1d8] sm:$0xff]  ;;  %v209_v57 = vld [vmem:[%s2691_s1 + $0x230] sm:$0xff]  ;;  %v92_v60 = vld [vmem:[%s2690_s0 + $0x208] sm:$0xff] }
  0x34   :  { %379 = vmatmul.f32.gmra.mxu1 %v42_v17  ;;  %509 = vmatmul.f32.gmra.mxu3 %v44_v18  ;;  %v225_v58 = vld [vmem:[%s2691_s1 + $0x2b0] sm:$0xff]  ;;  %v90_v59 = vld [vmem:[%s2690_s0 + $0x1f8] sm:$0xff]  ;;  %v91_v61 = vld [vmem:[%s2690_s0 + $0x200] sm:$0xff] }
  0x35   :  { %624 = vmatpush.msrb.mxu1 %v227_v45  ;;  %696 = vmatpush.msrb.mxu2 %v236_v46  ;;  %v93_v62 = vld [vmem:[%s2690_s0 + $0x210] sm:$0xff]  ;;  %v208_v63 = vld [vmem:[%s2691_s1 + $0x228] sm:$0xff]  ;;  %v99_v2 = vld [vmem:[%s2690_s0 + $0x240] sm:$0xff] }
  0x36   :  { %560 = vmatpush.msrb.mxu0 %v210_v51  ;;  %v224_v0 = vld [vmem:[%s2691_s1 + $0x2a8] sm:$0xff]  ;;  %v97_v1 = vld [vmem:[%s2690_s0 + $0x230] sm:$0xff]  ;;  %v98_v3 = vld [vmem:[%s2690_s0 + $0x238] sm:$0xff] }
  0x37   :  { %625 = vmatpush.msrb.mxu1 %v226_v52  ;;  %v100_v4 = vld [vmem:[%s2690_s0 + $0x248] sm:$0xff]  ;;  %v207_v5 = vld [vmem:[%s2691_s1 + $0x220] sm:$0xff]  ;;  %v106_v9 = vld [vmem:[%s2690_s0 + $0x278] sm:$0xff] }
  0x38   :  { %561 = vmatpush.msrb.mxu0 %v209_v57  ;;  %v223_v6 = vld [vmem:[%s2691_s1 + $0x2a0] sm:$0xff]  ;;  %v104_v8 = vld [vmem:[%s2690_s0 + $0x268] sm:$0xff]  ;;  %v105_v10 = vld [vmem:[%s2690_s0 + $0x270] sm:$0xff] }
  0x39   :  { %626 = vmatpush.msrb.mxu1 %v225_v58  ;;  %v235_v7 = vld [vmem:[%s2691_s1 + $0x300] sm:$0xff]  ;;  %v206_v12 = vld [vmem:[%s2691_s1 + $0x218] sm:$0xff]  ;;  %v205_v13 = vld [vmem:[%s2691_s1 + $0x210] sm:$0xff] }
  0x3a   :  { %317 = vmatmul.f32.gmra.mxu0 %v48_v22  ;;  %447 = vmatmul.f32.gmra.mxu2 %v50_v23  ;;  %v107_v11 = vld [vmem:[%s2690_s0 + $0x280] sm:$0xff]  ;;  %v222_v14 = vld [vmem:[%s2691_s1 + $0x298] sm:$0xff]  ;;  %v204_v15 = vld [vmem:[%s2691_s1 + $0x208] sm:$0xff] }
  0x3b   :  { %562 = vmatpush.msrb.mxu0 %v208_v63  ;;  %627 = vmatpush.msrb.mxu1 %v224_v0  ;;  %v221_v16 = vld [vmem:[%s2691_s1 + $0x290] sm:$0xff]  ;;  %v111_v17 = vld [vmem:[%s2690_s0 + $0x2a0] sm:$0xff]  ;;  %v220_v20 = vld [vmem:[%s2691_s1 + $0x288] sm:$0xff] }
  0x3c   :  { %382 = vmatmul.f32.gmra.mxu1 %v49_v24  ;;  %512 = vmatmul.f32.gmra.mxu3 %v51_v25  ;;  %v113_v18 = vld [vmem:[%s2690_s0 + $0x2b0] sm:$0xff]  ;;  %v203_v19 = vld [vmem:[%s2691_s1 + $0x200] sm:$0xff]  ;;  %v112_v21 = vld [vmem:[%s2690_s0 + $0x2a8] sm:$0xff] }
  0x3d   :  { %563 = vmatpush.msrb.mxu0 %v207_v5  ;;  %628 = vmatpush.msrb.mxu1 %v223_v6  ;;  %v114_v22 = vld [vmem:[%s2690_s0 + $0x2b8] sm:$0xff]  ;;  %v219_v23 = vld [vmem:[%s2691_s1 + $0x280] sm:$0xff]  ;;  %v120_v25 = vld [vmem:[%s2690_s0 + $0x2e8] sm:$0xff]  ;;  %s1447_s1 = smov 112  }
  0x3e   :  { %697 = vmatpush.msrb.mxu2 %v235_v7  ;;  %v118_v24 = vld [vmem:[%s2690_s0 + $0x2d8] sm:$0xff]  ;;  %v119_v26 = vld [vmem:[%s2690_s0 + $0x2e0] sm:$0xff]  ;;  %v121_v27 = vld [vmem:[%s2690_s0 + $0x2f0] sm:$0xff] }
  0x3f   :  { %564 = vmatpush.msrb.mxu0 %v206_v12  ;;  %629 = vmatpush.msrb.mxu1 %v222_v14  ;;  %v132_v32 = vld [vmem:[%s2690_s0 + $0x348] sm:$0xff]  ;;  %v134_v33 = vld [vmem:[%s2690_s0 + $0x358] sm:$0xff]  ;;  %v31_v38 = vld [vmem:[%s2690_s0 + $0x20] sm:$0xff] }
  0x40   :  { %v33_v39 = vld [vmem:[%s2690_s0 + $0x30] sm:$0xff]  ;;  %v46_v0 = vld [vmem:[%s2690_s0 + $0x98] sm:$0xff]  ;;  %v52_v6 = vld [vmem:[%s2690_s0 + $0xc8] sm:$0xff] }
  0x41   :  { %565 = vmatpush.msrb.mxu0 %v205_v13  ;;  %630 = vmatpush.msrb.mxu1 %v221_v16  ;;  %v54_v7 = vld [vmem:[%s2690_s0 + $0xd8] sm:$0xff] }
  0x42   :  { %320 = vmatmul.f32.gmra.mxu0 %v55_v28  ;;  %450 = vmatmul.f32.gmra.mxu2 %v57_v29  ;;  %v125_v28 = vld [vmem:[%s2690_s0 + $0x310] sm:$0xff]  ;;  %v127_v29 = vld [vmem:[%s2690_s0 + $0x320] sm:$0xff] }
  0x43   :  { %566 = vmatpush.msrb.mxu0 %v204_v15  ;;  %631 = vmatpush.msrb.mxu1 %v220_v20 }
  0x44   :  { %385 = vmatmul.f32.gmra.mxu1 %v56_v30  ;;  %515 = vmatmul.f32.gmra.mxu3 %v58_v31  ;;  %v126_v30 = vld [vmem:[%s2690_s0 + $0x318] sm:$0xff]  ;;  %v128_v31 = vld [vmem:[%s2690_s0 + $0x328] sm:$0xff] }
  0x45   :  { %567 = vmatpush.msrb.mxu0 %v203_v19  ;;  %632 = vmatpush.msrb.mxu1 %v219_v23 }
  0x4a   :  { %323 = vmatmul.f32.gmra.mxu0 %v62_v34  ;;  %453 = vmatmul.f32.gmra.mxu2 %v64_v35  ;;  %v133_v34 = vld [vmem:[%s2690_s0 + $0x350] sm:$0xff]  ;;  %v135_v35 = vld [vmem:[%s2690_s0 + $0x360] sm:$0xff] }
  0x4c   :  { %388 = vmatmul.f32.gmra.mxu1 %v63_v36  ;;  %518 = vmatmul.f32.gmra.mxu3 %v65_v37  ;;  %v1986_v36 = vld [vmem:[%s2692_s2] ss:$0 sm:$0xff]  ;;  %s1446_s2 = smov 64  }
  0x52   :  { %326 = vmatmul.f32.gmra.mxu0 %v69_v40  ;;  %456 = vmatmul.f32.gmra.mxu2 %v71_v41 }
  0x54   :  { %391 = vmatmul.f32.gmra.mxu1 %v70_v42  ;;  %521 = vmatmul.f32.gmra.mxu3 %v72_v43  ;;  %v32_v42 = vld [vmem:[%s2690_s0 + $0x28] sm:$0xff] }
  0x5a   :  { %329 = vmatmul.f32.gmra.mxu0 %v76_v47  ;;  %459 = vmatmul.f32.gmra.mxu2 %v78_v48  ;;  %v38_v48 = vld [vmem:[%s2690_s0 + $0x58] sm:$0xff] }
  0x5c   :  { %394 = vmatmul.f32.gmra.mxu1 %v77_v49  ;;  %524 = vmatmul.f32.gmra.mxu3 %v79_v50  ;;  %v40_v49 = vld [vmem:[%s2690_s0 + $0x68] sm:$0xff] }
  0x62   :  { %332 = vmatmul.f32.gmra.mxu0 %v83_v53  ;;  %462 = vmatmul.f32.gmra.mxu2 %v85_v54  ;;  %v39_v53 = vld [vmem:[%s2690_s0 + $0x60] sm:$0xff] }
  0x64   :  { %397 = vmatmul.f32.gmra.mxu1 %v84_v55  ;;  %527 = vmatmul.f32.gmra.mxu3 %v86_v56 }
  0x6a   :  { %335 = vmatmul.f32.gmra.mxu0 %v90_v59  ;;  %465 = vmatmul.f32.gmra.mxu2 %v92_v60  ;;  %v45_v59 = vld [vmem:[%s2690_s0 + $0x90] sm:$0xff]  ;;  %v47_v60 = vld [vmem:[%s2690_s0 + $0xa0] sm:$0xff] }
  0x6c   :  { %400 = vmatmul.f32.gmra.mxu1 %v91_v61  ;;  %530 = vmatmul.f32.gmra.mxu3 %v93_v62 }
  0x72   :  { %338 = vmatmul.f32.gmra.mxu0 %v97_v1  ;;  %468 = vmatmul.f32.gmra.mxu2 %v99_v2 }
  0x74   :  { %403 = vmatmul.f32.gmra.mxu1 %v98_v3  ;;  %533 = vmatmul.f32.gmra.mxu3 %v100_v4 }
  0x7a   :  { %341 = vmatmul.f32.gmra.mxu0 %v104_v8  ;;  %471 = vmatmul.f32.gmra.mxu2 %v106_v9 }
  0x7c   :  { %406 = vmatmul.f32.gmra.mxu1 %v105_v10  ;;  %536 = vmatmul.f32.gmra.mxu3 %v107_v11  ;;  %v53_v11 = vld [vmem:[%s2690_s0 + $0xd0] sm:$0xff] }
  0x82   :  { %344 = vmatmul.f32.gmra.mxu0 %v111_v17  ;;  %474 = vmatmul.f32.gmra.mxu2 %v113_v18  ;;  %v59_v17 = vld [vmem:[%s2690_s0 + $0x100] sm:$0xff]  ;;  %v61_v18 = vld [vmem:[%s2690_s0 + $0x110] sm:$0xff] }
  0x84   :  { %409 = vmatmul.f32.gmra.mxu1 %v112_v21  ;;  %539 = vmatmul.f32.gmra.mxu3 %v114_v22  ;;  %v60_v22 = vld [vmem:[%s2690_s0 + $0x108] sm:$0xff] }
  0x8a   :  { %347 = vmatmul.f32.gmra.mxu0 %v118_v24  ;;  %477 = vmatmul.f32.gmra.mxu2 %v120_v25 }
  0x8c   :  { %412 = vmatmul.f32.gmra.mxu1 %v119_v26  ;;  %542 = vmatmul.f32.gmra.mxu3 %v121_v27 }
  0x92   :  { %350 = vmatmul.f32.gmra.mxu0 %v125_v28  ;;  %480 = vmatmul.f32.gmra.mxu2 %v127_v29  ;;  %v66_v28 = vld [vmem:[%s2690_s0 + $0x138] sm:$0xff]  ;;  %v68_v29 = vld [vmem:[%s2690_s0 + $0x148] sm:$0xff] }
  0x94   :  { %415 = vmatmul.f32.gmra.mxu1 %v126_v30  ;;  %545 = vmatmul.f32.gmra.mxu3 %v128_v31 }
  0x9a   :  { %353 = vmatmul.f32.gmra.mxu0 %v132_v32  ;;  %483 = vmatmul.f32.gmra.mxu2 %v134_v33  ;;  %v67_v33 = vld [vmem:[%s2690_s0 + $0x140] sm:$0xff] }
  0x9c   :  { %418 = vmatmul.f32.gmra.mxu1 %v133_v34  ;;  %548 = vmatmul.f32.gmra.mxu3 %v135_v35 }
  0x9f   :  { %v309_v37 = vpop.f32.mrf.mxu0 }
  0xa0   :  { %v310_v40 = vadd.f32 %v1986_v36, %v309_v37 }
  0xa1   :  { %v374_v41 = vpop.f32.mrf.mxu1 }
  0xa2   :  { %v375_v43 = vadd.f32 %v374_v41, %v310_v40  ;;  %568 = vmatmul.f32.vlgmr.msrb.gmra.mxu0 %v31_v38  ;;  %1316 = vmatmul.msk.f32.vlgmr.msrb.gmra.mxu2 %vm243_vm0, %v33_v39  ;;  %v73_v40 = vld [vmem:[%s2690_s0 + $0x170] sm:$0xff]  ;;  %v75_v41 = vld [vmem:[%s2690_s0 + $0x180] sm:$0xff] }
  0xa4   :  { %633 = vmatmul.f32.vlgmr.msrb.gmra.mxu1 %v32_v42 }
  0xa5   :  { %v439_v44 = vpop.f32.mrf.mxu2 }
  0xa6   :  { %v440_v45 = vadd.f32 %v439_v44, %v375_v43 }
  0xa7   :  { %v312_v46 = vpop.f32.mrf.mxu0  ;;  %v504_v47 = vpop.f32.mrf.mxu3 }
  0xa8   :  { %v313_v50 = vadd.f32 %v1986_v36, %v312_v46  ;;  %v2006_v51 = vadd.f32 %v504_v47, %v440_v45  ;;  %v74_v45 = vld [vmem:[%s2690_s0 + $0x178] sm:$0xff] }
  0xa9   :  { %v377_v52 = vpop.f32.mrf.mxu1 }
  0xaa   :  { %v378_v54 = vadd.f32 %v377_v52, %v313_v50  ;;  %571 = vmatmul.f32.gmra.mxu0 %v38_v48  ;;  %1317 = vmatmul.msk.f32.gmra.mxu2 %vm243_vm0, %v40_v49  ;;  %v80_v52 = vld [vmem:[%s2690_s0 + $0x1a8] sm:$0xff] }
  0xac   :  { %636 = vmatmul.f32.gmra.mxu1 %v39_v53  ;;  %v82_v53 = vld [vmem:[%s2690_s0 + $0x1b8] sm:$0xff] }
  0xad   :  { %v442_v55 = vpop.f32.mrf.mxu2 }
  0xae   :  { %v443_v56 = vadd.f32 %v442_v55, %v378_v54 }
  0xaf   :  { %v315_v57 = vpop.f32.mrf.mxu0  ;;  %v507_v58 = vpop.f32.mrf.mxu3 }
  0xb0   :  { %v316_v61 = vadd.f32 %v1986_v36, %v315_v57  ;;  %v2019_v62 = vadd.f32 %v507_v58, %v443_v56  ;;  %v81_v57 = vld [vmem:[%s2690_s0 + $0x1b0] sm:$0xff] }
  0xb1   :  { %v380_v63 = vpop.f32.mrf.mxu1 }
  0xb2   :  { %v381_v1 = vadd.f32 %v380_v63, %v316_v61  ;;  %574 = vmatmul.f32.gmra.mxu0 %v45_v59  ;;  %1318 = vmatmul.msk.f32.gmra.mxu2 %vm243_vm0, %v47_v60 }
  0xb4   :  { %639 = vmatmul.f32.gmra.mxu1 %v46_v0  ;;  %v87_v0 = vld [vmem:[%s2690_s0 + $0x1e0] sm:$0xff] }
  0xb5   :  { %v445_v2 = vpop.f32.mrf.mxu2 }
  0xb6   :  { %v446_v3 = vadd.f32 %v445_v2, %v381_v1  ;;  %v89_v1 = vld [vmem:[%s2690_s0 + $0x1f0] sm:$0xff] }
  0xb7   :  { %v318_v4 = vpop.f32.mrf.mxu0  ;;  %v510_v5 = vpop.f32.mrf.mxu3 }
  0xb8   :  { %v319_v8 = vadd.f32 %v1986_v36, %v318_v4  ;;  %v2032_v9 = vadd.f32 %v510_v5, %v446_v3  ;;  %v88_v4 = vld [vmem:[%s2690_s0 + $0x1e8] sm:$0xff] }
  0xb9   :  { %v383_v10 = vpop.f32.mrf.mxu1 }
  0xba   :  { %v384_v12 = vadd.f32 %v383_v10, %v319_v8  ;;  %577 = vmatmul.f32.gmra.mxu0 %v52_v6  ;;  %1319 = vmatmul.msk.f32.gmra.mxu2 %vm243_vm0, %v54_v7  ;;  %v94_v7 = vld [vmem:[%s2690_s0 + $0x218] sm:$0xff]  ;;  %v96_v8 = vld [vmem:[%s2690_s0 + $0x228] sm:$0xff] }
  0xbc   :  { %642 = vmatmul.f32.gmra.mxu1 %v53_v11 }
  0xbd   :  { %v448_v13 = vpop.f32.mrf.mxu2 }
  0xbe   :  { %v449_v14 = vadd.f32 %v448_v13, %v384_v12  ;;  %v95_v12 = vld [vmem:[%s2690_s0 + $0x220] sm:$0xff] }
  0xbf   :  { %v321_v15 = vpop.f32.mrf.mxu0  ;;  %v513_v16 = vpop.f32.mrf.mxu3 }
  0xc0   :  { %v322_v19 = vadd.f32 %v1986_v36, %v321_v15  ;;  %v2045_v20 = vadd.f32 %v513_v16, %v449_v14 }
  0xc1   :  { %v386_v21 = vpop.f32.mrf.mxu1 }
  0xc2   :  { %v387_v23 = vadd.f32 %v386_v21, %v322_v19  ;;  %580 = vmatmul.f32.gmra.mxu0 %v59_v17  ;;  %1320 = vmatmul.msk.f32.gmra.mxu2 %vm243_vm0, %v61_v18  ;;  %v101_v17 = vld [vmem:[%s2690_s0 + $0x250] sm:$0xff]  ;;  %v103_v18 = vld [vmem:[%s2690_s0 + $0x260] sm:$0xff] }
  0xc4   :  { %645 = vmatmul.f32.gmra.mxu1 %v60_v22  ;;  %v102_v22 = vld [vmem:[%s2690_s0 + $0x258] sm:$0xff] }
  0xc5   :  { %v451_v24 = vpop.f32.mrf.mxu2 }
  0xc6   :  { %v452_v25 = vadd.f32 %v451_v24, %v387_v23 }
  0xc7   :  { %v324_v26 = vpop.f32.mrf.mxu0  ;;  %v516_v27 = vpop.f32.mrf.mxu3 }
  0xc8   :  { %v325_v30 = vadd.f32 %v1986_v36, %v324_v26  ;;  %v2058_v31 = vadd.f32 %v516_v27, %v452_v25  ;;  %v108_v27 = vld [vmem:[%s2690_s0 + $0x288] sm:$0xff] }
  0xc9   :  { %v389_v32 = vpop.f32.mrf.mxu1 }
  0xca   :  { %v390_v34 = vadd.f32 %v389_v32, %v325_v30  ;;  %583 = vmatmul.f32.gmra.mxu0 %v66_v28  ;;  %1321 = vmatmul.msk.f32.gmra.mxu2 %vm243_vm0, %v68_v29  ;;  %v110_v28 = vld [vmem:[%s2690_s0 + $0x298] sm:$0xff]  ;;  %v109_v32 = vld [vmem:[%s2690_s0 + $0x290] sm:$0xff] }
  0xcc   :  { %648 = vmatmul.f32.gmra.mxu1 %v67_v33 }
  0xcd   :  { %v454_v35 = vpop.f32.mrf.mxu2 }
  0xce   :  { %v455_v37 = vadd.f32 %v454_v35, %v390_v34 }
  0xcf   :  { %v327_v38 = vpop.f32.mrf.mxu0  ;;  %v519_v39 = vpop.f32.mrf.mxu3 }
  0xd0   :  { %v328_v42 = vadd.f32 %v1986_v36, %v327_v38  ;;  %v2071_v43 = vadd.f32 %v519_v39, %v455_v37  ;;  %v115_v38 = vld [vmem:[%s2690_s0 + $0x2c0] sm:$0xff]  ;;  %v117_v39 = vld [vmem:[%s2690_s0 + $0x2d0] sm:$0xff] }
  0xd1   :  { %v392_v44 = vpop.f32.mrf.mxu1 }
  0xd2   :  { %v393_v46 = vadd.f32 %v392_v44, %v328_v42  ;;  %586 = vmatmul.f32.gmra.mxu0 %v73_v40  ;;  %1322 = vmatmul.msk.f32.gmra.mxu2 %vm243_vm0, %v75_v41  ;;  %v116_v42 = vld [vmem:[%s2690_s0 + $0x2c8] sm:$0xff] }
  0xd4   :  { %651 = vmatmul.f32.gmra.mxu1 %v74_v45 }
  0xd5   :  { %v457_v47 = vpop.f32.mrf.mxu2 }
  0xd6   :  { %v458_v48 = vadd.f32 %v457_v47, %v393_v46 }
  0xd7   :  { %v330_v49 = vpop.f32.mrf.mxu0  ;;  %v522_v50 = vpop.f32.mrf.mxu3 }
  0xd8   :  { %v331_v54 = vadd.f32 %v1986_v36, %v330_v49  ;;  %v2084_v55 = vadd.f32 %v522_v50, %v458_v48  ;;  %v122_v48 = vld [vmem:[%s2690_s0 + $0x2f8] sm:$0xff]  ;;  %v124_v49 = vld [vmem:[%s2690_s0 + $0x308] sm:$0xff] }
  0xd9   :  { %v395_v56 = vpop.f32.mrf.mxu1 }
  0xda   :  { %v396_v58 = vadd.f32 %v395_v56, %v331_v54  ;;  %589 = vmatmul.f32.gmra.mxu0 %v80_v52  ;;  %1323 = vmatmul.msk.f32.gmra.mxu2 %vm243_vm0, %v82_v53  ;;  %v123_v53 = vld [vmem:[%s2690_s0 + $0x300] sm:$0xff] }
  0xdc   :  { %654 = vmatmul.f32.gmra.mxu1 %v81_v57 }
  0xdd   :  { %v460_v59 = vpop.f32.mrf.mxu2 }
  0xde   :  { %v461_v60 = vadd.f32 %v460_v59, %v396_v58  ;;  %v129_v59 = vld [vmem:[%s2690_s0 + $0x330] sm:$0xff] }
  0xdf   :  { %v2090_v61 = vpop.f32.mrf.mxu0  ;;  %v525_v63 = vpop.f32.mrf.mxu3 }
  0xe0   :  { %v2098_v2 = vadd.f32 %v525_v63, %v461_v60  ;;  %v131_v60 = vld [vmem:[%s2690_s0 + $0x340] sm:$0xff] }
  0xe1   :  { %v2100_v3 = vpop.f32.mrf.mxu1 }
  0xe2   :  { %592 = vmatmul.f32.gmra.mxu0 %v87_v0  ;;  %1324 = vmatmul.msk.f32.gmra.mxu2 %vm243_vm0, %v89_v1  ;;  %v130_v1 = vld [vmem:[%s2690_s0 + $0x338] sm:$0xff] }
  0xe4   :  { %657 = vmatmul.f32.gmra.mxu1 %v88_v4 }
  0xe5   :  { %v2106_v5 = vpop.f32.mrf.mxu2 }
  0xe7   :  { %v336_v6 = vpop.f32.mrf.mxu0 }
  0xe8   :  { %v337_v10 = vadd.f32 %v1986_v36, %v336_v6 }
  0xe9   :  { %v401_v11 = vpop.f32.mrf.mxu1 }
  0xea   :  { %v402_v13 = vadd.f32 %v401_v11, %v337_v10  ;;  %595 = vmatmul.f32.gmra.mxu0 %v94_v7  ;;  %1325 = vmatmul.msk.f32.gmra.mxu2 %vm243_vm0, %v96_v8  ;;  %v136_v10 = vld [vmem:[%s2690_s0 + $0x368] sm:$0xff]  ;;  %v138_v11 = vld [vmem:[%s2690_s0 + $0x378] sm:$0xff] }
  0xec   :  { %660 = vmatmul.f32.gmra.mxu1 %v95_v12 }
  0xed   :  { %v466_v14 = vpop.f32.mrf.mxu2 }
  0xee   :  { %v2119_v15 = vadd.f32 %v466_v14, %v402_v13  ;;  %v137_v14 = vld [vmem:[%s2690_s0 + $0x370] sm:$0xff]  ;;  %s1443_s0 = smov 16  }
  0xef   :  { %v339_v16 = vpop.f32.mrf.mxu0 }
  0xf0   :  { %v340_v19 = vadd.f32 %v1986_v36, %v339_v16 }
  0xf1   :  { %v404_v21 = vpop.f32.mrf.mxu1 }
  0xf2   :  { %v405_v23 = vadd.f32 %v404_v21, %v340_v19  ;;  %598 = vmatmul.f32.gmra.mxu0 %v101_v17  ;;  %1326 = vmatmul.msk.f32.gmra.mxu2 %vm243_vm0, %v103_v18 }
  0xf4   :  { %663 = vmatmul.f32.gmra.mxu1 %v102_v22 }
  0xf5   :  { %v469_v24 = vpop.f32.mrf.mxu2 }
  0xf6   :  { %v2132_v25 = vadd.f32 %v469_v24, %v405_v23 }
  0xf7   :  { %v342_v26 = vpop.f32.mrf.mxu0 }
  0xf8   :  { %v343_v29 = vadd.f32 %v1986_v36, %v342_v26 }
  0xf9   :  { %v407_v30 = vpop.f32.mrf.mxu1 }
  0xfa   :  { %v408_v33 = vadd.f32 %v407_v30, %v343_v29  ;;  %601 = vmatmul.f32.gmra.mxu0 %v108_v27  ;;  %1327 = vmatmul.msk.f32.gmra.mxu2 %vm243_vm0, %v110_v28 }
  0xfc   :  { %666 = vmatmul.f32.gmra.mxu1 %v109_v32 }
  0xfd   :  { %v472_v34 = vpop.f32.mrf.mxu2 }
  0xfe   :  { %v2145_v35 = vadd.f32 %v472_v34, %v408_v33 }
  0xff   :  { %v345_v37 = vpop.f32.mrf.mxu0 }
 0x100   :  { %v346_v40 = vadd.f32 %v1986_v36, %v345_v37 }
 0x101   :  { %v410_v41 = vpop.f32.mrf.mxu1 }
 0x102   :  { %v411_v44 = vadd.f32 %v410_v41, %v346_v40  ;;  %604 = vmatmul.f32.gmra.mxu0 %v115_v38  ;;  %1328 = vmatmul.msk.f32.gmra.mxu2 %vm243_vm0, %v117_v39 }
 0x104   :  { %669 = vmatmul.f32.gmra.mxu1 %v116_v42 }
 0x105   :  { %v475_v45 = vpop.f32.mrf.mxu2 }
 0x106   :  { %v2158_v46 = vadd.f32 %v475_v45, %v411_v44 }
 0x107   :  { %v348_v47 = vpop.f32.mrf.mxu0 }
 0x108   :  { %v349_v50 = vadd.f32 %v1986_v36, %v348_v47 }
 0x109   :  { %v413_v52 = vpop.f32.mrf.mxu1 }
 0x10a   :  { %v414_v54 = vadd.f32 %v413_v52, %v349_v50  ;;  %607 = vmatmul.f32.gmra.mxu0 %v122_v48  ;;  %1329 = vmatmul.msk.f32.gmra.mxu2 %vm243_vm0, %v124_v49 }
 0x10c   :  { %672 = vmatmul.f32.gmra.mxu1 %v123_v53 }
 0x10d   :  { %v478_v56 = vpop.f32.mrf.mxu2 }
 0x10e   :  { %v2171_v57 = vadd.f32 %v478_v56, %v414_v54 }
 0x10f   :  { %v351_v58 = vpop.f32.mrf.mxu0 }
 0x110   :  { %v352_v63 = vadd.f32 %v1986_v36, %v351_v58 }
 0x111   :  { %v416_v0 = vpop.f32.mrf.mxu1 }
 0x112   :  { %v417_v4 = vadd.f32 %v416_v0, %v352_v63  ;;  %610 = vmatmul.f32.gmra.mxu0 %v129_v59  ;;  %1330 = vmatmul.msk.f32.gmra.mxu2 %vm243_vm0, %v131_v60 }
 0x114   :  { %675 = vmatmul.f32.gmra.mxu1 %v130_v1 }
 0x115   :  { %v481_v6 = vpop.f32.mrf.mxu2 }
 0x116   :  { %v2184_v7 = vadd.f32 %v481_v6, %v417_v4 }
 0x117   :  { %v354_v8 = vpop.f32.mrf.mxu0 }
 0x118   :  { %v355_v12 = vadd.f32 %v1986_v36, %v354_v8 }
 0x119   :  { %v419_v13 = vpop.f32.mrf.mxu1 }
 0x11a   :  { %v420_v16 = vadd.f32 %v419_v13, %v355_v12  ;;  %613 = vmatmul.f32.gmra.mxu0 %v136_v10  ;;  %1331 = vmatmul.msk.f32.gmra.mxu2 %vm243_vm0, %v138_v11 }
 0x11c   :  { %678 = vmatmul.f32.gmra.mxu1 %v137_v14 }
 0x11d   :  { %v484_v17 = vpop.f32.mrf.mxu2 }
 0x11e   :  { %v2197_v18 = vadd.f32 %v484_v17, %v420_v16 }
 0x11f   :  { %v569_v19 = vpop.f32.mrf.mxu0 }
 0x120   :  { %v570_v21 = vadd.f32 %v569_v19, %v2006_v51 }
 0x121   :  { %v634_v22 = vpop.f32.mrf.mxu1 }
 0x122   :  { %v635_v23 = vadd.f32 %v634_v22, %v570_v21 }
 0x125   :  { %v699_v24 = vpop.f32.mrf.mxu2 }
 0x126   :  { %v700_v26 = vadd.f32 %v699_v24, %v635_v23  ;;  %v528_v23 = vpop.f32.mrf.mxu3 }
 0x127   :  { %v572_v27 = vpop.f32.mrf.mxu0 }
 0x128   :  { %v573_v28 = vadd.f32 %v572_v27, %v2019_v62  ;;  %v747_v33 = vmax.f32 %v700_v26, 0.0 }
 0x129   :  { %v637_v29 = vpop.f32.mrf.mxu1 }
 0x12a   :  { %v638_v30 = vadd.f32 %v637_v29, %v573_v28  ;;  %v779_v41 = vrot.slane %v747_v33, 1 }
 0x12d   :  { %v702_v32 = vpop.f32.mrf.mxu2 }
 0x12e   :  { %v703_v34 = vadd.f32 %v702_v32, %v638_v30 }
 0x12f   :  { %v575_v37 = vpop.f32.mrf.mxu0 }
 0x130   :  { %v748_v38 = vmax.f32 %v703_v34, 0.0  ;;  %v576_v39 = vadd.f32 %v575_v37, %v2032_v9 }
 0x131   :  { %v640_v40 = vpop.f32.mrf.mxu1 }
 0x132   :  { %v780_v51 = vrot.slane %v748_v38, 1  ;;  %v641_v42 = vadd.f32 %v640_v40, %v576_v39 }
 0x134   :  { %v781_v44 = vsel %vm778_vm1, %v779_v41, %v780_v51 }
 0x135   :  { %v809_v45 = vmax.f32 %v747_v33, %v781_v44  ;;  %v705_v47 = vpop.f32.mrf.mxu2  ;;  %v334_v33 = vadd.f32 %v1986_v36, %v2090_v61 }
 0x136   :  { %v706_v48 = vadd.f32 %v705_v47, %v641_v42 }
 0x137   :  { %v578_v62 = vpop.f32.mrf.mxu0  ;;  %v399_v40 = vadd.f32 %v2100_v3, %v334_v33 }
 0x138   :  { %v749_v49 = vmax.f32 %v706_v48, 0.0  ;;  %v579_v50 = vadd.f32 %v578_v62, %v2045_v20 }
 0x139   :  { %v643_v52 = vpop.f32.mrf.mxu1 }
 0x13a   :  { %v782_v53 = vrot.slane %v749_v49, 1  ;;  %v644_v54 = vadd.f32 %v643_v52, %v579_v50 }
 0x13c   :  { %v818_v56 = vsel %vm778_vm1, %v780_v51, %v782_v53  ;;  %v531_v51 = vpop.f32.mrf.mxu3 }
 0x13d   :  { %v834_v9 = vmax.f32 %v748_v38, %v818_v56  ;;  %v708_v58 = vpop.f32.mrf.mxu2 }
 0x13e   :  { %v709_v59 = vadd.f32 %v708_v58, %v644_v54 }
 0x13f   :  { %v2205_v60 = vmax.f32 %v809_v45, %v834_v9  ;;  %v581_v63 = vpop.f32.mrf.mxu0 }
 0x140   :  { %v750_v0 = vmax.f32 %v709_v59, 0.0  ;;  %v582_v1 = vadd.f32 %v581_v63, %v2058_v31 }
 0x141   :  { %v646_v4 = vpop.f32.mrf.mxu1 }
 0x142   :  { %v783_v6 = vrot.slane %v750_v0, 1  ;;  %v647_v8 = vadd.f32 %v646_v4, %v582_v1  ;;  %v532_v1 = vadd.f32 %v531_v51, %v2119_v15 }
 0x144   :  { %v784_v10 = vsel %vm778_vm1, %v782_v53, %v783_v6  ;;  %v534_v9 = vpop.f32.mrf.mxu3 }
 0x145   :  { %v810_v20 = vmax.f32 %v749_v49, %v784_v10  ;;  %v711_v11 = vpop.f32.mrf.mxu2 }
 0x146   :  { %v712_v12 = vadd.f32 %v711_v11, %v647_v8 }
 0x147   :  { %v584_v13 = vpop.f32.mrf.mxu0 }
 0x148   :  { %v751_v14 = vmax.f32 %v712_v12, 0.0  ;;  %v585_v16 = vadd.f32 %v584_v13, %v2071_v43 }
 0x149   :  { %v649_v17 = vpop.f32.mrf.mxu1 }
 0x14a   :  { %v785_v19 = vrot.slane %v751_v14, 1  ;;  %v650_v21 = vadd.f32 %v649_v17, %v585_v16 }
 0x14c   :  { %v819_v22 = vsel %vm778_vm1, %v783_v6, %v785_v19  ;;  %v537_v12 = vpop.f32.mrf.mxu3 }
 0x14d   :  { %v835_v24 = vmax.f32 %v750_v0, %v819_v22  ;;  %v714_v31 = vpop.f32.mrf.mxu2 }
 0x14e   :  { %v715_v26 = vadd.f32 %v714_v31, %v650_v21 }
 0x14f   :  { %v2211_v27 = vmax.f32 %v810_v20, %v835_v24  ;;  %v587_v28 = vpop.f32.mrf.mxu0 }
 0x150   :  { %v752_v29 = vmax.f32 %v715_v26, 0.0  ;;  %v588_v30 = vadd.f32 %v587_v28, %v2084_v55  ;;  %v464_v55 = vadd.f32 %v2106_v5, %v399_v40 }
 0x151   :  { %v652_v32 = vpop.f32.mrf.mxu1 }
 0x152   :  { %v786_v43 = vrot.slane %v752_v29, 1  ;;  %v653_v34 = vadd.f32 %v652_v32, %v588_v30  ;;  %v529_v50 = vadd.f32 %v528_v23, %v464_v55  ;;  %v538_v30 = vadd.f32 %v537_v12, %v2145_v35 }
 0x153   :  { %v855_v12 = vrot.slane %v2205_v60, 4 }
 0x154   :  { %v787_v37 = vsel %vm778_vm1, %v785_v19, %v786_v43  ;;  %v535_v19 = vadd.f32 %v534_v9, %v2132_v25  ;;  %v540_v28 = vpop.f32.mrf.mxu3 }
 0x155   :  { %v811_v38 = vmax.f32 %v751_v14, %v787_v37  ;;  %v717_v39 = vpop.f32.mrf.mxu2 }
 0x156   :  { %v718_v41 = vadd.f32 %v717_v39, %v653_v34 }
 0x157   :  { %v590_v42 = vpop.f32.mrf.mxu0 }
 0x158   :  { %v753_v44 = vmax.f32 %v718_v41, 0.0  ;;  %v591_v45 = vadd.f32 %v590_v42, %v2098_v2 }
 0x159   :  { %v655_v47 = vpop.f32.mrf.mxu1 }
 0x15a   :  { %v788_v48 = vrot.slane %v753_v44, 1  ;;  %v656_v62 = vadd.f32 %v655_v47, %v591_v45  ;;  %v541_v45 = vadd.f32 %v540_v28, %v2158_v46  ;;  %v867_v28 = vrot.slane %v2211_v27, 2 }
 0x15c   :  { %v820_v36 = vsel %vm778_vm1, %v786_v43, %v788_v48  ;;  %v543_v55 = vpop.f32.mrf.mxu3 }
 0x15d   :  { %v836_v61 = vmax.f32 %v752_v29, %v820_v36  ;;  %v720_v49 = vpop.f32.mrf.mxu2 }
 0x15e   :  { %v721_v52 = vadd.f32 %v720_v49, %v656_v62  ;;  %v859_v49 = vrot.slane %v2205_v60, 6 }
 0x15f   :  { %v2221_v53 = vmax.f32 %v811_v38, %v836_v61  ;;  %v593_v3 = vpop.f32.mrf.mxu0 }
 0x160   :  { %v754_v54 = vmax.f32 %v721_v52, 0.0  ;;  %v594_v56 = vadd.f32 %v593_v3, %v529_v50  ;;  %v851_v52 = vrot.slane %v2205_v60, 2 }
 0x161   :  { %v658_v58 = vpop.f32.mrf.mxu1 }
 0x162   :  { %v789_v59 = vrot.slane %v754_v54, 1  ;;  %v659_v63 = vadd.f32 %v658_v58, %v594_v56 }
 0x164   :  { %v790_v2 = vsel %vm778_vm1, %v788_v48, %v789_v59 }
 0x165   :  { %v812_v5 = vmax.f32 %v753_v44, %v790_v2  ;;  %v723_v0 = vpop.f32.mrf.mxu2 }
 0x166   :  { %v724_v4 = vadd.f32 %v723_v0, %v659_v63  ;;  %v544_v63 = vadd.f32 %v543_v55, %v2171_v57  ;;  %v1040_v0 = vld [vmem:[%s2693_s3 + $0x78] sm:$0xff]  ;;  %v546_v57 = vpop.f32.mrf.mxu3  ;;  %v1035_v55 = vld [vmem:[%s2693_s3 + $0x50] sm:$0xff] }
 0x167   :  { %v596_v6 = vpop.f32.mrf.mxu0  ;;  %1125 = vmatpush.msrb.mxu3 %v1040_v0 }
 0x168   :  { %v755_v8 = vmax.f32 %v724_v4, 0.0  ;;  %v597_v10 = vadd.f32 %v596_v6, %v532_v1  ;;  %v1039_v1 = vld [vmem:[%s2693_s3 + $0x70] sm:$0xff] }
 0x169   :  { %v661_v20 = vpop.f32.mrf.mxu1  ;;  %1126 = vmatpush.msrb.mxu3 %v1039_v1 }
 0x16a   :  { %v791_v11 = vrot.slane %v755_v8, 1  ;;  %v662_v14 = vadd.f32 %v661_v20, %v597_v10  ;;  %v1038_v20 = vld [vmem:[%s2693_s3 + $0x68] sm:$0xff] }
 0x16b   :  { %1127 = vmatpush.msrb.mxu3 %v1038_v20  ;;  %v1116_v20 = vld [vmem:[%s2693_s3 + $0x2d8] sm:$0xff] }
 0x16c   :  { %v821_v13 = vsel %vm778_vm1, %v789_v59, %v791_v11 }
 0x16d   :  { %v837_v16 = vmax.f32 %v754_v54, %v821_v13  ;;  %v726_v17 = vpop.f32.mrf.mxu2 }
 0x16e   :  { %v727_v21 = vadd.f32 %v726_v17, %v662_v14 }
 0x16f   :  { %v2227_v22 = vmax.f32 %v812_v5, %v837_v16  ;;  %v599_v23 = vpop.f32.mrf.mxu0 }
 0x170   :  { %v600_v24 = vadd.f32 %v599_v23, %v535_v19  ;;  %v756_v31 = vmax.f32 %v727_v21, 0.0  ;;  %v547_v23 = vadd.f32 %v546_v57, %v2184_v7 }
 0x171   :  { %v664_v15 = vpop.f32.mrf.mxu1 }
 0x172   :  { %v665_v26 = vadd.f32 %v664_v15, %v600_v24  ;;  %v792_v32 = vrot.slane %v756_v31, 1  ;;  %v1037_v15 = vld [vmem:[%s2693_s3 + $0x60] sm:$0xff] }
 0x173   :  { %1128 = vmatpush.msrb.mxu3 %v1037_v15 }
 0x174   :  { %v793_v25 = vsel %vm778_vm1, %v791_v11, %v792_v32 }
 0x175   :  { %v729_v29 = vpop.f32.mrf.mxu2  ;;  %v813_v51 = vmax.f32 %v755_v8, %v793_v25 }
 0x176   :  { %v730_v33 = vadd.f32 %v729_v29, %v665_v26 }
 0x177   :  { %v602_v43 = vpop.f32.mrf.mxu0 }
 0x178   :  { %v757_v34 = vmax.f32 %v730_v33, 0.0  ;;  %v603_v37 = vadd.f32 %v602_v43, %v538_v30  ;;  %v871_v33 = vrot.slane %v2211_v27, 4 }
 0x179   :  { %v667_v38 = vpop.f32.mrf.mxu1 }
 0x17a   :  { %v794_v39 = vrot.slane %v757_v34, 1  ;;  %v668_v41 = vadd.f32 %v667_v38, %v603_v37 }
 0x17c   :  { %v822_v40 = vsel %vm778_vm1, %v792_v32, %v794_v39  ;;  %v875_v32 = vrot.slane %v2211_v27, 6 }
 0x17d   :  { %v838_v42 = vmax.f32 %v756_v31, %v822_v40  ;;  %v732_v44 = vpop.f32.mrf.mxu2 }
 0x17e   :  { %v733_v47 = vadd.f32 %v732_v44, %v668_v41 }
 0x17f   :  { %v2233_v35 = vmax.f32 %v813_v51, %v838_v42  ;;  %v605_v48 = vpop.f32.mrf.mxu0 }
 0x180   :  { %v758_v62 = vmax.f32 %v733_v47, 0.0  ;;  %v606_v36 = vadd.f32 %v605_v48, %v541_v45 }
 0x181   :  { %v670_v61 = vpop.f32.mrf.mxu1  ;;  %v937_v50 = vrot.slane %v2233_v35, 6  ;;  %v929_v3 = vrot.slane %v2233_v35, 2  ;;  %v933_v6 = vrot.slane %v2233_v35, 4 }
 0x182   :  { %v795_v54 = vrot.slane %v758_v62, 1  ;;  %v671_v58 = vadd.f32 %v670_v61, %v606_v36  ;;  %v1104_v36 = vld [vmem:[%s2693_s3 + $0x278] sm:$0xff] }
 0x183   :  { %v1350_v56 = vpack.i.bf16 %v859_v49, %v937_v50  ;;  %v1340_v9 = vpack.i.bf16 %v851_v52, %v929_v3  ;;  %v1345_v14 = vpack.i.bf16 %v855_v12, %v933_v6  ;;  %v1120_v61 = vld [vmem:[%s2693_s3 + $0x2f8] sm:$0xff]  ;;  %1205 = vmatpush.msra.mxu0 %v1104_v36  ;;  %v1034_v50 = vld [vmem:[%s2693_s3 + $0x48] sm:$0xff]  ;;  %v1119_v52 = vld [vmem:[%s2693_s3 + $0x2f0] sm:$0xff] }
 0x184   :  { %v796_v46 = vsel %vm778_vm1, %v794_v39, %v795_v54  ;;  %v549_v39 = vpop.f32.mrf.mxu3  ;;  %1225 = vmatpush.msra.mxu1 %v1120_v61  ;;  %v1030_v12 = vld [vmem:[%s2693_s3 + $0x28] sm:$0xff]  ;;  %v1099_v61 = vld [vmem:[%s2693_s3 + $0x250] sm:$0xff] }
 0x185   :  { %v814_v59 = vmax.f32 %v757_v34, %v796_v46  ;;  %v735_v2 = vpop.f32.mrf.mxu2  ;;  %1351 = vrot.lane.b32.xlu1 %v1350_v56, %s1443_s0  ;;  %1341 = vrot.lane.b32.xlu0 %v1340_v9, %s1444_s27  ;;  %v550_v48 = vadd.f32 %v549_v39, %v2197_v18  ;;  %v1103_v18 = vld [vmem:[%s2693_s3 + $0x270] sm:$0xff]  ;;  %v1033_v9 = vld [vmem:[%s2693_s3 + $0x40] sm:$0xff] }
 0x186   :  { %v736_v5 = vadd.f32 %v735_v2, %v671_v58  ;;  %1206 = vmatpush.msra.mxu0 %v1103_v18  ;;  %1226 = vmatpush.msra.mxu1 %v1119_v52  ;;  %v1102_v46 = vld [vmem:[%s2693_s3 + $0x268] sm:$0xff]  ;;  %v1032_v2 = vld [vmem:[%s2693_s3 + $0x38] sm:$0xff]  ;;  %v1047_v52 = vld [vmem:[%s2693_s3 + $0xb0] sm:$0xff] }
 0x187   :  { %v608_v4 = vpop.f32.mrf.mxu0  ;;  %v1118_v58 = vld [vmem:[%s2693_s3 + $0x2e8] sm:$0xff]  ;;  %v1048_v18 = vld [vmem:[%s2693_s3 + $0xb8] sm:$0xff] }
 0x188   :  { %v759_v8 = vmax.f32 %v736_v5, 0.0  ;;  %v609_v10 = vadd.f32 %v608_v4, %v544_v63  ;;  %1207 = vmatpush.msra.mxu0 %v1102_v46  ;;  %1227 = vmatpush.msra.mxu1 %v1118_v58  ;;  %v1101_v63 = vld [vmem:[%s2693_s3 + $0x260] sm:$0xff]  ;;  %v1050_v36 = vld [vmem:[%s2693_s3 + $0xc8] sm:$0xff]  ;;  %v1044_v46 = vld [vmem:[%s2693_s3 + $0x98] sm:$0xff] }
 0x189   :  { %v673_v11 = vpop.f32.mrf.mxu1  ;;  %v1117_v5 = vld [vmem:[%s2693_s3 + $0x2e0] sm:$0xff]  ;;  %v1043_v58 = vld [vmem:[%s2693_s3 + $0x90] sm:$0xff] }
 0x18a   :  { %v797_v13 = vrot.slane %v759_v8, 1  ;;  %v674_v17 = vadd.f32 %v673_v11, %v609_v10  ;;  %1208 = vmatpush.msra.mxu0 %v1101_v63  ;;  %v1100_v10 = vld [vmem:[%s2693_s3 + $0x258] sm:$0xff]  ;;  %1228 = vmatpush.msra.mxu1 %v1117_v5  ;;  %v1041_v63 = vld [vmem:[%s2693_s3 + $0x80] sm:$0xff] }
 0x18b   :  { %v1113_v5 = vld [vmem:[%s2693_s3 + $0x2c0] sm:$0xff] }
 0x18c   :  { %v823_v16 = vsel %vm778_vm1, %v795_v54, %v797_v13  ;;  %1209 = vmatpush.msra.mxu0 %v1100_v10  ;;  %1229 = vmatpush.msra.mxu1 %v1116_v20  ;;  %v1094_v20 = vld [vmem:[%s2693_s3 + $0x228] sm:$0xff] }
 0x18d   :  { %v839_v19 = vmax.f32 %v758_v62, %v823_v16  ;;  %v738_v21 = vpop.f32.mrf.mxu2  ;;  %1346 = vrot.lane.b32.xlu0 %v1345_v14, %s1445_s11  ;;  %v884_v14 = vrot.slane %v2221_v53, 4  ;;  %v880_v16 = vrot.slane %v2221_v53, 2 }
 0x18e   :  { %v2257_v24 = vadd.f32 %v738_v21, %v674_v17  ;;  %v888_v21 = vrot.slane %v2221_v53, 6  ;;  %1210 = vmatpush.msra.mxu0 %v1099_v61 }
 0x18f   :  { %v847_v31 = vmax.f32 %v814_v59, %v839_v19  ;;  %v611_v26 = vpop.f32.mrf.mxu0 }
 0x190   :  { %v760_v29 = vmax.f32 %v2257_v24, 0.0  ;;  %v612_v30 = vadd.f32 %v611_v26, %v547_v23  ;;  %v1029_v24 = vld [vmem:[%s2693_s3 + $0x20] sm:$0xff] }
 0x191   :  { %v676_v43 = vpop.f32.mrf.mxu1  ;;  %v1355_v7 = vpack.i.bf16 %v2211_v27, %v847_v31  ;;  %v945_v34 = vrot.slane %v847_v31, 2  ;;  %v953_v37 = vrot.slane %v847_v31, 6  ;;  %v949_v38 = vrot.slane %v847_v31, 4  ;;  %v1036_v27 = vld [vmem:[%s2693_s3 + $0x58] sm:$0xff] }
 0x192   :  { %v798_v25 = vrot.slane %v760_v29, 1  ;;  %v677_v44 = vadd.f32 %v676_v43, %v612_v30  ;;  %1129 = vmatpush.msrb.mxu3 %v1036_v27  ;;  %v1054_v27 = vld [vmem:[%s2693_s3 + $0xe8] sm:$0xff] }
 0x193   :  { %1356 = vrot.lane.b32.xlu1 %v1355_v7, %s1446_s2  ;;  %v1360_v40 = vpack.i.bf16 %v867_v28, %v945_v34  ;;  %v1370_v41 = vpack.i.bf16 %v875_v32, %v953_v37  ;;  %v1365_v51 = vpack.i.bf16 %v871_v33, %v949_v38  ;;  %v1027_v33 = vld [vmem:[%s2693_s3 + $0x10] sm:$0xff]  ;;  %v896_v7 = vrot.slane %v2227_v22, 2  ;;  %v1026_v38 = vld [vmem:[%s2693_s3 + $0x8] sm:$0xff] }
 0x194   :  { %v799_v42 = vsel %vm778_vm1, %v797_v13, %v798_v25  ;;  %1130 = vmatpush.msrb.mxu3 %v1035_v55  ;;  %v900_v34 = vrot.slane %v2227_v22, 4  ;;  %v904_v37 = vrot.slane %v2227_v22, 6  ;;  %v1053_v55 = vld [vmem:[%s2693_s3 + $0xe0] sm:$0xff] }
 0x195   :  { %v815_v45 = vmax.f32 %v759_v8, %v799_v42  ;;  %v741_v47 = vpop.f32.mrf.mxu2  ;;  %1361 = vrot.lane.b32.xlu2 %v1360_v40, %s1447_s1  ;;  %1371 = vrot.lane.b32.xlu0 %v1370_v41, %s1448_s14  ;;  %v1031_v8 = vld [vmem:[%s2693_s3 + $0x30] sm:$0xff] }
 0x196   :  { %v742_v62 = vadd.f32 %v741_v47, %v677_v44  ;;  %1131 = vmatpush.msrb.mxu3 %v1034_v50  ;;  %v1056_v47 = vld [vmem:[%s2693_s3 + $0xf8] sm:$0xff]  ;;  %v1049_v50 = vld [vmem:[%s2693_s3 + $0xc0] sm:$0xff] }
 0x197   :  { %v614_v49 = vpop.f32.mrf.mxu0 }
 0x198   :  { %v761_v3 = vmax.f32 %v742_v62, 0.0  ;;  %v615_v54 = vadd.f32 %v614_v49, %v550_v48  ;;  %1132 = vmatpush.msrb.mxu3 %v1033_v9  ;;  %v1052_v48 = vld [vmem:[%s2693_s3 + $0xd8] sm:$0xff]  ;;  %v1051_v62 = vld [vmem:[%s2693_s3 + $0xd0] sm:$0xff]  ;;  %v1114_v9 = vld [vmem:[%s2693_s3 + $0x2c8] sm:$0xff] }
 0x199   :  { %v679_v56 = vpop.f32.mrf.mxu1  ;;  %v1115_v49 = vld [vmem:[%s2693_s3 + $0x2d0] sm:$0xff] }
 0x19a   :  { %v800_v59 = vrot.slane %v761_v3, 1  ;;  %v680_v1 = vadd.f32 %v679_v56, %v615_v54  ;;  %1133 = vmatpush.msrb.mxu3 %v1032_v2  ;;  %1230 = vmatpush.msra.mxu1 %v1115_v49  ;;  %v1098_v54 = vld [vmem:[%s2693_s3 + $0x248] sm:$0xff]  ;;  %v1045_v56 = vld [vmem:[%s2693_s3 + $0xa0] sm:$0xff]  ;;  %v1068_v49 = vld [vmem:[%s2693_s3 + $0x158] sm:$0xff] }
 0x19b   :  { %1211 = vmatpush.msra.mxu0 %v1098_v54  ;;  %v1097_v2 = vld [vmem:[%s2693_s3 + $0x240] sm:$0xff]  ;;  %v1066_v54 = vld [vmem:[%s2693_s3 + $0x148] sm:$0xff] }
 0x19c   :  { %v824_v0 = vsel %vm778_vm1, %v798_v25, %v800_v59  ;;  %1134 = vmatpush.msrb.mxu3 %v1031_v8  ;;  %v816_v30 = vmax.f32 %v761_v3, %v800_v59  ;;  %v1046_v3 = vld [vmem:[%s2693_s3 + $0xa8] sm:$0xff]  ;;  %1231 = vmatpush.msra.mxu1 %v1114_v9  ;;  %v1111_v8 = vld [vmem:[%s2693_s3 + $0x2b0] sm:$0xff] }
 0x19d   :  { %v840_v4 = vmax.f32 %v760_v29, %v824_v0  ;;  %v744_v6 = vpop.f32.mrf.mxu2  ;;  %1366 = vrot.lane.b32.xlu2 %v1365_v51, %s1449_s21  ;;  %v1028_v29 = vld [vmem:[%s2693_s3 + $0x18] sm:$0xff]  ;;  %v1025_v51 = vld [vmem:[%s2693_s3] sm:$0xff]  ;;  %v1042_v59 = vld [vmem:[%s2693_s3 + $0x88] sm:$0xff]  ;;  %1212 = vmatpush.msra.mxu0 %v1097_v2 }
 0x19e   :  { %v745_v57 = vadd.f32 %v744_v6, %v680_v1  ;;  %1135 = vmatpush.msrb.mxu3 %v1030_v12  ;;  %1232 = vmatpush.msra.mxu1 %v1113_v5  ;;  %v1096_v0 = vld [vmem:[%s2693_s3 + $0x238] sm:$0xff]  ;;  %v1093_v12 = vld [vmem:[%s2693_s3 + $0x220] sm:$0xff] }
 0x19f   :  { %v2322_v11 = vmax.f32 %v815_v45, %v840_v4  ;;  %1213 = vmatpush.msra.mxu0 %v1096_v0  ;;  %v1112_v1 = vld [vmem:[%s2693_s3 + $0x2b8] sm:$0xff]  ;;  %v1095_v4 = vld [vmem:[%s2693_s3 + $0x230] sm:$0xff] }
 0x1a0   :  { %v762_v13 = vmax.f32 %v745_v57, 0.0  ;;  %1136 = vmatpush.msrb.mxu3 %v1029_v24  ;;  %1233 = vmatpush.msra.mxu1 %v1112_v1 }
 0x1a1   :  { %v962_v17 = vrot.slane %v2322_v11, 4  ;;  %v958_v19 = vrot.slane %v2322_v11, 2  ;;  %v966_v23 = vrot.slane %v2322_v11, 6  ;;  %1214 = vmatpush.msra.mxu0 %v1095_v4  ;;  %v1062_v4 = vld [vmem:[%s2693_s3 + $0x128] sm:$0xff] }
 0x1a2   :  { %v825_v15 = vrot.slane %v762_v13, 1  ;;  %1137 = vmatpush.msrb.mxu3 %v1028_v29  ;;  %1234 = vmatpush.msra.mxu1 %v1111_v8 }
 0x1a3   :  { %v1380_v31 = vpack.i.bf16 %v884_v14, %v962_v17  ;;  %v1375_v26 = vpack.i.bf16 %v880_v16, %v958_v19  ;;  %v1385_v28 = vpack.i.bf16 %v888_v21, %v966_v23  ;;  %1215 = vmatpush.msra.mxu0 %v1094_v20  ;;  %v1110_v17 = vld [vmem:[%s2693_s3 + $0x2a8] sm:$0xff]  ;;  %v1092_v23 = vld [vmem:[%s2693_s3 + $0x218] sm:$0xff] }
 0x1a4   :  { %v841_v32 = vmax.f32 %v762_v13, %v825_v15  ;;  %1138 = vmatpush.msrb.mxu3 %v1027_v33  ;;  %1235 = vmatpush.msra.mxu1 %v1110_v17  ;;  %v1072_v33 = vld [vmem:[%s2693_s3 + $0x178] sm:$0xff] }
 0x1a5   :  { %1381 = vrot.lane.b32.xlu2 %v1380_v31, %s1445_s11  ;;  %1376 = vrot.lane.b32.xlu1 %v1375_v26, %s1444_s27  ;;  %v1091_v31 = vld [vmem:[%s2693_s3 + $0x210] sm:$0xff] }
 0x1a6   :  { %v849_v43 = vmax.f32 %v816_v30, %v841_v32  ;;  %1386 = vrot.lane.b32.xlu0 %v1385_v28, %s1443_s0  ;;  %1139 = vmatpush.msrb.mxu3 %v1026_v38 }
 0x1a7   :  { %1216 = vmatpush.msra.mxu0 %v1093_v12 }
 0x1a8   :  { %v974_v25 = vrot.slane %v849_v43, 2  ;;  %v1390_v39 = vpack.i.bf16 %v2227_v22, %v849_v43  ;;  %v978_v40 = vrot.slane %v849_v43, 4  ;;  %v982_v41 = vrot.slane %v849_v43, 6  ;;  %1140 = vmatpush.msrb.mxu3 %v1025_v51  ;;  %v1055_v22 = vld [vmem:[%s2693_s3 + $0xf0] sm:$0xff]  ;;  %v1090_v43 = vld [vmem:[%s2693_s3 + $0x208] sm:$0xff] }
 0x1a9   :  { %1217 = vmatpush.msra.mxu0 %v1092_v23 }
 0x1aa   :  { %v1395_v42 = vpack.i.bf16 %v896_v7, %v974_v25  ;;  %v1400_v44 = vpack.i.bf16 %v900_v34, %v978_v40  ;;  %v1405_v45 = vpack.i.bf16 %v904_v37, %v982_v41  ;;  %1145 = vmatpush.msra.mxu3 %v1056_v47  ;;  %v1109_v40 = vld [vmem:[%s2693_s3 + $0x2a0] sm:$0xff]  ;;  %v1070_v47 = vld [vmem:[%s2693_s3 + $0x168] sm:$0xff] }
 0x1ab   :  { %1218 = vmatpush.msra.mxu0 %v1091_v31  ;;  %1236 = vmatpush.msra.mxu1 %v1109_v40  ;;  %v1059_v31 = vld [vmem:[%s2693_s3 + $0x110] sm:$0xff] }
 0x1ac   :  { %1146 = vmatpush.msra.mxu3 %v1055_v22 }
 0x1ad   :  { %1396 = vrot.lane.b32.xlu2 %v1395_v42, %s1447_s1  ;;  %1391 = vrot.lane.b32.xlu1 %v1390_v39, %s1446_s2  ;;  %v1071_v39 = vld [vmem:[%s2693_s3 + $0x170] sm:$0xff]  ;;  %v1089_v42 = vld [vmem:[%s2693_s3 + $0x200] sm:$0xff] }
 0x1ae   :  { %1401 = vrot.lane.b32.xlu0 %v1400_v44, %s1449_s21  ;;  %1147 = vmatpush.msra.mxu3 %v1054_v27  ;;  %v1108_v44 = vld [vmem:[%s2693_s3 + $0x298] sm:$0xff] }
 0x1af   :  { %1219 = vmatpush.msra.mxu0 %v1090_v43  ;;  %1237 = vmatpush.msra.mxu1 %v1108_v44  ;;  %v1058_v43 = vld [vmem:[%s2693_s3 + $0x108] sm:$0xff]  ;;  %v1088_v44 = vld [vmem:[%s2693_s3 + $0x1f8] sm:$0xff] }
 0x1b0   :  { %1148 = vmatpush.msra.mxu3 %v1053_v55 }
 0x1b1   :  { %1220 = vmatpush.msra.mxu0 %v1089_v42 }
 0x1b2   :  { %1149 = vmatpush.msra.mxu3 %v1052_v48  ;;  %v1069_v48 = vld [vmem:[%s2693_s3 + $0x160] sm:$0xff] }
 0x1b4   :  { %1150 = vmatpush.msra.mxu3 %v1051_v62 }
 0x1b5   :  { %1406 = vrot.lane.b32.xlu1 %v1405_v45, %s1448_s14 }
 0x1b6   :  { %1151 = vmatpush.msra.mxu3 %v1050_v36  ;;  %v1107_v36 = vld [vmem:[%s2693_s3 + $0x290] sm:$0xff] }
 0x1b7   :  { %1238 = vmatpush.msra.mxu1 %v1107_v36 }
 0x1b8   :  { %1152 = vmatpush.msra.mxu3 %v1049_v50  ;;  %v1106_v50 = vld [vmem:[%s2693_s3 + $0x288] sm:$0xff] }
 0x1b9   :  { %1239 = vmatpush.msra.mxu1 %v1106_v50  ;;  %v1086_v50 = vld [vmem:[%s2693_s3 + $0x1e8] sm:$0xff] }
 0x1ba   :  { %1153 = vmatpush.msra.mxu3 %v1048_v18  ;;  %v1067_v18 = vld [vmem:[%s2693_s3 + $0x150] sm:$0xff] }
 0x1bc   :  { %1154 = vmatpush.msra.mxu3 %v1047_v52  ;;  %v1105_v52 = vld [vmem:[%s2693_s3 + $0x280] sm:$0xff] }
 0x1bd   :  { %1240 = vmatpush.msra.mxu1 %v1105_v52 }
 0x1be   :  { %1155 = vmatpush.msra.mxu3 %v1046_v3 }
 0x1c0   :  { %1156 = vmatpush.msra.mxu3 %v1045_v56  ;;  %v1065_v56 = vld [vmem:[%s2693_s3 + $0x140] sm:$0xff] }
 0x1c2   :  { %1157 = vmatpush.msra.mxu3 %v1044_v46  ;;  %v1064_v46 = vld [vmem:[%s2693_s3 + $0x138] sm:$0xff] }
 0x1c4   :  { %1158 = vmatpush.msra.mxu3 %v1043_v58 }
 0x1c6   :  { %1159 = vmatpush.msra.mxu3 %v1042_v59  ;;  %v1063_v59 = vld [vmem:[%s2693_s3 + $0x130] sm:$0xff] }
 0x1c8   :  { %1160 = vmatpush.msra.mxu3 %v1041_v63 }
 0x1ef   :  { %v2443_v13 = vpop.permute.xlu2 %1361 }
 0x1f0   :  { %v1363_v37 = vunpack.i.l.bf16 %v2443_v13  ;;  %v1364_v45 = vunpack.i.h.bf16 %v2443_v13 }
 0x1f7   :  { %v1342_v6 = vpop.permute.xlu0 %1341  ;;  %v1352_v10 = vpop.permute.xlu1 %1351 }
 0x1f8   :  { %v1343_v57 = vunpack.i.l.bf16 %v1342_v6  ;;  %v1344_v14 = vunpack.i.h.bf16 %v1342_v6  ;;  %v1354_v29 = vunpack.i.h.bf16 %v1352_v10  ;;  %v1353_v30 = vunpack.i.l.bf16 %v1352_v10  ;;  %v2491_v27 = vpop.permute.xlu2 %1366 }
 0x1f9   :  { %v1368_v6 = vunpack.i.l.bf16 %v2491_v27 }
 0x1fa   :  { %v986_v24 = vsel %vm908_vm2, %v2233_v35, %v1343_v57  ;;  %v909_v26 = vsel %vm908_vm2, %v2205_v60, %v1344_v14  ;;  %v1061_v57 = vld [vmem:[%s2693_s3 + $0x120] sm:$0xff] }
 0x1ff   :  { %v1347_v16 = vpop.permute.xlu0 %1346 }
 0x200   :  { %v1349_v19 = vunpack.i.h.bf16 %v1347_v16  ;;  %v1348_v21 = vunpack.i.l.bf16 %v1347_v16  ;;  %v1382_v9 = vpop.permute.xlu2 %1381 }
 0x201   :  { %v1384_v0 = vunpack.i.h.bf16 %v1382_v9  ;;  %v1383_v1 = vunpack.i.l.bf16 %v1382_v9 }
 0x202   :  { %v987_v15 = vsel %vm910_vm3, %v986_v24, %v1348_v21  ;;  %v911_v35 = vsel %vm910_vm3, %v909_v26, %v1349_v19  ;;  %v913_v38 = vsel %vm912_vm5, %v1349_v19, %v1354_v29  ;;  %v988_v25 = vsel %vm912_vm5, %v1348_v21, %v1353_v30 }
 0x203   :  { %v1006_v28 = vrot.slane %v987_v15, 7  ;;  %v1369_v26 = vunpack.i.h.bf16 %v2491_v27 }
 0x205   :  { %v1357_v32 = vpop.permute.xlu1 %1356  ;;  %v1019_v60 = vsel %vm1018_vm4, %v911_v35, %v1006_v28  ;;  %v918_v40 = vsel %vm243_vm0, %v1364_v45, %v1369_v26  ;;  %v1246_v26 = vld [vmem:[%s2695_s5] sm:$0xff] }
 0x206   :  { %v1359_v7 = vunpack.i.h.bf16 %v1357_v32  ;;  %v1358_v34 = vunpack.i.l.bf16 %v1357_v32  ;;  %1141 = vmatmul.f32.vlgmr.msrb.gmra.mxu3 %v1019_v60 }
 0x207   :  { %1165 = vmatpush.msrb.mxu3 %v1072_v33  ;;  %v2515_v3 = vpop.permute.xlu0 %1371 }
 0x208   :  { %v915_v41 = vsel %vm914_vm6, %v913_v38, %v1359_v7  ;;  %v989_v51 = vsel %vm914_vm6, %v988_v25, %v1358_v34  ;;  %v1373_v20 = vunpack.i.l.bf16 %v2515_v3  ;;  %v1397_v21 = vpop.permute.xlu2 %1396  ;;  %v1374_v32 = vunpack.i.h.bf16 %v2515_v3 }
 0x209   :  { %v990_v22 = vsel %vm916_vm7, %v989_v51, %v1363_v37  ;;  %1166 = vmatpush.msrb.mxu3 %v1071_v39  ;;  %v917_v62 = vsel %vm916_vm7, %v915_v41, %v1364_v45  ;;  %v1398_v30 = vunpack.i.l.bf16 %v1397_v21  ;;  %v1399_v38 = vunpack.i.h.bf16 %v1397_v21  ;;  %v1057_v39 = vld [vmem:[%s2693_s3 + $0x100] sm:$0xff]  ;;  %v1087_v45 = vld [vmem:[%s2693_s3 + $0x1f0] sm:$0xff] }
 0x20a   :  { %v1007_v55 = vrot.slane %v990_v22, 7  ;;  %v920_v42 = vsel %vm919_vm8, %v918_v40, %v1374_v32  ;;  %v1250_v21 = vld [vmem:[%s2695_s5 + $0x20] sm:$0xff] }
 0x20b   :  { %1167 = vmatpush.msrb.mxu3 %v1070_v47 }
 0x20c   :  { %v1020_v61 = vsel %vm1018_vm4, %v917_v62, %v1007_v55  ;;  %v1260_v62 = vld [vmem:[%s2695_s5 + $0x70] sm:$0xff] }
 0x20d   :  { %1168 = vmatpush.msrb.mxu3 %v1069_v48  ;;  %v1261_v48 = vld [vmem:[%s2695_s5 + $0x78] sm:$0xff] }
 0x20e   :  { %1161 = vmatmul.f32.vlgmr.msra.gmra.mxu3 %v1020_v61  ;;  %1266 = vmatpush.msra.mxu2 %v1261_v48 }
 0x20f   :  { %1169 = vmatpush.msrb.mxu3 %v1068_v49 }
 0x210   :  { %1267 = vmatpush.msra.mxu2 %v1260_v62 }
 0x211   :  { %1170 = vmatpush.msrb.mxu3 %v1067_v18  ;;  %v1259_v18 = vld [vmem:[%s2695_s5 + $0x68] sm:$0xff] }
 0x212   :  { %1268 = vmatpush.msra.mxu2 %v1259_v18 }
 0x213   :  { %1171 = vmatpush.msrb.mxu3 %v1066_v54 }
 0x215   :  { %1172 = vmatpush.msrb.mxu3 %v1065_v56  ;;  %v1085_v56 = vld [vmem:[%s2693_s3 + $0x1e0] sm:$0xff] }
 0x217   :  { %v1377_v58 = vpop.permute.xlu1 %1376  ;;  %1173 = vmatpush.msrb.mxu3 %v1064_v46  ;;  %v1258_v46 = vld [vmem:[%s2695_s5 + $0x60] sm:$0xff] }
 0x218   :  { %v1379_v2 = vunpack.i.h.bf16 %v1377_v58  ;;  %v1378_v63 = vunpack.i.l.bf16 %v1377_v58  ;;  %v1387_v5 = vpop.permute.xlu0 %1386  ;;  %v1084_v58 = vld [vmem:[%s2693_s3 + $0x1d8] sm:$0xff]  ;;  %1269 = vmatpush.msra.mxu2 %v1258_v46 }
 0x219   :  { %1174 = vmatpush.msrb.mxu3 %v1063_v59  ;;  %v1389_v17 = vunpack.i.h.bf16 %v1387_v5  ;;  %v1388_v19 = vunpack.i.l.bf16 %v1387_v5  ;;  %v1256_v5 = vld [vmem:[%s2695_s5 + $0x50] sm:$0xff] }
 0x21a   :  { %v921_v8 = vsel %vm908_vm2, %v2221_v53, %v1379_v2  ;;  %v993_v10 = vsel %vm908_vm2, %v2322_v11, %v1378_v63  ;;  %v1060_v53 = vld [vmem:[%s2693_s3 + $0x118] sm:$0xff]  ;;  %v991_v11 = vsel %vm243_vm0, %v1363_v37, %v1368_v6  ;;  %v1083_v63 = vld [vmem:[%s2693_s3 + $0x1d0] sm:$0xff]  ;;  %v1254_v6 = vld [vmem:[%s2695_s5 + $0x40] sm:$0xff] }
 0x21b   :  { %v922_v12 = vsel %vm910_vm3, %v921_v8, %v1384_v0  ;;  %v994_v14 = vsel %vm910_vm3, %v993_v10, %v1383_v1  ;;  %1175 = vmatpush.msrb.mxu3 %v1062_v4  ;;  %v992_v24 = vsel %vm919_vm8, %v991_v11, %v1373_v20  ;;  %v923_v35 = vsel %vm912_vm5, %v1384_v0, %v1389_v17  ;;  %v1257_v2 = vld [vmem:[%s2695_s5 + $0x58] sm:$0xff]  ;;  %v1082_v0 = vld [vmem:[%s2693_s3 + $0x1c8] sm:$0xff]  ;;  %v1081_v4 = vld [vmem:[%s2693_s3 + $0x1c0] sm:$0xff] }
 0x21c   :  { %v1009_v16 = vrot.slane %v994_v14, 7  ;;  %v995_v33 = vsel %vm912_vm5, %v1383_v1, %v1388_v19  ;;  %v1008_v7 = vrot.slane %v992_v24, 7  ;;  %1270 = vmatpush.msra.mxu2 %v1257_v2  ;;  %v1255_v1 = vld [vmem:[%s2695_s5 + $0x48] sm:$0xff]  ;;  %v1080_v8 = vld [vmem:[%s2693_s3 + $0x1b8] sm:$0xff]  ;;  %v1079_v10 = vld [vmem:[%s2693_s3 + $0x1b0] sm:$0xff] }
 0x21d   :  { %1176 = vmatpush.msrb.mxu3 %v1061_v57  ;;  %v1078_v20 = vld [vmem:[%s2693_s3 + $0x1a8] sm:$0xff]  ;;  %v1077_v57 = vld [vmem:[%s2693_s3 + $0x1a0] sm:$0xff]  ;;  %v1075_v14 = vld [vmem:[%s2693_s3 + $0x190] sm:$0xff] }
 0x21e   :  { %v2550_v23 = vsel %vm1018_vm4, %v922_v12, %v1009_v16  ;;  %v1021_v22 = vsel %vm1018_vm4, %v920_v42, %v1008_v7  ;;  %1271 = vmatpush.msra.mxu2 %v1256_v5  ;;  %v1076_v12 = vld [vmem:[%s2693_s3 + $0x198] sm:$0xff]  ;;  %v1074_v16 = vld [vmem:[%s2693_s3 + $0x188] sm:$0xff]  ;;  %v1073_v17 = vld [vmem:[%s2693_s3 + $0x180] sm:$0xff] }
 0x21f   :  { %v1392_v15 = vpop.permute.xlu1 %1391  ;;  %1177 = vmatpush.msrb.mxu3 %v1060_v53  ;;  %v1253_v19 = vld [vmem:[%s2695_s5 + $0x38] sm:$0xff]  ;;  %v1252_v53 = vld [vmem:[%s2695_s5 + $0x30] sm:$0xff]  ;;  %v1251_v11 = vld [vmem:[%s2695_s5 + $0x28] sm:$0xff] }
 0x220   :  { %v1394_v28 = vunpack.i.h.bf16 %v1392_v15  ;;  %v1393_v29 = vunpack.i.l.bf16 %v1392_v15  ;;  %v1402_v37 = vpop.permute.xlu0 %1401  ;;  %1272 = vmatpush.msra.mxu2 %v1255_v1  ;;  %v1248_v24 = vld [vmem:[%s2695_s5 + $0x10] sm:$0xff]  ;;  %v1247_v15 = vld [vmem:[%s2695_s5 + $0x8] sm:$0xff] }
 0x221   :  { %1178 = vmatpush.msrb.mxu3 %v1059_v31  ;;  %v1403_v51 = vunpack.i.l.bf16 %v1402_v37  ;;  %v1404_v55 = vunpack.i.h.bf16 %v1402_v37 }
 0x222   :  { %v924_v34 = vsel %vm914_vm6, %v923_v35, %v1394_v28  ;;  %v996_v60 = vsel %vm914_vm6, %v995_v33, %v1393_v29  ;;  %1273 = vmatpush.msra.mxu2 %v1254_v6  ;;  %v1411_v29 = vld [vmem:[%s2694_s4] ss:$0 sm:$0xff]  ;;  %s1450_s4 = smov [#allocation2]  }
 0x223   :  { %v997_v25 = vsel %vm916_vm7, %v996_v60, %v1398_v30  ;;  %1179 = vmatpush.msrb.mxu3 %v1058_v43  ;;  %v925_v47 = vsel %vm916_vm7, %v924_v34, %v1399_v38  ;;  %v998_v49 = vsel %vm243_vm0, %v1398_v30, %v1403_v51  ;;  %v926_v3 = vsel %vm243_vm0, %v1399_v38, %v1404_v55  ;;  %s1305_s14 = sshll.u32 %s1450_s4, 4  ;;  %s1306_s14 = int_to_ptr.vmem [resolvable:$true] %s1305_s14 }
 0x224   :  { %v1010_v41 = vrot.slane %v997_v25, 7  ;;  %1274 = vmatpush.msra.mxu2 %v1253_v19 }
 0x225   :  { %1180 = vmatpush.msrb.mxu3 %v1057_v39  ;;  %v1412_v39 = vld [vmem:[%s2696_s6] ss:$0 sm:$0xff] }
 0x226   :  { %v1023_v27 = vsel %vm1018_vm4, %v925_v47, %v1010_v41  ;;  %1181 = vmatmul.f32.vlgmr.msrb.gmra.mxu3 %v1021_v22  ;;  %1275 = vmatpush.msra.mxu2 %v1252_v53 }
 0x227   :  { %v1407_v13 = vpop.permute.xlu1 %1406  ;;  %1221 = vmatmul.f32.vlgmr.msra.gmra.mxu0 %v1023_v27  ;;  %1185 = vmatpush.msra.mxu3 %v1088_v44 }
 0x228   :  { %v1409_v36 = vunpack.i.h.bf16 %v1407_v13  ;;  %v1408_v61 = vunpack.i.l.bf16 %v1407_v13  ;;  %1276 = vmatpush.msra.mxu2 %v1251_v11 }
 0x229   :  { %1186 = vmatpush.msra.mxu3 %v1087_v45 }
 0x22a   :  { %v999_v52 = vsel %vm919_vm8, %v998_v49, %v1408_v61  ;;  %v927_v9 = vsel %vm919_vm8, %v926_v3, %v1409_v36  ;;  %1277 = vmatpush.msra.mxu2 %v1250_v21 }
 0x22b   :  { %v1011_v54 = vrot.slane %v999_v52, 7  ;;  %1187 = vmatpush.msra.mxu3 %v1086_v50 }
 0x22d   :  { %v1024_v59 = vsel %vm1018_vm4, %v927_v9, %v1011_v54  ;;  %1188 = vmatpush.msra.mxu3 %v1085_v56 }
 0x22e   :  { %1241 = vmatmul.f32.vlgmr.msra.gmra.mxu1 %v1024_v59 }
 0x22f   :  { %1189 = vmatpush.msra.mxu3 %v1084_v58 }
 0x231   :  { %1190 = vmatpush.msra.mxu3 %v1083_v63 }
 0x233   :  { %1191 = vmatpush.msra.mxu3 %v1082_v0 }
 0x235   :  { %1192 = vmatpush.msra.mxu3 %v1081_v4 }
 0x237   :  { %1193 = vmatpush.msra.mxu3 %v1080_v8 }
 0x239   :  { %1194 = vmatpush.msra.mxu3 %v1079_v10 }
 0x23b   :  { %1195 = vmatpush.msra.mxu3 %v1078_v20 }
 0x23d   :  { %1196 = vmatpush.msra.mxu3 %v1077_v57 }
 0x23f   :  { %1197 = vmatpush.msra.mxu3 %v1076_v12 }
 0x241   :  { %1198 = vmatpush.msra.mxu3 %v1075_v14 }
 0x243   :  { %1199 = vmatpush.msra.mxu3 %v1074_v16 }
 0x245   :  { %1200 = vmatpush.msra.mxu3 %v1073_v17 }
 0x246   :  { %1201 = vmatmul.f32.vlgmr.msra.gmra.mxu3 %v2550_v23  ;;  %v1249_v23 = vld [vmem:[%s2695_s5 + $0x18] sm:$0xff] }
 0x247   :  { %1278 = vmatpush.msra.mxu2 %v1249_v23 }
 0x249   :  { %1279 = vmatpush.msra.mxu2 %v1248_v24 }
 0x24b   :  { %1280 = vmatpush.msra.mxu2 %v1247_v15 }
 0x24d   :  { %1281 = vmatpush.msra.mxu2 %v1246_v26 }
 0x289   :  { %v1142_v31 = vpop.f32.mrf.mxu3 }
 0x28a   :  { %v1143_v32 = vadd.f32 %v1411_v29, %v1142_v31 }
 0x291   :  { %v1162_v28 = vpop.f32.mrf.mxu3 }
 0x292   :  { %v1163_v35 = vadd.f32 %v1162_v28, %v1143_v32 }
 0x2a4   :  { %v1222_v34 = vpop.f32.mrf.mxu0 }
 0x2a9   :  { %v1182_v30 = vpop.f32.mrf.mxu3 }
 0x2aa   :  { %v1183_v33 = vadd.f32 %v1182_v30, %v1163_v35 }
 0x2ab   :  { %v1242_v37 = vpop.f32.mrf.mxu1 }
 0x2c9   :  { %v1202_v43 = vpop.f32.mrf.mxu3 }
 0x2ca   :  { %v1203_v7 = vadd.f32 %v1202_v43, %v1183_v33 }
 0x2cc   :  { %v1223_v60 = vadd.f32 %v1222_v34, %v1203_v7 }
 0x2ce   :  { %v1243_v38 = vadd.f32 %v1242_v37, %v1223_v60 }
 0x2d0   :  { %v1245_v25 = vmax.f32 %v1243_v38, 0.0 }
 0x2d2   :  { %1282 = vmatmul.f32.vlgmr.msra.gmra.mxu2 %v1245_v25 }
 0x355   :  { %v1283_v40 = vpop.f32.mrf.mxu2 }
 0x356   :  { %v1284_v41 = vadd.f32 %v1412_v39, %v1283_v40 }
 0x358   :  { %v1287_v51 = vsel %vm1286_vm9, %v1284_v41, -inf }
 0x359   :  { %1288 = vmax.xlane.f32.xlu2 %v1287_v51 }
 0x3cc   :  { %v1289_v42 = vpop.xlane.xlu2 %1288 }
 0x3cd   :  { %v1290_v44 = vsub.f32 %v1284_v41, %v1289_v42 }
 0x3cf   :  { %v1291_v47 = vmul.f32 1.442695, %v1290_v44 }
 0x3d1   :  { %1413 = vpow2.f32 %v1291_v47 }
 0x3d7   :  { %v1414_v22 = vpop.eup %1413 }
 0x3d8   :  { %v1293_v27 = vsel %vm1286_vm9, %v1414_v22, 0.0 }
 0x3d9   :  { %1294 = vadd.xlane.f32.xlu0 %v1293_v27 }
 0x44c   :  { %v1295_v55 = vpop.xlane.xlu0 %1294 }
 0x44d   :  { %1415 = vlog2.f32 %v1295_v55 }
 0x453   :  { %v1416_v13 = vpop.eup %1415 }
 0x454   :  { %v1297_v45 = vmul.f32 0.6931472, %v1416_v13 }
 0x456   :  { %v1298_v48 = vsub.f32 %v1290_v44, %v1297_v45 }
 0x458   :  { %1299 = vst.msk [vmem:[#allocation2] sm:$0x3] %vm1286_vm9, %v1298_v48 }
 0x459   :  { %1310 = dma.vmem_to_hbm [thread:$0]  %s1306_s14, 32, %s1308_s13, [#allocation3]  }
 0x45a   :  { %1441 = dma.done.wait [#allocation3], 32  }
 0x45b   :  { %1442 = vsyncadd [#allocation3], 4294967264 }
 0x45c   :  { %1315 = vsyncpa [#allocation3], 1 }

</bundles_post_ra>
